<compile_context>
chip_gen: v5e
topology: v5e:2x2
jax: 0.10.0
libtpu: 0.0.40
codegen_flags: <defaults>
</compile_context>

<pallas_src>
import jax
import jax.numpy as jnp
from jax import lax
from jax.experimental import pallas as pl


# ----------------------------------------------------------------------------
# Fused kernel factory (static shapes baked in).
# Kernel ref order:
#   inputs : x_flat (T*B, E)  -- time-major, flattened in XLA
#            per layer: W_ih (Din, 8H), W_hh_blockdiag (2H, 8H), bias (1, 8H)
#              column layout (8H): gate-major [i | f | g | o], each gate block
#              is [fwd H | bwd H]; gate order matches PyTorch [i, f, g, o].
#            w_out (2H, C)
#   outputs: log_probs (B, C), h_n (2L, B, H), c_n (2L, B, H)
#   scratch: none (all activations vreg-resident)
# ----------------------------------------------------------------------------
def _make_fused_kernel(T, B, H, num_layers):
    H2, H8 = 2 * H, 8 * H

    def kernel(*refs):
        n_w = num_layers * 3
        x_ref = refs[0]
        w_refs = refs[1:1 + n_w]
        w_out_ref = refs[1 + n_w]
        lp_ref, hn_ref, cn_ref = refs[2 + n_w], refs[3 + n_w], refs[4 + n_w]

        # Lane masks (built once, reused; JAX does not CSE broadcasts).
        gate_lanes = lax.broadcasted_iota(jnp.int32, (B, H8), 1)
        fwd_gate_mask = (gate_lanes % H2) < H          # fwd lanes of every gate block
        half_lanes = lax.broadcasted_iota(jnp.int32, (B, H2), 1)
        fwd_half_mask = half_lanes < H                 # fwd half of [h_f | h_b]

        prev_hs = None                                 # per-step states of prev layer
        for layer in range(num_layers):
            wih_ref, whh_ref, b_ref = w_refs[3 * layer:3 * layer + 3]
            wih = wih_ref[...]
            bias = b_ref[...]
            whh = whh_ref[...]                         # (2H, 8H) block-diagonal

            # ---- hoisted input projection (off the recurrence chain) -------
            if layer == 0:
                # one (T*B, E) @ (E, 8H) matmul covering all steps & both dirs
                gx_all = jnp.dot(x_ref[...], wih,
                                 preferred_element_type=jnp.float32) + bias
                gx_list = [gx_all[t * B:(t + 1) * B, :] for t in range(T)]
            else:
                # previous layer output out[t] = [h_f(t) | h_b(t)] is a pure
                # lane select of two vreg-resident step states; the T small
                # projection matmuls are mutually independent -> MXU pipelines
                # them before the recurrence loop starts.
                gx_list = [
                    jnp.dot(jnp.where(fwd_half_mask,
                                      prev_hs[t], prev_hs[T - 1 - t]),
                            wih, preferred_element_type=jnp.float32) + bias
                    for t in range(T)]

            # ---- fused fwd+bwd recurrence (the only dependent chain) -------
            h = jnp.zeros((B, H2), jnp.float32)        # [h_fwd | h_bwd]
            c = jnp.zeros((B, H2), jnp.float32)        # [c_fwd | c_bwd]
            hs = []
            for s in range(T):
                tb = T - 1 - s                         # bwd-direction time index
                gx_step = jnp.where(fwd_gate_mask, gx_list[s], gx_list[tb])
                gates = jnp.dot(h, whh,
                                preferred_element_type=jnp.float32) + gx_step
                sig = jax.nn.sigmoid(gates)            # one EUP pass, all 8H lanes
                tan = jnp.tanh(gates)
                i_g = sig[:, 0 * H2:1 * H2]
                f_g = sig[:, 1 * H2:2 * H2]
                g_g = tan[:, 2 * H2:3 * H2]
                o_g = sig[:, 3 * H2:4 * H2]
                c = f_g * c + i_g * g_g
                h = o_g * jnp.tanh(c)
                hs.append(h)

            # ---- final states (epilogue; only 4 tiny stores per layer) -----
            # fwd finished at s=T-1 (t=T-1); bwd finished at s=T-1 (t=0).
            hn_ref[2 * layer + 0] = hs[-1][:, 0:H]
            hn_ref[2 * layer + 1] = hs[-1][:, H:H2]
            cn_ref[2 * layer + 0] = c[:, 0:H]
            cn_ref[2 * layer + 1] = c[:, H:H2]

            prev_hs = hs

        # -------------------- head: Linear + LogSoftmax ----------------------
        # out[:, -1, :] = [h_f(T-1) | h_b(T-1)] = fwd half of step T-1 state,
        # bwd half of step 0 state -> one lane select, one (B,2H)@(2H,C) matmul.
        out_last = jnp.where(fwd_half_mask, prev_hs[T - 1], prev_hs[0])
        logits = jnp.dot(out_last, w_out_ref[...],
                         preferred_element_type=jnp.float32)
        m = jnp.max(logits, axis=1, keepdims=True)
        sh = logits - m
        lse = jnp.log(jnp.sum(jnp.exp(sh), axis=1, keepdims=True))
        lp_ref[...] = sh - lse

    return kernel


def build_fused_call(T, B, E, H, num_layers, n_classes):
    del E  # shapes come from the refs themselves
    kernel = _make_fused_kernel(T, B, H, num_layers)
    out_shape = (
        jax.ShapeDtypeStruct((B, n_classes), jnp.float32),
        jax.ShapeDtypeStruct((num_layers * 2, B, H), jnp.float32),
        jax.ShapeDtypeStruct((num_layers * 2, B, H), jnp.float32),
    )
    # No grid / BlockSpecs / scratch: every operand fits trivially in VMEM as
    # one block and all intermediates stay in vregs.
    return pl.pallas_call(kernel, out_shape=out_shape)


# ----------------------------------------------------------------------------
# Kernel weight layout construction (from PyTorch nn.LSTM-layout tensors).
#   columns (8H): gate-major [i | f | g | o]; each gate block = [fwd H | bwd H]
# ----------------------------------------------------------------------------
def _fuse_wih(w_ih_f, w_ih_b):
    # (4H, Din) each, rows [i; f; g; o]  ->  (Din, 8H)
    H = w_ih_f.shape[0] // 4
    cols = []
    for g in range(4):
        cols.append(jnp.transpose(w_ih_f[g * H:(g + 1) * H, :]))
        cols.append(jnp.transpose(w_ih_b[g * H:(g + 1) * H, :]))
    return jnp.concatenate(cols, axis=1)


def _fuse_whh_blockdiag(w_hh_f, w_hh_b):
    # (4H, H) each -> (2H, 8H); rows [0:H] (h_f) drive fwd gate columns,
    # rows [H:2H] (h_b) drive bwd gate columns, zeros elsewhere.
    H = w_hh_f.shape[1]
    z = jnp.zeros((H, H), w_hh_f.dtype)
    cols = []
    for g in range(4):
        cols.append(jnp.concatenate(
            [jnp.transpose(w_hh_f[g * H:(g + 1) * H, :]), z], axis=0))
        cols.append(jnp.concatenate(
            [z, jnp.transpose(w_hh_b[g * H:(g + 1) * H, :])], axis=0))
    return jnp.concatenate(cols, axis=1)


def _fuse_bias(b_ih_f, b_hh_f, b_ih_b, b_hh_b):
    H = b_ih_f.shape[0] // 4
    bf = b_ih_f + b_hh_f
    bb = b_ih_b + b_hh_b
    segs = []
    for g in range(4):
        segs.append(bf[g * H:(g + 1) * H])
        segs.append(bb[g * H:(g + 1) * H])
    return jnp.concatenate(segs).reshape(1, 8 * H)


# ----------------------------------------------------------------------------
# Parameter setup (PyTorch nn.LSTM / nn.Linear shapes) + kernel weight layout.
# ----------------------------------------------------------------------------
def init_params(key, vocab, E, H, num_layers):
    keys = jax.random.split(key, 2 + num_layers * 2 * 4)
    emb_table = jax.random.normal(keys[0], (vocab, E), jnp.float32) * 0.1
    out_w = jax.random.normal(keys[1], (3, 2 * H), jnp.float32) * 0.1  # no bias

    scale = 1.0 / float(H) ** 0.5
    ki = 2
    lstm_raw = []        # PyTorch layout, for the pure-JAX reference
    flat_kernel = []     # per layer: W_ih_fused, W_hh_blockdiag, bias_fused
    for layer in range(num_layers):
        in_dim = E if layer == 0 else 2 * H
        raw_dirs = []
        for _d in range(2):  # forward, backward
            w_ih = jax.random.uniform(keys[ki + 0], (4 * H, in_dim),
                                      jnp.float32, -scale, scale)
            w_hh = jax.random.uniform(keys[ki + 1], (4 * H, H),
                                      jnp.float32, -scale, scale)
            b_ih = jax.random.uniform(keys[ki + 2], (4 * H,),
                                      jnp.float32, -scale, scale)
            b_hh = jax.random.uniform(keys[ki + 3], (4 * H,),
                                      jnp.float32, -scale, scale)
            ki += 4
            raw_dirs.append((w_ih, w_hh, b_ih, b_hh))
        (wih_f, whh_f, bih_f, bhh_f), (wih_b, whh_b, bih_b, bhh_b) = raw_dirs
        flat_kernel += [
            _fuse_wih(wih_f, wih_b),
            _fuse_whh_blockdiag(whh_f, whh_b),
            _fuse_bias(bih_f, bhh_f, bih_b, bhh_b),
        ]
        lstm_raw.append(raw_dirs)
    return emb_table, out_w, lstm_raw, flat_kernel


# ----------------------------------------------------------------------------
# Pure-JAX reference (mirrors torch.nn.LSTM semantics) for correctness check.
# ----------------------------------------------------------------------------
def _ref_lstm_dir(x, w_ih, w_hh, b_ih, b_hh):
    B, T, _ = x.shape
    H = w_hh.shape[1]

    def step(carry, x_t):
        h, c = carry
        gates = x_t @ w_ih.T + b_ih + h @ w_hh.T + b_hh
        i, f, g, o = jnp.split(gates, 4, axis=-1)
        c = jax.nn.sigmoid(f) * c + jax.nn.sigmoid(i) * jnp.tanh(g)
        h = jax.nn.sigmoid(o) * jnp.tanh(c)
        return (h, c), h

    init = (jnp.zeros((B, H), jnp.float32), jnp.zeros((B, H), jnp.float32))
    (hN, cN), hs = lax.scan(step, init, jnp.transpose(x, (1, 0, 2)))
    return jnp.transpose(hs, (1, 0, 2)), hN, cN


def reference_forward(x_idx, emb_table, lstm_raw, out_w):
    x = jnp.take(emb_table, x_idx, axis=0)
    h_list, c_list = [], []
    for (fwd, bwd) in lstm_raw:
        out_f, hN_f, cN_f = _ref_lstm_dir(x, *fwd)
        out_b_rev, hN_b, cN_b = _ref_lstm_dir(x[:, ::-1, :], *bwd)
        x = jnp.concatenate([out_f, out_b_rev[:, ::-1, :]], axis=-1)
        h_list += [hN_f, hN_b]
        c_list += [cN_f, cN_b]
    logits = x[:, -1, :] @ out_w.T
    log_probs = jax.nn.log_softmax(logits, axis=1)
    return log_probs, (jnp.stack(h_list, 0), jnp.stack(c_list, 0))


if __name__ == "__main__":
    B, T, VOCAB, E, H, NUM_LAYERS, N_CLASSES = 2, 8, 16, 32, 32, 2, 3

    key = jax.random.PRNGKey(0)
    k_param, k_x = jax.random.split(key)
    emb_table, out_w, lstm_raw, flat_w = init_params(k_param, VOCAB, E, H,
                                                     NUM_LAYERS)
    x_idx = jax.random.randint(k_x, (B, T), 0, VOCAB, dtype=jnp.int32)

    call_fn = build_fused_call(T, B, E, H, NUM_LAYERS, N_CLASSES)
    out_w_t = jnp.transpose(out_w)  # (2H, 3)

    @jax.jit
    def forward(idx):
        # embedding lookup in XLA, already time-major & flattened: (T*B, E)
        x_flat = jnp.take(emb_table, jnp.transpose(idx),
                          axis=0).reshape(T * B, E)
        lp, h_n, c_n = call_fn(x_flat, *flat_w, out_w_t)
        return lp, (h_n, c_n)

    log_probs, (h_n, c_n) = forward(x_idx)
    jax.block_until_ready((log_probs, h_n, c_n))

    # correctness check against the pure-JAX reference
    ref_lp, (ref_h, ref_c) = reference_forward(x_idx, emb_table, lstm_raw,
                                               out_w)
    assert log_probs.shape == (B, N_CLASSES)
    assert h_n.shape == (NUM_LAYERS * 2, B, H) and c_n.shape == h_n.shape
    assert jnp.max(jnp.abs(log_probs - ref_lp)) < 1e-3
    assert jnp.max(jnp.abs(h_n - ref_h)) < 1e-3
    assert jnp.max(jnp.abs(c_n - ref_c)) < 1e-3

    print("KERNEL_OK")
</pallas_src>

<mosaic_0001>
module attributes {stable_mosaic.version = 11 : i64} {
  func.func @kernel(%arg0: memref<16x32xf32, #tpu.memory_space<vmem>>, %arg1: memref<32x256xf32, #tpu.memory_space<vmem>>, %arg2: memref<64x256xf32, #tpu.memory_space<vmem>>, %arg3: memref<1x256xf32, #tpu.memory_space<vmem>>, %arg4: memref<64x256xf32, #tpu.memory_space<vmem>>, %arg5: memref<64x256xf32, #tpu.memory_space<vmem>>, %arg6: memref<1x256xf32, #tpu.memory_space<vmem>>, %arg7: memref<64x3xf32, #tpu.memory_space<vmem>>, %arg8: memref<2x3xf32, #tpu.memory_space<vmem>>, %arg9: memref<4x2x32xf32, #tpu.memory_space<vmem>>, %arg10: memref<4x2x32xf32, #tpu.memory_space<vmem>>) attributes {dimension_semantics = [], scalar_prefetch = 0 : i64, scratch_operands = 0 : i64, tpu.core_type = #tpu.core_type<tc>} {
    %0 = tpu.iota {dimensions = array<i32: 1>} : vector<2x256xi32>
    %c64_i32 = arith.constant 64 : i32
    %c0_i32 = arith.constant 0 : i32
    %1 = arith.cmpi eq, %c64_i32, %c0_i32 : i32
    %c1_i32 = arith.constant 1 : i32
    %2 = arith.select %1, %c1_i32, %c64_i32 : i32
    %3 = vector.broadcast %2 : i32 to vector<2x256xi32>
    %4 = arith.remsi %0, %3 : vector<2x256xi32>
    %c0_i32_0 = arith.constant 0 : i32
    %5 = vector.broadcast %c0_i32_0 : i32 to vector<2x256xi32>
    %6 = arith.cmpi ne, %4, %5 : vector<2x256xi32>
    %c0_i32_1 = arith.constant 0 : i32
    %7 = vector.broadcast %c0_i32_1 : i32 to vector<2x256xi32>
    %8 = arith.cmpi slt, %4, %7 : vector<2x256xi32>
    %c0_i32_2 = arith.constant 0 : i32
    %9 = arith.cmpi slt, %2, %c0_i32_2 : i32
    %10 = vector.broadcast %9 : i1 to vector<2x256xi1>
    %11 = vector.broadcast %10 : vector<2x256xi1> to vector<2x256xi1>
    %12 = arith.xori %8, %11 : vector<2x256xi1>
    %13 = arith.andi %12, %6 : vector<2x256xi1>
    %14 = vector.broadcast %2 : i32 to vector<2x256xi32>
    %15 = arith.addi %4, %14 : vector<2x256xi32>
    %16 = arith.select %13, %15, %4 : vector<2x256xi1>, vector<2x256xi32>
    %c32_i32 = arith.constant 32 : i32
    %17 = vector.broadcast %c32_i32 : i32 to vector<2x256xi32>
    %18 = arith.cmpi slt, %16, %17 : vector<2x256xi32>
    %19 = tpu.iota {dimensions = array<i32: 1>} : vector<2x64xi32>
    %c32_i32_3 = arith.constant 32 : i32
    %20 = vector.broadcast %c32_i32_3 : i32 to vector<2x64xi32>
    %21 = arith.cmpi slt, %19, %20 : vector<2x64xi32>
    %c0 = arith.constant 0 : index
    %c0_4 = arith.constant 0 : index
    %22 = vector.load %arg1[%c0, %c0_4] : memref<32x256xf32, #tpu.memory_space<vmem>>, vector<32x256xf32>
    %c0_5 = arith.constant 0 : index
    %c0_6 = arith.constant 0 : index
    %23 = vector.load %arg3[%c0_5, %c0_6] : memref<1x256xf32, #tpu.memory_space<vmem>>, vector<1x256xf32>
    %c0_7 = arith.constant 0 : index
    %c0_8 = arith.constant 0 : index
    %24 = vector.load %arg2[%c0_7, %c0_8] : memref<64x256xf32, #tpu.memory_space<vmem>>, vector<64x256xf32>
    %c0_9 = arith.constant 0 : index
    %c0_10 = arith.constant 0 : index
    %25 = vector.load %arg0[%c0_9, %c0_10] : memref<16x32xf32, #tpu.memory_space<vmem>>, vector<16x32xf32>
    %cst = arith.constant dense<0.000000e+00> : vector<16x256xf32>
    %26 = tpu.matmul %25, %22, %cst {dimension_numbers = #tpu.dot_dimension_numbers<[1], [0], [0], [1], [0, 0, 1, 1], [], []>} : vector<16x32xf32>, vector<32x256xf32>, vector<16x256xf32> -> vector<16x256xf32>
    %27 = vector.broadcast %23 : vector<1x256xf32> to vector<16x256xf32>
    %28 = arith.addf %26, %27 : vector<16x256xf32>
    %29 = vector.extract_strided_slice %28 {offsets = [0, 0], sizes = [2, 256], strides = [1, 1]} : vector<16x256xf32> to vector<2x256xf32>
    %30 = vector.extract_strided_slice %28 {offsets = [2, 0], sizes = [2, 256], strides = [1, 1]} : vector<16x256xf32> to vector<2x256xf32>
    %31 = vector.extract_strided_slice %28 {offsets = [4, 0], sizes = [2, 256], strides = [1, 1]} : vector<16x256xf32> to vector<2x256xf32>
    %32 = vector.extract_strided_slice %28 {offsets = [6, 0], sizes = [2, 256], strides = [1, 1]} : vector<16x256xf32> to vector<2x256xf32>
    %33 = vector.extract_strided_slice %28 {offsets = [8, 0], sizes = [2, 256], strides = [1, 1]} : vector<16x256xf32> to vector<2x256xf32>
    %34 = vector.extract_strided_slice %28 {offsets = [10, 0], sizes = [2, 256], strides = [1, 1]} : vector<16x256xf32> to vector<2x256xf32>
    %35 = vector.extract_strided_slice %28 {offsets = [12, 0], sizes = [2, 256], strides = [1, 1]} : vector<16x256xf32> to vector<2x256xf32>
    %36 = vector.extract_strided_slice %28 {offsets = [14, 0], sizes = [2, 256], strides = [1, 1]} : vector<16x256xf32> to vector<2x256xf32>
    %cst_11 = arith.constant 0.000000e+00 : f32
    %37 = vector.broadcast %cst_11 : f32 to vector<2x64xf32>
    %cst_12 = arith.constant 0.000000e+00 : f32
    %38 = vector.broadcast %cst_12 : f32 to vector<2x64xf32>
    %39 = arith.select %18, %29, %36 : vector<2x256xi1>, vector<2x256xf32>
    %cst_13 = arith.constant dense<0.000000e+00> : vector<2x256xf32>
    %40 = tpu.matmul %37, %24, %cst_13 {dimension_numbers = #tpu.dot_dimension_numbers<[1], [0], [0], [1], [0, 0, 1, 1], [], []>} : vector<2x64xf32>, vector<64x256xf32>, vector<2x256xf32> -> vector<2x256xf32>
    %41 = arith.addf %40, %39 : vector<2x256xf32>
    %42 = arith.negf %41 : vector<2x256xf32>
    %43 = math.exp %42 : vector<2x256xf32>
    %cst_14 = arith.constant 1.000000e+00 : f32
    %44 = vector.broadcast %cst_14 : f32 to vector<2x256xf32>
    %45 = arith.addf %44, %43 : vector<2x256xf32>
    %46 = arith.divf %44, %45 : vector<2x256xf32>
    %47 = math.tanh %41 : vector<2x256xf32>
    %48 = vector.extract_strided_slice %46 {offsets = [0, 0], sizes = [2, 64], strides = [1, 1]} : vector<2x256xf32> to vector<2x64xf32>
    %49 = vector.extract_strided_slice %46 {offsets = [0, 64], sizes = [2, 64], strides = [1, 1]} : vector<2x256xf32> to vector<2x64xf32>
    %50 = vector.extract_strided_slice %47 {offsets = [0, 128], sizes = [2, 64], strides = [1, 1]} : vector<2x256xf32> to vector<2x64xf32>
    %51 = vector.extract_strided_slice %46 {offsets = [0, 192], sizes = [2, 64], strides = [1, 1]} : vector<2x256xf32> to vector<2x64xf32>
    %52 = arith.mulf %49, %38 : vector<2x64xf32>
    %53 = arith.mulf %48, %50 : vector<2x64xf32>
    %54 = arith.addf %52, %53 : vector<2x64xf32>
    %55 = math.tanh %54 : vector<2x64xf32>
    %56 = arith.mulf %51, %55 : vector<2x64xf32>
    %57 = arith.select %18, %30, %35 : vector<2x256xi1>, vector<2x256xf32>
    %cst_15 = arith.constant dense<0.000000e+00> : vector<2x256xf32>
    %58 = tpu.matmul %56, %24, %cst_15 {dimension_numbers = #tpu.dot_dimension_numbers<[1], [0], [0], [1], [0, 0, 1, 1], [], []>} : vector<2x64xf32>, vector<64x256xf32>, vector<2x256xf32> -> vector<2x256xf32>
    %59 = arith.addf %58, %57 : vector<2x256xf32>
    %60 = arith.negf %59 : vector<2x256xf32>
    %61 = math.exp %60 : vector<2x256xf32>
    %cst_16 = arith.constant 1.000000e+00 : f32
    %62 = vector.broadcast %cst_16 : f32 to vector<2x256xf32>
    %63 = arith.addf %62, %61 : vector<2x256xf32>
    %64 = arith.divf %62, %63 : vector<2x256xf32>
    %65 = math.tanh %59 : vector<2x256xf32>
    %66 = vector.extract_strided_slice %64 {offsets = [0, 0], sizes = [2, 64], strides = [1, 1]} : vector<2x256xf32> to vector<2x64xf32>
    %67 = vector.extract_strided_slice %64 {offsets = [0, 64], sizes = [2, 64], strides = [1, 1]} : vector<2x256xf32> to vector<2x64xf32>
    %68 = vector.extract_strided_slice %65 {offsets = [0, 128], sizes = [2, 64], strides = [1, 1]} : vector<2x256xf32> to vector<2x64xf32>
    %69 = vector.extract_strided_slice %64 {offsets = [0, 192], sizes = [2, 64], strides = [1, 1]} : vector<2x256xf32> to vector<2x64xf32>
    %70 = arith.mulf %67, %54 : vector<2x64xf32>
    %71 = arith.mulf %66, %68 : vector<2x64xf32>
    %72 = arith.addf %70, %71 : vector<2x64xf32>
    %73 = math.tanh %72 : vector<2x64xf32>
    %74 = arith.mulf %69, %73 : vector<2x64xf32>
    %75 = arith.select %18, %31, %34 : vector<2x256xi1>, vector<2x256xf32>
    %cst_17 = arith.constant dense<0.000000e+00> : vector<2x256xf32>
    %76 = tpu.matmul %74, %24, %cst_17 {dimension_numbers = #tpu.dot_dimension_numbers<[1], [0], [0], [1], [0, 0, 1, 1], [], []>} : vector<2x64xf32>, vector<64x256xf32>, vector<2x256xf32> -> vector<2x256xf32>
    %77 = arith.addf %76, %75 : vector<2x256xf32>
    %78 = arith.negf %77 : vector<2x256xf32>
    %79 = math.exp %78 : vector<2x256xf32>
    %cst_18 = arith.constant 1.000000e+00 : f32
    %80 = vector.broadcast %cst_18 : f32 to vector<2x256xf32>
    %81 = arith.addf %80, %79 : vector<2x256xf32>
    %82 = arith.divf %80, %81 : vector<2x256xf32>
    %83 = math.tanh %77 : vector<2x256xf32>
    %84 = vector.extract_strided_slice %82 {offsets = [0, 0], sizes = [2, 64], strides = [1, 1]} : vector<2x256xf32> to vector<2x64xf32>
    %85 = vector.extract_strided_slice %82 {offsets = [0, 64], sizes = [2, 64], strides = [1, 1]} : vector<2x256xf32> to vector<2x64xf32>
    %86 = vector.extract_strided_slice %83 {offsets = [0, 128], sizes = [2, 64], strides = [1, 1]} : vector<2x256xf32> to vector<2x64xf32>
    %87 = vector.extract_strided_slice %82 {offsets = [0, 192], sizes = [2, 64], strides = [1, 1]} : vector<2x256xf32> to vector<2x64xf32>
    %88 = arith.mulf %85, %72 : vector<2x64xf32>
    %89 = arith.mulf %84, %86 : vector<2x64xf32>
    %90 = arith.addf %88, %89 : vector<2x64xf32>
    %91 = math.tanh %90 : vector<2x64xf32>
    %92 = arith.mulf %87, %91 : vector<2x64xf32>
    %93 = arith.select %18, %32, %33 : vector<2x256xi1>, vector<2x256xf32>
    %cst_19 = arith.constant dense<0.000000e+00> : vector<2x256xf32>
    %94 = tpu.matmul %92, %24, %cst_19 {dimension_numbers = #tpu.dot_dimension_numbers<[1], [0], [0], [1], [0, 0, 1, 1], [], []>} : vector<2x64xf32>, vector<64x256xf32>, vector<2x256xf32> -> vector<2x256xf32>
    %95 = arith.addf %94, %93 : vector<2x256xf32>
    %96 = arith.negf %95 : vector<2x256xf32>
    %97 = math.exp %96 : vector<2x256xf32>
    %cst_20 = arith.constant 1.000000e+00 : f32
    %98 = vector.broadcast %cst_20 : f32 to vector<2x256xf32>
    %99 = arith.addf %98, %97 : vector<2x256xf32>
    %100 = arith.divf %98, %99 : vector<2x256xf32>
    %101 = math.tanh %95 : vector<2x256xf32>
    %102 = vector.extract_strided_slice %100 {offsets = [0, 0], sizes = [2, 64], strides = [1, 1]} : vector<2x256xf32> to vector<2x64xf32>
    %103 = vector.extract_strided_slice %100 {offsets = [0, 64], sizes = [2, 64], strides = [1, 1]} : vector<2x256xf32> to vector<2x64xf32>
    %104 = vector.extract_strided_slice %101 {offsets = [0, 128], sizes = [2, 64], strides = [1, 1]} : vector<2x256xf32> to vector<2x64xf32>
    %105 = vector.extract_strided_slice %100 {offsets = [0, 192], sizes = [2, 64], strides = [1, 1]} : vector<2x256xf32> to vector<2x64xf32>
    %106 = arith.mulf %103, %90 : vector<2x64xf32>
    %107 = arith.mulf %102, %104 : vector<2x64xf32>
    %108 = arith.addf %106, %107 : vector<2x64xf32>
    %109 = math.tanh %108 : vector<2x64xf32>
    %110 = arith.mulf %105, %109 : vector<2x64xf32>
    %111 = arith.select %18, %33, %32 : vector<2x256xi1>, vector<2x256xf32>
    %cst_21 = arith.constant dense<0.000000e+00> : vector<2x256xf32>
    %112 = tpu.matmul %110, %24, %cst_21 {dimension_numbers = #tpu.dot_dimension_numbers<[1], [0], [0], [1], [0, 0, 1, 1], [], []>} : vector<2x64xf32>, vector<64x256xf32>, vector<2x256xf32> -> vector<2x256xf32>
    %113 = arith.addf %112, %111 : vector<2x256xf32>
    %114 = arith.negf %113 : vector<2x256xf32>
    %115 = math.exp %114 : vector<2x256xf32>
    %cst_22 = arith.constant 1.000000e+00 : f32
    %116 = vector.broadcast %cst_22 : f32 to vector<2x256xf32>
    %117 = arith.addf %116, %115 : vector<2x256xf32>
    %118 = arith.divf %116, %117 : vector<2x256xf32>
    %119 = math.tanh %113 : vector<2x256xf32>
    %120 = vector.extract_strided_slice %118 {offsets = [0, 0], sizes = [2, 64], strides = [1, 1]} : vector<2x256xf32> to vector<2x64xf32>
    %121 = vector.extract_strided_slice %118 {offsets = [0, 64], sizes = [2, 64], strides = [1, 1]} : vector<2x256xf32> to vector<2x64xf32>
    %122 = vector.extract_strided_slice %119 {offsets = [0, 128], sizes = [2, 64], strides = [1, 1]} : vector<2x256xf32> to vector<2x64xf32>
    %123 = vector.extract_strided_slice %118 {offsets = [0, 192], sizes = [2, 64], strides = [1, 1]} : vector<2x256xf32> to vector<2x64xf32>
    %124 = arith.mulf %121, %108 : vector<2x64xf32>
    %125 = arith.mulf %120, %122 : vector<2x64xf32>
    %126 = arith.addf %124, %125 : vector<2x64xf32>
    %127 = math.tanh %126 : vector<2x64xf32>
    %128 = arith.mulf %123, %127 : vector<2x64xf32>
    %129 = arith.select %18, %34, %31 : vector<2x256xi1>, vector<2x256xf32>
    %cst_23 = arith.constant dense<0.000000e+00> : vector<2x256xf32>
    %130 = tpu.matmul %128, %24, %cst_23 {dimension_numbers = #tpu.dot_dimension_numbers<[1], [0], [0], [1], [0, 0, 1, 1], [], []>} : vector<2x64xf32>, vector<64x256xf32>, vector<2x256xf32> -> vector<2x256xf32>
    %131 = arith.addf %130, %129 : vector<2x256xf32>
    %132 = arith.negf %131 : vector<2x256xf32>
    %133 = math.exp %132 : vector<2x256xf32>
    %cst_24 = arith.constant 1.000000e+00 : f32
    %134 = vector.broadcast %cst_24 : f32 to vector<2x256xf32>
    %135 = arith.addf %134, %133 : vector<2x256xf32>
    %136 = arith.divf %134, %135 : vector<2x256xf32>
    %137 = math.tanh %131 : vector<2x256xf32>
    %138 = vector.extract_strided_slice %136 {offsets = [0, 0], sizes = [2, 64], strides = [1, 1]} : vector<2x256xf32> to vector<2x64xf32>
    %139 = vector.extract_strided_slice %136 {offsets = [0, 64], sizes = [2, 64], strides = [1, 1]} : vector<2x256xf32> to vector<2x64xf32>
    %140 = vector.extract_strided_slice %137 {offsets = [0, 128], sizes = [2, 64], strides = [1, 1]} : vector<2x256xf32> to vector<2x64xf32>
    %141 = vector.extract_strided_slice %136 {offsets = [0, 192], sizes = [2, 64], strides = [1, 1]} : vector<2x256xf32> to vector<2x64xf32>
    %142 = arith.mulf %139, %126 : vector<2x64xf32>
    %143 = arith.mulf %138, %140 : vector<2x64xf32>
    %144 = arith.addf %142, %143 : vector<2x64xf32>
    %145 = math.tanh %144 : vector<2x64xf32>
    %146 = arith.mulf %141, %145 : vector<2x64xf32>
    %147 = arith.select %18, %35, %30 : vector<2x256xi1>, vector<2x256xf32>
    %cst_25 = arith.constant dense<0.000000e+00> : vector<2x256xf32>
    %148 = tpu.matmul %146, %24, %cst_25 {dimension_numbers = #tpu.dot_dimension_numbers<[1], [0], [0], [1], [0, 0, 1, 1], [], []>} : vector<2x64xf32>, vector<64x256xf32>, vector<2x256xf32> -> vector<2x256xf32>
    %149 = arith.addf %148, %147 : vector<2x256xf32>
    %150 = arith.negf %149 : vector<2x256xf32>
    %151 = math.exp %150 : vector<2x256xf32>
    %cst_26 = arith.constant 1.000000e+00 : f32
    %152 = vector.broadcast %cst_26 : f32 to vector<2x256xf32>
    %153 = arith.addf %152, %151 : vector<2x256xf32>
    %154 = arith.divf %152, %153 : vector<2x256xf32>
    %155 = math.tanh %149 : vector<2x256xf32>
    %156 = vector.extract_strided_slice %154 {offsets = [0, 0], sizes = [2, 64], strides = [1, 1]} : vector<2x256xf32> to vector<2x64xf32>
    %157 = vector.extract_strided_slice %154 {offsets = [0, 64], sizes = [2, 64], strides = [1, 1]} : vector<2x256xf32> to vector<2x64xf32>
    %158 = vector.extract_strided_slice %155 {offsets = [0, 128], sizes = [2, 64], strides = [1, 1]} : vector<2x256xf32> to vector<2x64xf32>
    %159 = vector.extract_strided_slice %154 {offsets = [0, 192], sizes = [2, 64], strides = [1, 1]} : vector<2x256xf32> to vector<2x64xf32>
    %160 = arith.mulf %157, %144 : vector<2x64xf32>
    %161 = arith.mulf %156, %158 : vector<2x64xf32>
    %162 = arith.addf %160, %161 : vector<2x64xf32>
    %163 = math.tanh %162 : vector<2x64xf32>
    %164 = arith.mulf %159, %163 : vector<2x64xf32>
    %165 = arith.select %18, %36, %29 : vector<2x256xi1>, vector<2x256xf32>
    %cst_27 = arith.constant dense<0.000000e+00> : vector<2x256xf32>
    %166 = tpu.matmul %164, %24, %cst_27 {dimension_numbers = #tpu.dot_dimension_numbers<[1], [0], [0], [1], [0, 0, 1, 1], [], []>} : vector<2x64xf32>, vector<64x256xf32>, vector<2x256xf32> -> vector<2x256xf32>
    %167 = arith.addf %166, %165 : vector<2x256xf32>
    %168 = arith.negf %167 : vector<2x256xf32>
    %169 = math.exp %168 : vector<2x256xf32>
    %cst_28 = arith.constant 1.000000e+00 : f32
    %170 = vector.broadcast %cst_28 : f32 to vector<2x256xf32>
    %171 = arith.addf %170, %169 : vector<2x256xf32>
    %172 = arith.divf %170, %171 : vector<2x256xf32>
    %173 = math.tanh %167 : vector<2x256xf32>
    %174 = vector.extract_strided_slice %172 {offsets = [0, 0], sizes = [2, 64], strides = [1, 1]} : vector<2x256xf32> to vector<2x64xf32>
    %175 = vector.extract_strided_slice %172 {offsets = [0, 64], sizes = [2, 64], strides = [1, 1]} : vector<2x256xf32> to vector<2x64xf32>
    %176 = vector.extract_strided_slice %173 {offsets = [0, 128], sizes = [2, 64], strides = [1, 1]} : vector<2x256xf32> to vector<2x64xf32>
    %177 = vector.extract_strided_slice %172 {offsets = [0, 192], sizes = [2, 64], strides = [1, 1]} : vector<2x256xf32> to vector<2x64xf32>
    %178 = arith.mulf %175, %162 : vector<2x64xf32>
    %179 = arith.mulf %174, %176 : vector<2x64xf32>
    %180 = arith.addf %178, %179 : vector<2x64xf32>
    %181 = math.tanh %180 : vector<2x64xf32>
    %182 = arith.mulf %177, %181 : vector<2x64xf32>
    %183 = vector.extract_strided_slice %182 {offsets = [0, 0], sizes = [2, 32], strides = [1, 1]} : vector<2x64xf32> to vector<2x32xf32>
    %c0_29 = arith.constant 0 : index
    %c0_30 = arith.constant 0 : index
    %c0_31 = arith.constant 0 : index
    %184 = vector.load %arg9[%c0_29, %c0_30, %c0_31] : memref<4x2x32xf32, #tpu.memory_space<vmem>>, vector<1x2x32xf32>
    %185 = vector.shape_cast %184 : vector<1x2x32xf32> to vector<2x32xf32>
    %186 = vector.shape_cast %183 : vector<2x32xf32> to vector<1x2x32xf32>
    tpu.vector_store %arg9[%c0_29, %c0_30, %c0_31], %186 {strides = array<i32>} : memref<4x2x32xf32, #tpu.memory_space<vmem>>, vector<1x2x32xf32>,
    %187 = vector.extract_strided_slice %182 {offsets = [0, 32], sizes = [2, 32], strides = [1, 1]} : vector<2x64xf32> to vector<2x32xf32>
    %c1 = arith.constant 1 : index
    %c0_32 = arith.constant 0 : index
    %c0_33 = arith.constant 0 : index
    %188 = vector.load %arg9[%c1, %c0_32, %c0_33] : memref<4x2x32xf32, #tpu.memory_space<vmem>>, vector<1x2x32xf32>
    %189 = vector.shape_cast %188 : vector<1x2x32xf32> to vector<2x32xf32>
    %190 = vector.shape_cast %187 : vector<2x32xf32> to vector<1x2x32xf32>
    tpu.vector_store %arg9[%c1, %c0_32, %c0_33], %190 {strides = array<i32>} : memref<4x2x32xf32, #tpu.memory_space<vmem>>, vector<1x2x32xf32>,
    %191 = vector.extract_strided_slice %180 {offsets = [0, 0], sizes = [2, 32], strides = [1, 1]} : vector<2x64xf32> to vector<2x32xf32>
    %c0_34 = arith.constant 0 : index
    %c0_35 = arith.constant 0 : index
    %c0_36 = arith.constant 0 : index
    %192 = vector.load %arg10[%c0_34, %c0_35, %c0_36] : memref<4x2x32xf32, #tpu.memory_space<vmem>>, vector<1x2x32xf32>
    %193 = vector.shape_cast %192 : vector<1x2x32xf32> to vector<2x32xf32>
    %194 = vector.shape_cast %191 : vector<2x32xf32> to vector<1x2x32xf32>
    tpu.vector_store %arg10[%c0_34, %c0_35, %c0_36], %194 {strides = array<i32>} : memref<4x2x32xf32, #tpu.memory_space<vmem>>, vector<1x2x32xf32>,
    %195 = vector.extract_strided_slice %180 {offsets = [0, 32], sizes = [2, 32], strides = [1, 1]} : vector<2x64xf32> to vector<2x32xf32>
    %c1_37 = arith.constant 1 : index
    %c0_38 = arith.constant 0 : index
    %c0_39 = arith.constant 0 : index
    %196 = vector.load %arg10[%c1_37, %c0_38, %c0_39] : memref<4x2x32xf32, #tpu.memory_space<vmem>>, vector<1x2x32xf32>
    %197 = vector.shape_cast %196 : vector<1x2x32xf32> to vector<2x32xf32>
    %198 = vector.shape_cast %195 : vector<2x32xf32> to vector<1x2x32xf32>
    tpu.vector_store %arg10[%c1_37, %c0_38, %c0_39], %198 {strides = array<i32>} : memref<4x2x32xf32, #tpu.memory_space<vmem>>, vector<1x2x32xf32>,
    %c0_40 = arith.constant 0 : index
    %c0_41 = arith.constant 0 : index
    %199 = vector.load %arg4[%c0_40, %c0_41] : memref<64x256xf32, #tpu.memory_space<vmem>>, vector<64x256xf32>
    %c0_42 = arith.constant 0 : index
    %c0_43 = arith.constant 0 : index
    %200 = vector.load %arg6[%c0_42, %c0_43] : memref<1x256xf32, #tpu.memory_space<vmem>>, vector<1x256xf32>
    %c0_44 = arith.constant 0 : index
    %c0_45 = arith.constant 0 : index
    %201 = vector.load %arg5[%c0_44, %c0_45] : memref<64x256xf32, #tpu.memory_space<vmem>>, vector<64x256xf32>
    %202 = arith.select %21, %56, %182 : vector<2x64xi1>, vector<2x64xf32>
    %cst_46 = arith.constant dense<0.000000e+00> : vector<2x256xf32>
    %203 = tpu.matmul %202, %199, %cst_46 {dimension_numbers = #tpu.dot_dimension_numbers<[1], [0], [0], [1], [0, 0, 1, 1], [], []>} : vector<2x64xf32>, vector<64x256xf32>, vector<2x256xf32> -> vector<2x256xf32>
    %204 = vector.broadcast %200 : vector<1x256xf32> to vector<2x256xf32>
    %205 = arith.addf %203, %204 : vector<2x256xf32>
    %206 = arith.select %21, %74, %164 : vector<2x64xi1>, vector<2x64xf32>
    %cst_47 = arith.constant dense<0.000000e+00> : vector<2x256xf32>
    %207 = tpu.matmul %206, %199, %cst_47 {dimension_numbers = #tpu.dot_dimension_numbers<[1], [0], [0], [1], [0, 0, 1, 1], [], []>} : vector<2x64xf32>, vector<64x256xf32>, vector<2x256xf32> -> vector<2x256xf32>
    %208 = vector.broadcast %200 : vector<1x256xf32> to vector<2x256xf32>
    %209 = arith.addf %207, %208 : vector<2x256xf32>
    %210 = arith.select %21, %92, %146 : vector<2x64xi1>, vector<2x64xf32>
    %cst_48 = arith.constant dense<0.000000e+00> : vector<2x256xf32>
    %211 = tpu.matmul %210, %199, %cst_48 {dimension_numbers = #tpu.dot_dimension_numbers<[1], [0], [0], [1], [0, 0, 1, 1], [], []>} : vector<2x64xf32>, vector<64x256xf32>, vector<2x256xf32> -> vector<2x256xf32>
    %212 = vector.broadcast %200 : vector<1x256xf32> to vector<2x256xf32>
    %213 = arith.addf %211, %212 : vector<2x256xf32>
    %214 = arith.select %21, %110, %128 : vector<2x64xi1>, vector<2x64xf32>
    %cst_49 = arith.constant dense<0.000000e+00> : vector<2x256xf32>
    %215 = tpu.matmul %214, %199, %cst_49 {dimension_numbers = #tpu.dot_dimension_numbers<[1], [0], [0], [1], [0, 0, 1, 1], [], []>} : vector<2x64xf32>, vector<64x256xf32>, vector<2x256xf32> -> vector<2x256xf32>
    %216 = vector.broadcast %200 : vector<1x256xf32> to vector<2x256xf32>
    %217 = arith.addf %215, %216 : vector<2x256xf32>
    %218 = arith.select %21, %128, %110 : vector<2x64xi1>, vector<2x64xf32>
    %cst_50 = arith.constant dense<0.000000e+00> : vector<2x256xf32>
    %219 = tpu.matmul %218, %199, %cst_50 {dimension_numbers = #tpu.dot_dimension_numbers<[1], [0], [0], [1], [0, 0, 1, 1], [], []>} : vector<2x64xf32>, vector<64x256xf32>, vector<2x256xf32> -> vector<2x256xf32>
    %220 = vector.broadcast %200 : vector<1x256xf32> to vector<2x256xf32>
    %221 = arith.addf %219, %220 : vector<2x256xf32>
    %222 = arith.select %21, %146, %92 : vector<2x64xi1>, vector<2x64xf32>
    %cst_51 = arith.constant dense<0.000000e+00> : vector<2x256xf32>
    %223 = tpu.matmul %222, %199, %cst_51 {dimension_numbers = #tpu.dot_dimension_numbers<[1], [0], [0], [1], [0, 0, 1, 1], [], []>} : vector<2x64xf32>, vector<64x256xf32>, vector<2x256xf32> -> vector<2x256xf32>
    %224 = vector.broadcast %200 : vector<1x256xf32> to vector<2x256xf32>
    %225 = arith.addf %223, %224 : vector<2x256xf32>
    %226 = arith.select %21, %164, %74 : vector<2x64xi1>, vector<2x64xf32>
    %cst_52 = arith.constant dense<0.000000e+00> : vector<2x256xf32>
    %227 = tpu.matmul %226, %199, %cst_52 {dimension_numbers = #tpu.dot_dimension_numbers<[1], [0], [0], [1], [0, 0, 1, 1], [], []>} : vector<2x64xf32>, vector<64x256xf32>, vector<2x256xf32> -> vector<2x256xf32>
    %228 = vector.broadcast %200 : vector<1x256xf32> to vector<2x256xf32>
    %229 = arith.addf %227, %228 : vector<2x256xf32>
    %230 = arith.select %21, %182, %56 : vector<2x64xi1>, vector<2x64xf32>
    %cst_53 = arith.constant dense<0.000000e+00> : vector<2x256xf32>
    %231 = tpu.matmul %230, %199, %cst_53 {dimension_numbers = #tpu.dot_dimension_numbers<[1], [0], [0], [1], [0, 0, 1, 1], [], []>} : vector<2x64xf32>, vector<64x256xf32>, vector<2x256xf32> -> vector<2x256xf32>
    %232 = vector.broadcast %200 : vector<1x256xf32> to vector<2x256xf32>
    %233 = arith.addf %231, %232 : vector<2x256xf32>
    %cst_54 = arith.constant 0.000000e+00 : f32
    %234 = vector.broadcast %cst_54 : f32 to vector<2x64xf32>
    %cst_55 = arith.constant 0.000000e+00 : f32
    %235 = vector.broadcast %cst_55 : f32 to vector<2x64xf32>
    %236 = arith.select %18, %205, %233 : vector<2x256xi1>, vector<2x256xf32>
    %cst_56 = arith.constant dense<0.000000e+00> : vector<2x256xf32>
    %237 = tpu.matmul %234, %201, %cst_56 {dimension_numbers = #tpu.dot_dimension_numbers<[1], [0], [0], [1], [0, 0, 1, 1], [], []>} : vector<2x64xf32>, vector<64x256xf32>, vector<2x256xf32> -> vector<2x256xf32>
    %238 = arith.addf %237, %236 : vector<2x256xf32>
    %239 = arith.negf %238 : vector<2x256xf32>
    %240 = math.exp %239 : vector<2x256xf32>
    %cst_57 = arith.constant 1.000000e+00 : f32
    %241 = vector.broadcast %cst_57 : f32 to vector<2x256xf32>
    %242 = arith.addf %241, %240 : vector<2x256xf32>
    %243 = arith.divf %241, %242 : vector<2x256xf32>
    %244 = math.tanh %238 : vector<2x256xf32>
    %245 = vector.extract_strided_slice %243 {offsets = [0, 0], sizes = [2, 64], strides = [1, 1]} : vector<2x256xf32> to vector<2x64xf32>
    %246 = vector.extract_strided_slice %243 {offsets = [0, 64], sizes = [2, 64], strides = [1, 1]} : vector<2x256xf32> to vector<2x64xf32>
    %247 = vector.extract_strided_slice %244 {offsets = [0, 128], sizes = [2, 64], strides = [1, 1]} : vector<2x256xf32> to vector<2x64xf32>
    %248 = vector.extract_strided_slice %243 {offsets = [0, 192], sizes = [2, 64], strides = [1, 1]} : vector<2x256xf32> to vector<2x64xf32>
    %249 = arith.mulf %246, %235 : vector<2x64xf32>
    %250 = arith.mulf %245, %247 : vector<2x64xf32>
    %251 = arith.addf %249, %250 : vector<2x64xf32>
    %252 = math.tanh %251 : vector<2x64xf32>
    %253 = arith.mulf %248, %252 : vector<2x64xf32>
    %254 = arith.select %18, %209, %229 : vector<2x256xi1>, vector<2x256xf32>
    %cst_58 = arith.constant dense<0.000000e+00> : vector<2x256xf32>
    %255 = tpu.matmul %253, %201, %cst_58 {dimension_numbers = #tpu.dot_dimension_numbers<[1], [0], [0], [1], [0, 0, 1, 1], [], []>} : vector<2x64xf32>, vector<64x256xf32>, vector<2x256xf32> -> vector<2x256xf32>
    %256 = arith.addf %255, %254 : vector<2x256xf32>
    %257 = arith.negf %256 : vector<2x256xf32>
    %258 = math.exp %257 : vector<2x256xf32>
    %cst_59 = arith.constant 1.000000e+00 : f32
    %259 = vector.broadcast %cst_59 : f32 to vector<2x256xf32>
    %260 = arith.addf %259, %258 : vector<2x256xf32>
    %261 = arith.divf %259, %260 : vector<2x256xf32>
    %262 = math.tanh %256 : vector<2x256xf32>
    %263 = vector.extract_strided_slice %261 {offsets = [0, 0], sizes = [2, 64], strides = [1, 1]} : vector<2x256xf32> to vector<2x64xf32>
    %264 = vector.extract_strided_slice %261 {offsets = [0, 64], sizes = [2, 64], strides = [1, 1]} : vector<2x256xf32> to vector<2x64xf32>
    %265 = vector.extract_strided_slice %262 {offsets = [0, 128], sizes = [2, 64], strides = [1, 1]} : vector<2x256xf32> to vector<2x64xf32>
    %266 = vector.extract_strided_slice %261 {offsets = [0, 192], sizes = [2, 64], strides = [1, 1]} : vector<2x256xf32> to vector<2x64xf32>
    %267 = arith.mulf %264, %251 : vector<2x64xf32>
    %268 = arith.mulf %263, %265 : vector<2x64xf32>
    %269 = arith.addf %267, %268 : vector<2x64xf32>
    %270 = math.tanh %269 : vector<2x64xf32>
    %271 = arith.mulf %266, %270 : vector<2x64xf32>
    %272 = arith.select %18, %213, %225 : vector<2x256xi1>, vector<2x256xf32>
    %cst_60 = arith.constant dense<0.000000e+00> : vector<2x256xf32>
    %273 = tpu.matmul %271, %201, %cst_60 {dimension_numbers = #tpu.dot_dimension_numbers<[1], [0], [0], [1], [0, 0, 1, 1], [], []>} : vector<2x64xf32>, vector<64x256xf32>, vector<2x256xf32> -> vector<2x256xf32>
    %274 = arith.addf %273, %272 : vector<2x256xf32>
    %275 = arith.negf %274 : vector<2x256xf32>
    %276 = math.exp %275 : vector<2x256xf32>
    %cst_61 = arith.constant 1.000000e+00 : f32
    %277 = vector.broadcast %cst_61 : f32 to vector<2x256xf32>
    %278 = arith.addf %277, %276 : vector<2x256xf32>
    %279 = arith.divf %277, %278 : vector<2x256xf32>
    %280 = math.tanh %274 : vector<2x256xf32>
    %281 = vector.extract_strided_slice %279 {offsets = [0, 0], sizes = [2, 64], strides = [1, 1]} : vector<2x256xf32> to vector<2x64xf32>
    %282 = vector.extract_strided_slice %279 {offsets = [0, 64], sizes = [2, 64], strides = [1, 1]} : vector<2x256xf32> to vector<2x64xf32>
    %283 = vector.extract_strided_slice %280 {offsets = [0, 128], sizes = [2, 64], strides = [1, 1]} : vector<2x256xf32> to vector<2x64xf32>
    %284 = vector.extract_strided_slice %279 {offsets = [0, 192], sizes = [2, 64], strides = [1, 1]} : vector<2x256xf32> to vector<2x64xf32>
    %285 = arith.mulf %282, %269 : vector<2x64xf32>
    %286 = arith.mulf %281, %283 : vector<2x64xf32>
    %287 = arith.addf %285, %286 : vector<2x64xf32>
    %288 = math.tanh %287 : vector<2x64xf32>
    %289 = arith.mulf %284, %288 : vector<2x64xf32>
    %290 = arith.select %18, %217, %221 : vector<2x256xi1>, vector<2x256xf32>
    %cst_62 = arith.constant dense<0.000000e+00> : vector<2x256xf32>
    %291 = tpu.matmul %289, %201, %cst_62 {dimension_numbers = #tpu.dot_dimension_numbers<[1], [0], [0], [1], [0, 0, 1, 1], [], []>} : vector<2x64xf32>, vector<64x256xf32>, vector<2x256xf32> -> vector<2x256xf32>
    %292 = arith.addf %291, %290 : vector<2x256xf32>
    %293 = arith.negf %292 : vector<2x256xf32>
    %294 = math.exp %293 : vector<2x256xf32>
    %cst_63 = arith.constant 1.000000e+00 : f32
    %295 = vector.broadcast %cst_63 : f32 to vector<2x256xf32>
    %296 = arith.addf %295, %294 : vector<2x256xf32>
    %297 = arith.divf %295, %296 : vector<2x256xf32>
    %298 = math.tanh %292 : vector<2x256xf32>
    %299 = vector.extract_strided_slice %297 {offsets = [0, 0], sizes = [2, 64], strides = [1, 1]} : vector<2x256xf32> to vector<2x64xf32>
    %300 = vector.extract_strided_slice %297 {offsets = [0, 64], sizes = [2, 64], strides = [1, 1]} : vector<2x256xf32> to vector<2x64xf32>
    %301 = vector.extract_strided_slice %298 {offsets = [0, 128], sizes = [2, 64], strides = [1, 1]} : vector<2x256xf32> to vector<2x64xf32>
    %302 = vector.extract_strided_slice %297 {offsets = [0, 192], sizes = [2, 64], strides = [1, 1]} : vector<2x256xf32> to vector<2x64xf32>
    %303 = arith.mulf %300, %287 : vector<2x64xf32>
    %304 = arith.mulf %299, %301 : vector<2x64xf32>
    %305 = arith.addf %303, %304 : vector<2x64xf32>
    %306 = math.tanh %305 : vector<2x64xf32>
    %307 = arith.mulf %302, %306 : vector<2x64xf32>
    %308 = arith.select %18, %221, %217 : vector<2x256xi1>, vector<2x256xf32>
    %cst_64 = arith.constant dense<0.000000e+00> : vector<2x256xf32>
    %309 = tpu.matmul %307, %201, %cst_64 {dimension_numbers = #tpu.dot_dimension_numbers<[1], [0], [0], [1], [0, 0, 1, 1], [], []>} : vector<2x64xf32>, vector<64x256xf32>, vector<2x256xf32> -> vector<2x256xf32>
    %310 = arith.addf %309, %308 : vector<2x256xf32>
    %311 = arith.negf %310 : vector<2x256xf32>
    %312 = math.exp %311 : vector<2x256xf32>
    %cst_65 = arith.constant 1.000000e+00 : f32
    %313 = vector.broadcast %cst_65 : f32 to vector<2x256xf32>
    %314 = arith.addf %313, %312 : vector<2x256xf32>
    %315 = arith.divf %313, %314 : vector<2x256xf32>
    %316 = math.tanh %310 : vector<2x256xf32>
    %317 = vector.extract_strided_slice %315 {offsets = [0, 0], sizes = [2, 64], strides = [1, 1]} : vector<2x256xf32> to vector<2x64xf32>
    %318 = vector.extract_strided_slice %315 {offsets = [0, 64], sizes = [2, 64], strides = [1, 1]} : vector<2x256xf32> to vector<2x64xf32>
    %319 = vector.extract_strided_slice %316 {offsets = [0, 128], sizes = [2, 64], strides = [1, 1]} : vector<2x256xf32> to vector<2x64xf32>
    %320 = vector.extract_strided_slice %315 {offsets = [0, 192], sizes = [2, 64], strides = [1, 1]} : vector<2x256xf32> to vector<2x64xf32>
    %321 = arith.mulf %318, %305 : vector<2x64xf32>
    %322 = arith.mulf %317, %319 : vector<2x64xf32>
    %323 = arith.addf %321, %322 : vector<2x64xf32>
    %324 = math.tanh %323 : vector<2x64xf32>
    %325 = arith.mulf %320, %324 : vector<2x64xf32>
    %326 = arith.select %18, %225, %213 : vector<2x256xi1>, vector<2x256xf32>
    %cst_66 = arith.constant dense<0.000000e+00> : vector<2x256xf32>
    %327 = tpu.matmul %325, %201, %cst_66 {dimension_numbers = #tpu.dot_dimension_numbers<[1], [0], [0], [1], [0, 0, 1, 1], [], []>} : vector<2x64xf32>, vector<64x256xf32>, vector<2x256xf32> -> vector<2x256xf32>
    %328 = arith.addf %327, %326 : vector<2x256xf32>
    %329 = arith.negf %328 : vector<2x256xf32>
    %330 = math.exp %329 : vector<2x256xf32>
    %cst_67 = arith.constant 1.000000e+00 : f32
    %331 = vector.broadcast %cst_67 : f32 to vector<2x256xf32>
    %332 = arith.addf %331, %330 : vector<2x256xf32>
    %333 = arith.divf %331, %332 : vector<2x256xf32>
    %334 = math.tanh %328 : vector<2x256xf32>
    %335 = vector.extract_strided_slice %333 {offsets = [0, 0], sizes = [2, 64], strides = [1, 1]} : vector<2x256xf32> to vector<2x64xf32>
    %336 = vector.extract_strided_slice %333 {offsets = [0, 64], sizes = [2, 64], strides = [1, 1]} : vector<2x256xf32> to vector<2x64xf32>
    %337 = vector.extract_strided_slice %334 {offsets = [0, 128], sizes = [2, 64], strides = [1, 1]} : vector<2x256xf32> to vector<2x64xf32>
    %338 = vector.extract_strided_slice %333 {offsets = [0, 192], sizes = [2, 64], strides = [1, 1]} : vector<2x256xf32> to vector<2x64xf32>
    %339 = arith.mulf %336, %323 : vector<2x64xf32>
    %340 = arith.mulf %335, %337 : vector<2x64xf32>
    %341 = arith.addf %339, %340 : vector<2x64xf32>
    %342 = math.tanh %341 : vector<2x64xf32>
    %343 = arith.mulf %338, %342 : vector<2x64xf32>
    %344 = arith.select %18, %229, %209 : vector<2x256xi1>, vector<2x256xf32>
    %cst_68 = arith.constant dense<0.000000e+00> : vector<2x256xf32>
    %345 = tpu.matmul %343, %201, %cst_68 {dimension_numbers = #tpu.dot_dimension_numbers<[1], [0], [0], [1], [0, 0, 1, 1], [], []>} : vector<2x64xf32>, vector<64x256xf32>, vector<2x256xf32> -> vector<2x256xf32>
    %346 = arith.addf %345, %344 : vector<2x256xf32>
    %347 = arith.negf %346 : vector<2x256xf32>
    %348 = math.exp %347 : vector<2x256xf32>
    %cst_69 = arith.constant 1.000000e+00 : f32
    %349 = vector.broadcast %cst_69 : f32 to vector<2x256xf32>
    %350 = arith.addf %349, %348 : vector<2x256xf32>
    %351 = arith.divf %349, %350 : vector<2x256xf32>
    %352 = math.tanh %346 : vector<2x256xf32>
    %353 = vector.extract_strided_slice %351 {offsets = [0, 0], sizes = [2, 64], strides = [1, 1]} : vector<2x256xf32> to vector<2x64xf32>
    %354 = vector.extract_strided_slice %351 {offsets = [0, 64], sizes = [2, 64], strides = [1, 1]} : vector<2x256xf32> to vector<2x64xf32>
    %355 = vector.extract_strided_slice %352 {offsets = [0, 128], sizes = [2, 64], strides = [1, 1]} : vector<2x256xf32> to vector<2x64xf32>
    %356 = vector.extract_strided_slice %351 {offsets = [0, 192], sizes = [2, 64], strides = [1, 1]} : vector<2x256xf32> to vector<2x64xf32>
    %357 = arith.mulf %354, %341 : vector<2x64xf32>
    %358 = arith.mulf %353, %355 : vector<2x64xf32>
    %359 = arith.addf %357, %358 : vector<2x64xf32>
    %360 = math.tanh %359 : vector<2x64xf32>
    %361 = arith.mulf %356, %360 : vector<2x64xf32>
    %362 = arith.select %18, %233, %205 : vector<2x256xi1>, vector<2x256xf32>
    %cst_70 = arith.constant dense<0.000000e+00> : vector<2x256xf32>
    %363 = tpu.matmul %361, %201, %cst_70 {dimension_numbers = #tpu.dot_dimension_numbers<[1], [0], [0], [1], [0, 0, 1, 1], [], []>} : vector<2x64xf32>, vector<64x256xf32>, vector<2x256xf32> -> vector<2x256xf32>
    %364 = arith.addf %363, %362 : vector<2x256xf32>
    %365 = arith.negf %364 : vector<2x256xf32>
    %366 = math.exp %365 : vector<2x256xf32>
    %cst_71 = arith.constant 1.000000e+00 : f32
    %367 = vector.broadcast %cst_71 : f32 to vector<2x256xf32>
    %368 = arith.addf %367, %366 : vector<2x256xf32>
    %369 = arith.divf %367, %368 : vector<2x256xf32>
    %370 = math.tanh %364 : vector<2x256xf32>
    %371 = vector.extract_strided_slice %369 {offsets = [0, 0], sizes = [2, 64], strides = [1, 1]} : vector<2x256xf32> to vector<2x64xf32>
    %372 = vector.extract_strided_slice %369 {offsets = [0, 64], sizes = [2, 64], strides = [1, 1]} : vector<2x256xf32> to vector<2x64xf32>
    %373 = vector.extract_strided_slice %370 {offsets = [0, 128], sizes = [2, 64], strides = [1, 1]} : vector<2x256xf32> to vector<2x64xf32>
    %374 = vector.extract_strided_slice %369 {offsets = [0, 192], sizes = [2, 64], strides = [1, 1]} : vector<2x256xf32> to vector<2x64xf32>
    %375 = arith.mulf %372, %359 : vector<2x64xf32>
    %376 = arith.mulf %371, %373 : vector<2x64xf32>
    %377 = arith.addf %375, %376 : vector<2x64xf32>
    %378 = math.tanh %377 : vector<2x64xf32>
    %379 = arith.mulf %374, %378 : vector<2x64xf32>
    %380 = vector.extract_strided_slice %379 {offsets = [0, 0], sizes = [2, 32], strides = [1, 1]} : vector<2x64xf32> to vector<2x32xf32>
    %c2 = arith.constant 2 : index
    %c0_72 = arith.constant 0 : index
    %c0_73 = arith.constant 0 : index
    %381 = vector.load %arg9[%c2, %c0_72, %c0_73] : memref<4x2x32xf32, #tpu.memory_space<vmem>>, vector<1x2x32xf32>
    %382 = vector.shape_cast %381 : vector<1x2x32xf32> to vector<2x32xf32>
    %383 = vector.shape_cast %380 : vector<2x32xf32> to vector<1x2x32xf32>
    tpu.vector_store %arg9[%c2, %c0_72, %c0_73], %383 {strides = array<i32>} : memref<4x2x32xf32, #tpu.memory_space<vmem>>, vector<1x2x32xf32>,
    %384 = vector.extract_strided_slice %379 {offsets = [0, 32], sizes = [2, 32], strides = [1, 1]} : vector<2x64xf32> to vector<2x32xf32>
    %c3 = arith.constant 3 : index
    %c0_74 = arith.constant 0 : index
    %c0_75 = arith.constant 0 : index
    %385 = vector.load %arg9[%c3, %c0_74, %c0_75] : memref<4x2x32xf32, #tpu.memory_space<vmem>>, vector<1x2x32xf32>
    %386 = vector.shape_cast %385 : vector<1x2x32xf32> to vector<2x32xf32>
    %387 = vector.shape_cast %384 : vector<2x32xf32> to vector<1x2x32xf32>
    tpu.vector_store %arg9[%c3, %c0_74, %c0_75], %387 {strides = array<i32>} : memref<4x2x32xf32, #tpu.memory_space<vmem>>, vector<1x2x32xf32>,
    %388 = vector.extract_strided_slice %377 {offsets = [0, 0], sizes = [2, 32], strides = [1, 1]} : vector<2x64xf32> to vector<2x32xf32>
    %c2_76 = arith.constant 2 : index
    %c0_77 = arith.constant 0 : index
    %c0_78 = arith.constant 0 : index
    %389 = vector.load %arg10[%c2_76, %c0_77, %c0_78] : memref<4x2x32xf32, #tpu.memory_space<vmem>>, vector<1x2x32xf32>
    %390 = vector.shape_cast %389 : vector<1x2x32xf32> to vector<2x32xf32>
    %391 = vector.shape_cast %388 : vector<2x32xf32> to vector<1x2x32xf32>
    tpu.vector_store %arg10[%c2_76, %c0_77, %c0_78], %391 {strides = array<i32>} : memref<4x2x32xf32, #tpu.memory_space<vmem>>, vector<1x2x32xf32>,
    %392 = vector.extract_strided_slice %377 {offsets = [0, 32], sizes = [2, 32], strides = [1, 1]} : vector<2x64xf32> to vector<2x32xf32>
    %c3_79 = arith.constant 3 : index
    %c0_80 = arith.constant 0 : index
    %c0_81 = arith.constant 0 : index
    %393 = vector.load %arg10[%c3_79, %c0_80, %c0_81] : memref<4x2x32xf32, #tpu.memory_space<vmem>>, vector<1x2x32xf32>
    %394 = vector.shape_cast %393 : vector<1x2x32xf32> to vector<2x32xf32>
    %395 = vector.shape_cast %392 : vector<2x32xf32> to vector<1x2x32xf32>
    tpu.vector_store %arg10[%c3_79, %c0_80, %c0_81], %395 {strides = array<i32>} : memref<4x2x32xf32, #tpu.memory_space<vmem>>, vector<1x2x32xf32>,
    %396 = arith.select %21, %379, %253 : vector<2x64xi1>, vector<2x64xf32>
    %c0_82 = arith.constant 0 : index
    %c0_83 = arith.constant 0 : index
    %397 = vector.load %arg7[%c0_82, %c0_83] : memref<64x3xf32, #tpu.memory_space<vmem>>, vector<64x3xf32>
    %cst_84 = arith.constant dense<0.000000e+00> : vector<2x3xf32>
    %398 = tpu.matmul %396, %397, %cst_84 {dimension_numbers = #tpu.dot_dimension_numbers<[1], [0], [0], [1], [0, 0, 1, 1], [], []>} : vector<2x64xf32>, vector<64x3xf32>, vector<2x3xf32> -> vector<2x3xf32>
    %cst_85 = arith.constant dense<0xFF800000> : vector<2xf32>
    %399 = vector.multi_reduction <maximumf>, %398, %cst_85 [1] : vector<2x3xf32> to vector<2xf32>
    %400 = vector.shape_cast %399 : vector<2xf32> to vector<2x1xf32>
    %401 = vector.broadcast %400 : vector<2x1xf32> to vector<2x3xf32>
    %402 = arith.subf %398, %401 : vector<2x3xf32>
    %403 = math.exp %402 : vector<2x3xf32>
    %cst_86 = arith.constant dense<0.000000e+00> : vector<2xf32>
    %404 = vector.multi_reduction <add>, %403, %cst_86 [1] : vector<2x3xf32> to vector<2xf32>
    %405 = vector.shape_cast %404 : vector<2xf32> to vector<2x1xf32>
    %406 = math.log %405 : vector<2x1xf32>
    %407 = vector.broadcast %406 : vector<2x1xf32> to vector<2x3xf32>
    %408 = arith.subf %402, %407 : vector<2x3xf32>
    %c0_87 = arith.constant 0 : index
    %c0_88 = arith.constant 0 : index
    %409 = vector.load %arg8[%c0_87, %c0_88] : memref<2x3xf32, #tpu.memory_space<vmem>>, vector<2x3xf32>
    tpu.vector_store %arg8[%c0_87, %c0_88], %408 {strides = array<i32>} : memref<2x3xf32, #tpu.memory_space<vmem>>, vector<2x3xf32>,
    return
  }
}

</mosaic_0001>

<bundles_post_ra>
// kernel: forward.1
= control target key start
LH: loop header
LB: loop body
LE: loop exit
PB: predicated region body
PF: predicated region fallthrough
CT: control target
= control target key end

     0   :  { %16 = vsyncpa [#allocation3], 0  ;;  %s3820_s0 = inlined_call_operand.vmem [shape: f32[16,32], index: 0, kind: input, shape index: {}]   ;;  %s3821_s1 = inlined_call_operand.hbm [shape: f32[32,256], index: 1, kind: input, shape index: {}]   ;;  %s3822_s2 = inlined_call_operand.hbm [shape: f32[64,256], index: 2, kind: input, shape index: {}]   ;;  %s3823_s3 = inlined_call_operand.vmem [shape: f32[1,256], index: 3, kind: input, shape index: {}]   ;;  %s3824_s4 = inlined_call_operand.hbm [shape: f32[64,256], index: 4, kind: input, shape index: {}]   ;;  %s3825_s5 = inlined_call_operand.vmem [shape: f32[64,256], index: 5, kind: input, shape index: {}]   ;;  %s3826_s6 = inlined_call_operand.vmem [shape: f32[1,256], index: 6, kind: input, shape index: {}]   ;;  %s3827_s7 = inlined_call_operand.vmem [shape: f32[64,3], index: 7, kind: input, shape index: {}]   ;;  %s3828_s8 = inlined_call_operand.hbm [shape: f32[2,3], index: 8, kind: output, shape index: {0}]   ;;  %s3829_s9 = inlined_call_operand.hbm [shape: f32[4,2,32], index: 9, kind: output, shape index: {1}]   ;;  %s3830_s10 = inlined_call_operand.hbm [shape: f32[4,2,32], index: 10, kind: output, shape index: {2}]  }
   0x1   :  { %17 = vsyncpa [#allocation6], 0 }
   0x2   :  { %18 = vsyncpa [#allocation4], 0 }
   0x3   :  { %19 = vsyncpa [#allocation10], 0  ;;  %s39_s15 = sshll.u32 %s3822_s2, 4  ;;  %s2735_s16 = smov [#allocation5]   ;;  %s40_s15 = int_to_ptr.hbm [resolvable:$true] %s39_s15 }
   0x4   :  { %s41_s17 = sshll.u32 %s2735_s16, 4  ;;  %s26_s20 = sshll.u32 %s3821_s1, 4  ;;  %s42_s17 = int_to_ptr.vmem [resolvable:$true] %s41_s17  ;;  %s27_s20 = int_to_ptr.hbm [resolvable:$true] %s26_s20 }
   0x5   :  { %s2736_s21 = smov 256   ;;  %s2737_s22 = smov 16  }
   0x6   :  { %47 = dma.hbm_to_vmem [thread:$0]  %s40_s15, 2048, %s42_s17, [#allocation6], %s2736_s21, %s2736_s21, %s2737_s22  }
   0x7   :  { %s2738_s23 = smov [#allocation2]   ;;  %s54_s27 = sshll.u32 %s3824_s4, 4  ;;  %s55_s27 = int_to_ptr.hbm [resolvable:$true] %s54_s27 }
   0x8   :  { %s28_s24 = sshll.u32 %s2738_s23, 4  ;;  %s2739_s2 = smov [#allocation7]   ;;  %s29_s24 = int_to_ptr.vmem [resolvable:$true] %s28_s24 }
   0x9   :  { %34 = dma.hbm_to_vmem [thread:$0]  %s27_s20, 1024, %s29_s24, [#allocation3], %s2736_s21, %s2736_s21, %s2737_s22  }
   0xa   :  { %s56_s28 = sshll.u32 %s2739_s2, 4  ;;  %s57_s28 = int_to_ptr.vmem [resolvable:$true] %s56_s28 }
   0xb   :  { %62 = dma.hbm_to_vmem [thread:$0]  %s55_s27, 2048, %s57_s28, [#allocation6], %s2736_s21, %s2736_s21, %s2737_s22  }
   0xc   :  { %2727 = dma.done.wait [#allocation3], 1024  }
   0xd   :  { %2728 = vsyncadd [#allocation3], 4294966272 }
   0xe   :  { %2729 = dma.done.wait [#allocation6], 4096  }
   0xf   :  { %2730 = vsyncadd [#allocation6], 4294963200  ;;  %v117_v0 = vld [vmem:[#allocation2 + $0x30] sm:$0xff]  ;;  %v2813_v2 = vld [vmem:[#allocation5 + $0x78] sm:$0xff]  ;;  %vm143_vm0 = vcmask 261120   ;;  %v2740_v26 = vmov 0.0   ;;  %v81_v27 = vlaneseq }
  0x10   :  { %v2811_v1 = vld [vmem:[#allocation5 + $0x70] sm:$0xff]  ;;  %162 = vmatpush.msra.mxu0 %v117_v0  ;;  %v118_v3 = vld [vmem:[#allocation2 + $0x38] sm:$0xff]  ;;  %v115_v4 = vld [vmem:[#allocation2 + $0x20] sm:$0xff]  ;;  %236 = vmatpush.msra.mxu3 %v2813_v2  ;;  %vm204_vm11 = vcmask 523264   ;;  %s2258_s15 = sshll.u32 %s3829_s9, 4  ;;  %s2744_s16 = smov 2   ;;  %s2259_s15 = int_to_ptr.hbm [resolvable:$true] %s2258_s15 }
  0x11   :  { %216 = vmatpush.msra.mxu2 %v2811_v1  ;;  %v2816_v5 = vld [vmem:[#allocation5 + $0x60] sm:$0xff]  ;;  %185 = vmatpush.msra.mxu1 %v118_v3  ;;  %v2819_v6 = vld [vmem:[#allocation5 + $0x68] sm:$0xff]  ;;  %v113_v8 = vld [vmem:[#allocation2 + $0x10] sm:$0xff]  ;;  %v2938_v30 = vand.u32 127, %v81_v27  ;;  %s2271_s19 = sshll.u32 %s3830_s10, 4  ;;  %s2746_s9 = smov [#allocation8]   ;;  %s2272_s19 = int_to_ptr.hbm [resolvable:$true] %s2271_s19 }
  0x12   :  { %v116_v7 = vld [vmem:[#allocation2 + $0x28] sm:$0xff]  ;;  %163 = vmatpush.msra.mxu0 %v115_v4  ;;  %v2822_v9 = vld [vmem:[#allocation5 + $0x50] sm:$0xff]  ;;  %v2824_v10 = vld [vmem:[#allocation5 + $0x58] sm:$0xff]  ;;  %237 = vmatpush.msra.mxu3 %v2819_v6  ;;  %s2246_s21 = sshll.u32 %s2746_s9, 4  ;;  %s2248_s24 = sshll.u32 %s3828_s8, 4  ;;  %s2247_s21 = int_to_ptr.vmem [resolvable:$true] %s2246_s21  ;;  %s2249_s24 = int_to_ptr.hbm [resolvable:$true] %s2248_s24 }
  0x13   :  { %217 = vmatpush.msra.mxu2 %v2816_v5  ;;  %v114_v11 = vld [vmem:[#allocation2 + $0x18] sm:$0xff]  ;;  %186 = vmatpush.msra.mxu1 %v116_v7  ;;  %v111_v12 = vld [vmem:[#allocation2] sm:$0xff]  ;;  %v2830_v14 = vld [vmem:[#allocation5 + $0x48] sm:$0xff]  ;;  %v88_v33 = vand.u32 63, %v2938_v30  ;;  %v83_v35 = vadd.s32 128, %v2938_v30 }
  0x14   :  { %v2827_v13 = vld [vmem:[#allocation5 + $0x40] sm:$0xff]  ;;  %164 = vmatpush.msra.mxu0 %v113_v8  ;;  %238 = vmatpush.msra.mxu3 %v2824_v10  ;;  %v112_v16 = vld [vmem:[#allocation2 + $0x8] sm:$0xff]  ;;  %v2836_v17 = vld [vmem:[#allocation5 + $0x30] sm:$0xff] }
  0x15   :  { %218 = vmatpush.msra.mxu2 %v2822_v9  ;;  %v136_v15 = vld [vmem:[%s3820_s0] sm:$0xff]  ;;  %187 = vmatpush.msra.mxu1 %v114_v11  ;;  %v2839_v18 = vld [vmem:[#allocation5 + $0x38] sm:$0xff]  ;;  %v2846_v20 = vld [vmem:[#allocation5 + $0x28] sm:$0xff]  ;;  %vm2942_vm1 = vcmp.lt.s32.totalorder %v88_v33, 32  ;;  %v95_v41 = vand.u32 63, %v83_v35 }
  0x16   :  { %165 = vmatpush.msra.mxu0 %v111_v12  ;;  %239 = vmatpush.msra.mxu3 %v2830_v14  ;;  %v2843_v19 = vld [vmem:[#allocation5 + $0x20] sm:$0xff]  ;;  %v2850_v21 = vld [vmem:[#allocation5 + $0x10] sm:$0xff]  ;;  %v2853_v22 = vld [vmem:[#allocation5 + $0x18] sm:$0xff] }
  0x17   :  { %219 = vmatpush.msra.mxu2 %v2827_v13  ;;  %2294 = vmatmul.msk.f32.vlgmr.msra.gmra.mxu0 %vm143_vm0, %v136_v15  ;;  %v2857_v23 = vld [vmem:[#allocation5] sm:$0xff]  ;;  %v2861_v24 = vld [vmem:[#allocation5 + $0x8] sm:$0xff]  ;;  %vm2958_vm2 = vcmp.lt.s32.totalorder %v95_v41, 32 }
  0x18   :  { %188 = vmatpush.msra.mxu1 %v112_v16  ;;  %240 = vmatpush.msra.mxu3 %v2839_v18  ;;  %v137_v25 = vld [vmem:[%s3820_s0 + $0x8] sm:$0xff]  ;;  %v119_v28 = vld [vmem:[%s3823_s3] sm:$0x3]  ;;  %s2741_s3 = smov 64  }
  0x19   :  { %220 = vmatpush.msra.mxu2 %v2836_v17  ;;  %2296 = vmatmul.msk.f32.vlgmr.msra.gmra.mxu1 %vm143_vm0, %v136_v15  ;;  %v139_v31 = vperm.slane %v119_v28, 0  ;;  %v140_v36 = vperm.slane %v119_v28, 1 }
  0x1a   :  { %321 = vmatpush.msrb.mxu0 %v2811_v1  ;;  %241 = vmatpush.msra.mxu3 %v2846_v20 }
  0x1b   :  { %221 = vmatpush.msra.mxu2 %v2843_v19  ;;  %341 = vmatpush.msrb.mxu1 %v2813_v2 }
  0x1c   :  { %322 = vmatpush.msrb.mxu0 %v2816_v5  ;;  %242 = vmatpush.msra.mxu3 %v2853_v22 }
  0x1d   :  { %222 = vmatpush.msra.mxu2 %v2850_v21  ;;  %342 = vmatpush.msrb.mxu1 %v2819_v6 }
  0x1e   :  { %323 = vmatpush.msrb.mxu0 %v2822_v9  ;;  %243 = vmatpush.msra.mxu3 %v2861_v24 }
  0x1f   :  { %223 = vmatpush.msra.mxu2 %v2857_v23  ;;  %2295 = vmatmul.msk.f32.gmra.mxu0 %vm143_vm0, %v137_v25 }
  0x20   :  { %224 = vmatmul.f32.vlgmr.msra.gmra.mxu2 %v2740_v26  ;;  %244 = vmatmul.f32.vlgmr.msra.gmra.mxu3 %v2740_v26 }
  0x21   :  { %2297 = vmatmul.msk.f32.gmra.mxu1 %vm143_vm0, %v137_v25  ;;  %324 = vmatpush.msrb.mxu0 %v2827_v13 }
  0x22   :  { %343 = vmatpush.msrb.mxu1 %v2824_v10  ;;  %420 = vmatpush.msrb.mxu2 %v2811_v1 }
  0x23   :  { %325 = vmatpush.msrb.mxu0 %v2836_v17  ;;  %440 = vmatpush.msrb.mxu3 %v2813_v2 }
  0x24   :  { %344 = vmatpush.msrb.mxu1 %v2830_v14  ;;  %421 = vmatpush.msrb.mxu2 %v2816_v5 }
  0x25   :  { %326 = vmatpush.msrb.mxu0 %v2843_v19  ;;  %441 = vmatpush.msrb.mxu3 %v2819_v6 }
  0x26   :  { %345 = vmatpush.msrb.mxu1 %v2839_v18  ;;  %422 = vmatpush.msrb.mxu2 %v2822_v9 }
  0x27   :  { %327 = vmatpush.msrb.mxu0 %v2850_v21  ;;  %442 = vmatpush.msrb.mxu3 %v2824_v10 }
  0x28   :  { %346 = vmatpush.msrb.mxu1 %v2846_v20  ;;  %423 = vmatpush.msrb.mxu2 %v2827_v13 }
  0x29   :  { %328 = vmatpush.msrb.mxu0 %v2857_v23  ;;  %443 = vmatpush.msrb.mxu3 %v2830_v14 }
  0x2a   :  { %347 = vmatpush.msrb.mxu1 %v2853_v22  ;;  %424 = vmatpush.msrb.mxu2 %v2836_v17 }
  0x2b   :  { %444 = vmatpush.msrb.mxu3 %v2839_v18  ;;  %517 = vmatpush.msra.mxu0 %v2811_v1 }
  0x2c   :  { %348 = vmatpush.msrb.mxu1 %v2861_v24  ;;  %425 = vmatpush.msrb.mxu2 %v2843_v19 }
  0x2d   :  { %445 = vmatpush.msrb.mxu3 %v2846_v20  ;;  %518 = vmatpush.msra.mxu0 %v2816_v5 }
  0x2e   :  { %537 = vmatpush.msra.mxu1 %v2813_v2  ;;  %426 = vmatpush.msrb.mxu2 %v2850_v21 }
  0x2f   :  { %446 = vmatpush.msrb.mxu3 %v2853_v22  ;;  %519 = vmatpush.msra.mxu0 %v2822_v9 }
  0x30   :  { %538 = vmatpush.msra.mxu1 %v2819_v6  ;;  %427 = vmatpush.msrb.mxu2 %v2857_v23 }
  0x31   :  { %447 = vmatpush.msrb.mxu3 %v2861_v24  ;;  %520 = vmatpush.msra.mxu0 %v2827_v13 }
  0x32   :  { %539 = vmatpush.msra.mxu1 %v2824_v10  ;;  %618 = vmatpush.msra.mxu2 %v2811_v1 }
  0x33   :  { %638 = vmatpush.msra.mxu3 %v2813_v2  ;;  %521 = vmatpush.msra.mxu0 %v2836_v17 }
  0x34   :  { %540 = vmatpush.msra.mxu1 %v2830_v14  ;;  %619 = vmatpush.msra.mxu2 %v2816_v5 }
  0x35   :  { %639 = vmatpush.msra.mxu3 %v2819_v6  ;;  %522 = vmatpush.msra.mxu0 %v2843_v19 }
  0x36   :  { %541 = vmatpush.msra.mxu1 %v2839_v18  ;;  %620 = vmatpush.msra.mxu2 %v2822_v9 }
  0x37   :  { %640 = vmatpush.msra.mxu3 %v2824_v10  ;;  %523 = vmatpush.msra.mxu0 %v2850_v21 }
  0x38   :  { %542 = vmatpush.msra.mxu1 %v2846_v20  ;;  %621 = vmatpush.msra.mxu2 %v2827_v13 }
  0x39   :  { %641 = vmatpush.msra.mxu3 %v2830_v14  ;;  %524 = vmatpush.msra.mxu0 %v2857_v23 }
  0x3a   :  { %543 = vmatpush.msra.mxu1 %v2853_v22  ;;  %622 = vmatpush.msra.mxu2 %v2836_v17 }
  0x3b   :  { %642 = vmatpush.msra.mxu3 %v2839_v18 }
  0x3c   :  { %544 = vmatpush.msra.mxu1 %v2861_v24  ;;  %623 = vmatpush.msra.mxu2 %v2843_v19 }
  0x3d   :  { %643 = vmatpush.msra.mxu3 %v2846_v20 }
  0x3e   :  { %624 = vmatpush.msra.mxu2 %v2850_v21 }
  0x3f   :  { %644 = vmatpush.msra.mxu3 %v2853_v22 }
  0x40   :  { %625 = vmatpush.msra.mxu2 %v2857_v23 }
  0x41   :  { %645 = vmatpush.msra.mxu3 %v2861_v24 }
  0x94   :  { %v167_v29 = vpop.f32.mrf.mxu0 }
  0x95   :  { %v168_v34 = vadd.f32 %v167_v29, %v139_v31 }
  0x96   :  { %v190_v32 = vpop.f32.mrf.mxu1 }
  0x97   :  { %v191_v37 = vadd.f32 %v190_v32, %v140_v36  ;;  %v599_v42 = vrot.slane %v168_v34, 6  ;;  %v698_v45 = vrot.slane %v168_v34, 2 }
  0x99   :  { %v600_v44 = vrot.slane %v191_v37, 6  ;;  %v699_v46 = vrot.slane %v191_v37, 2 }
  0x9c   :  { %v170_v38 = vpop.f32.mrf.mxu0 }
  0x9d   :  { %v171_v40 = vadd.f32 %v170_v38, %v139_v31 }
  0x9e   :  { %v193_v43 = vpop.f32.mrf.mxu1 }
  0x9f   :  { %v194_v47 = vadd.f32 %v193_v43, %v140_v36  ;;  %v198_v48 = vrot.slane %v171_v40, 6  ;;  %v296_v49 = vrot.slane %v171_v40, 2  ;;  %v2948_v50 = vsel %vm2942_vm1, %v171_v40, %v599_v42 }
  0xa0   :  { %v2952_v51 = vsel %vm2942_vm1, %v171_v40, %v698_v45 }
  0xa1   :  { %v2956_v52 = vsel %vm2942_vm1, %v168_v34, %v198_v48  ;;  %v2964_v54 = vsel %vm2942_vm1, %v168_v34, %v296_v49  ;;  %v297_v55 = vrot.slane %v194_v47, 2  ;;  %v2968_v56 = vsel %vm2958_vm2, %v194_v47, %v600_v44 }
  0xa2   :  { %v2976_v59 = vsel %vm2958_vm2, %v194_v47, %v699_v46  ;;  %v199_v0 = vrot.slane %v194_v47, 6 }
  0xa3   :  { %v225_v57 = vpop.f32.mrf.mxu2  ;;  %v2972_v58 = vsel %vm2958_vm2, %v191_v37, %v297_v55  ;;  %v245_v4 = vpop.f32.mrf.mxu3 }
  0xa4   :  { %v226_v60 = vadd.f32 %v225_v57, %v2956_v52  ;;  %v2981_v3 = vsel %vm2958_vm2, %v191_v37, %v199_v0 }
  0xa5   :  { %v246_v11 = vadd.f32 %v245_v4, %v2981_v3 }
  0xa6   :  { %v2298_v61 = vmul.f32 -1.442695, %v226_v60 }
  0xa7   :  { %v2299_v34 = vmul.f32 -1.442695, %v246_v11 }
  0xa8   :  { %2387 = vpow2.f32 %v2298_v61 }
  0xae   :  { %v2388_v62 = vpop.eup %2387 }
  0xaf   :  { %v254_v63 = vadd.f32 1.0, %v2388_v62  ;;  %v307_v62 = vrot.slane %v2964_v54, 2 }
  0xb1   :  { %2389 = vrcp.f32 %v254_v63  ;;  %v267_v15 = vand.u32 2147483648, %v254_v63  ;;  %v265_v25 = vand.u32 2147483647, %v254_v63  ;;  %vm261_vm4 = vweird.f32 %v254_v63 }
  0xb2   :  { %2391 = vtanh.f32 %v246_v11 }
  0xb3   :  { %v268_v28 = vor.u32 1.1754944e-38, %v267_v15  ;;  %vm266_vm6 = vcmp.eq.f32.partialorder %v265_v25, 8.507059e+37  ;;  %2393 = vpow2.f32 %v2299_v34 }
  0xb7   :  { %v2390_v7 = vpop.eup %2389 }
  0xb8   :  { %v257_v8 = vmul.f32 %v2390_v7, %v254_v63  ;;  %vm262_vm3 = vweird.f32 %v2390_v7  ;;  %v2392_v31 = vpop.eup %2391 }
  0xb9   :  { %vm263_vm5 = vmor %vm261_vm4, %vm262_vm3  ;;  %v2394_v35 = vpop.eup %2393 }
  0xba   :  { %v258_v12 = vsub.f32 1.0, %v257_v8  ;;  %v255_v36 = vadd.f32 1.0, %v2394_v35 }
  0xbc   :  { %v259_v16 = vmul.f32 %v2390_v7, %v258_v12  ;;  %2395 = vrcp.f32 %v255_v36  ;;  %v282_v45 = vand.u32 2147483648, %v255_v36  ;;  %vm276_vm7 = vweird.f32 %v255_v36 }
  0xbd   :  { %v280_v47 = vand.u32 2147483647, %v255_v36  ;;  %v308_v12 = vrot.slane %v2972_v58, 2 }
  0xbe   :  { %v260_v27 = vadd.f32 %v2390_v7, %v259_v16  ;;  %v283_v48 = vor.u32 1.1754944e-38, %v282_v45 }
  0xbf   :  { %vm281_vm10 = vcmp.eq.f32.partialorder %v280_v47, 8.507059e+37 }
  0xc0   :  { %v264_v29 = vsel %vm263_vm5, %v2390_v7, %v260_v27 }
  0xc1   :  { %v269_v32 = vsel %vm266_vm6, %v268_v28, %v264_v29 }
  0xc2   :  { %v288_v33 = vmul.f32 %v2392_v31, %v269_v32  ;;  %v2396_v37 = vpop.eup %2395  ;;  %v287_v42 = vmul.f32 0.0, %v269_v32 }
  0xc3   :  { %v272_v38 = vmul.f32 %v2396_v37, %v255_v36  ;;  %vm277_vm8 = vweird.f32 %v2396_v37 }
  0xc4   :  { %290 = vrot.lane.b32.xlu0 %v288_v33, %s2741_s3  ;;  %vm278_vm9 = vmor %vm276_vm7, %vm277_vm8 }
  0xc5   :  { %v273_v40 = vsub.f32 1.0, %v272_v38 }
  0xc7   :  { %v274_v41 = vmul.f32 %v2396_v37, %v273_v40 }
  0xc9   :  { %v275_v46 = vadd.f32 %v2396_v37, %v274_v41 }
  0xcb   :  { %v279_v49 = vsel %vm278_vm9, %v2396_v37, %v275_v46 }
  0xcc   :  { %v284_v57 = vsel %vm281_vm10, %v283_v48, %v279_v49 }
 0x136   :  { %v291_v43 = vpop.permute.xlu0 %290 }
 0x137   :  { %v2985_v44 = vadd.f32 %v291_v43, %v287_v42 }
 0x139   :  { %2397 = vtanh.f32 %v2985_v44 }
 0x13f   :  { %v2398_v55 = vpop.eup %2397 }
 0x140   :  { %v295_v60 = vmul.f32 %v2398_v55, %v284_v57 }
 0x142   :  { %303 = vrot.lane.b32.xlu0 %v295_v60, %s2741_s3 }
 0x1b4   :  { %v2989_v61 = vpop.permute.xlu0 %303 }
 0x1b5   :  { %2300 = vmatmul.msk.f32.vlgmr.msrb.gmra.mxu0 %vm204_vm11, %v2989_v61  ;;  %2301 = vmatmul.msk.f32.vlgmr.msrb.gmra.mxu1 %vm204_vm11, %v2989_v61 }
 0x1b6   :  { %723 = vmatpush.msrb.mxu0 %v2811_v1  ;;  %743 = vmatpush.msrb.mxu1 %v2813_v2 }
 0x1b8   :  { %724 = vmatpush.msrb.mxu0 %v2816_v5  ;;  %744 = vmatpush.msrb.mxu1 %v2819_v6 }
 0x1ba   :  { %725 = vmatpush.msrb.mxu0 %v2822_v9  ;;  %745 = vmatpush.msrb.mxu1 %v2824_v10 }
 0x1bc   :  { %726 = vmatpush.msrb.mxu0 %v2827_v13  ;;  %746 = vmatpush.msrb.mxu1 %v2830_v14 }
 0x1be   :  { %727 = vmatpush.msrb.mxu0 %v2836_v17  ;;  %747 = vmatpush.msrb.mxu1 %v2839_v18 }
 0x1c0   :  { %728 = vmatpush.msrb.mxu0 %v2843_v19  ;;  %748 = vmatpush.msrb.mxu1 %v2846_v20 }
 0x1c2   :  { %729 = vmatpush.msrb.mxu0 %v2850_v21  ;;  %749 = vmatpush.msrb.mxu1 %v2853_v22 }
 0x1c4   :  { %730 = vmatpush.msrb.mxu0 %v2857_v23  ;;  %750 = vmatpush.msrb.mxu1 %v2861_v24 }
 0x232   :  { %v330_v63 = vpop.f32.mrf.mxu0  ;;  %v350_v11 = vpop.f32.mrf.mxu1 }
 0x233   :  { %v331_v0 = vadd.f32 %v330_v63, %v307_v62  ;;  %v351_v16 = vadd.f32 %v350_v11, %v308_v12 }
 0x235   :  { %v2302_v4 = vmul.f32 -1.442695, %v331_v0  ;;  %v2303_v38 = vmul.f32 -1.442695, %v351_v16 }
 0x237   :  { %2399 = vpow2.f32 %v2302_v4 }
 0x23d   :  { %v2400_v7 = vpop.eup %2399 }
 0x23e   :  { %v359_v8 = vadd.f32 1.0, %v2400_v7 }
 0x240   :  { %2401 = vrcp.f32 %v359_v8  ;;  %v372_v28 = vand.u32 2147483648, %v359_v8  ;;  %v370_v31 = vand.u32 2147483647, %v359_v8  ;;  %vm366_vm13 = vweird.f32 %v359_v8 }
 0x241   :  { %2403 = vtanh.f32 %v351_v16 }
 0x242   :  { %v373_v33 = vor.u32 1.1754944e-38, %v372_v28  ;;  %vm371_vm15 = vcmp.eq.f32.partialorder %v370_v31, 8.507059e+37  ;;  %2405 = vpow2.f32 %v2303_v38  ;;  %v407_v28 = vrot.slane %v2981_v3, 4 }
 0x246   :  { %v2402_v15 = vpop.eup %2401 }
 0x247   :  { %v362_v25 = vmul.f32 %v2402_v15, %v359_v8  ;;  %vm367_vm12 = vweird.f32 %v2402_v15  ;;  %v2404_v35 = vpop.eup %2403  ;;  %v406_v8 = vrot.slane %v2956_v52, 4 }
 0x248   :  { %vm368_vm14 = vmor %vm366_vm13, %vm367_vm12  ;;  %v2406_v40 = vpop.eup %2405 }
 0x249   :  { %v363_v27 = vsub.f32 1.0, %v362_v25  ;;  %v360_v41 = vadd.f32 1.0, %v2406_v40 }
 0x24b   :  { %v364_v29 = vmul.f32 %v2402_v15, %v363_v27  ;;  %2407 = vrcp.f32 %v360_v41  ;;  %v387_v57 = vand.u32 2147483648, %v360_v41  ;;  %vm381_vm3 = vweird.f32 %v360_v41 }
 0x24c   :  { %v385_v60 = vand.u32 2147483647, %v360_v41 }
 0x24d   :  { %v365_v32 = vadd.f32 %v2402_v15, %v364_v29  ;;  %v388_v63 = vor.u32 1.1754944e-38, %v387_v57 }
 0x24e   :  { %vm386_vm5 = vcmp.eq.f32.partialorder %v385_v60, 8.507059e+37 }
 0x24f   :  { %v369_v34 = vsel %vm368_vm14, %v2402_v15, %v365_v32 }
 0x250   :  { %v374_v36 = vsel %vm371_vm15, %v373_v33, %v369_v34 }
 0x251   :  { %v393_v37 = vmul.f32 %v2404_v35, %v374_v36  ;;  %v2408_v42 = vpop.eup %2407  ;;  %v392_v47 = vmul.f32 %v374_v36, %v2985_v44 }
 0x252   :  { %v377_v43 = vmul.f32 %v2408_v42, %v360_v41  ;;  %vm382_vm0 = vweird.f32 %v2408_v42 }
 0x253   :  { %395 = vrot.lane.b32.xlu1 %v393_v37, %s2741_s3  ;;  %vm383_vm4 = vmor %vm381_vm3, %vm382_vm0 }
 0x254   :  { %v378_v45 = vsub.f32 1.0, %v377_v43 }
 0x256   :  { %v379_v46 = vmul.f32 %v2408_v42, %v378_v45 }
 0x258   :  { %v380_v55 = vadd.f32 %v2408_v42, %v379_v46 }
 0x25a   :  { %v384_v62 = vsel %vm383_vm4, %v2408_v42, %v380_v55 }
 0x25b   :  { %v389_v4 = vsel %vm386_vm5, %v388_v63, %v384_v62 }
 0x2c5   :  { %v396_v48 = vpop.permute.xlu1 %395 }
 0x2c6   :  { %v3015_v49 = vadd.f32 %v396_v48, %v392_v47 }
 0x2c8   :  { %2409 = vtanh.f32 %v3015_v49 }
 0x2ce   :  { %v2410_v0 = vpop.eup %2409 }
 0x2cf   :  { %v400_v7 = vmul.f32 %v2410_v0, %v389_v4 }
 0x2d1   :  { %402 = vrot.lane.b32.xlu1 %v400_v7, %s2741_s3 }
 0x343   :  { %v3019_v44 = vpop.permute.xlu1 %402 }
 0x344   :  { %2304 = vmatmul.msk.f32.vlgmr.msrb.gmra.mxu2 %vm204_vm11, %v3019_v44  ;;  %2305 = vmatmul.msk.f32.vlgmr.msrb.gmra.mxu3 %vm204_vm11, %v3019_v44 }
 0x345   :  { %822 = vmatpush.msrb.mxu2 %v2811_v1  ;;  %842 = vmatpush.msrb.mxu3 %v2813_v2 }
 0x347   :  { %823 = vmatpush.msrb.mxu2 %v2816_v5  ;;  %843 = vmatpush.msrb.mxu3 %v2819_v6 }
 0x349   :  { %824 = vmatpush.msrb.mxu2 %v2822_v9  ;;  %844 = vmatpush.msrb.mxu3 %v2824_v10 }
 0x34b   :  { %825 = vmatpush.msrb.mxu2 %v2827_v13  ;;  %845 = vmatpush.msrb.mxu3 %v2830_v14 }
 0x34d   :  { %826 = vmatpush.msrb.mxu2 %v2836_v17  ;;  %846 = vmatpush.msrb.mxu3 %v2839_v18 }
 0x34f   :  { %827 = vmatpush.msrb.mxu2 %v2843_v19  ;;  %847 = vmatpush.msrb.mxu3 %v2846_v20 }
 0x351   :  { %828 = vmatpush.msrb.mxu2 %v2850_v21  ;;  %848 = vmatpush.msrb.mxu3 %v2853_v22 }
 0x353   :  { %829 = vmatpush.msrb.mxu2 %v2857_v23  ;;  %849 = vmatpush.msrb.mxu3 %v2861_v24 }
 0x3c7   :  { %v429_v11 = vpop.f32.mrf.mxu2  ;;  %v449_v27 = vpop.f32.mrf.mxu3 }
 0x3c8   :  { %v430_v12 = vadd.f32 %v429_v11, %v406_v8  ;;  %v450_v31 = vadd.f32 %v449_v27, %v407_v28 }
 0x3ca   :  { %v2306_v15 = vmul.f32 -1.442695, %v430_v12  ;;  %v2307_v3 = vmul.f32 -1.442695, %v450_v31 }
 0x3cc   :  { %2411 = vpow2.f32 %v2306_v15 }
 0x3d2   :  { %v2412_v16 = vpop.eup %2411 }
 0x3d3   :  { %v458_v25 = vadd.f32 1.0, %v2412_v16 }
 0x3d5   :  { %2413 = vrcp.f32 %v458_v25  ;;  %v471_v34 = vand.u32 2147483648, %v458_v25  ;;  %v469_v36 = vand.u32 2147483647, %v458_v25  ;;  %vm465_vm7 = vweird.f32 %v458_v25 }
 0x3d6   :  { %2415 = vtanh.f32 %v450_v31 }
 0x3d7   :  { %v472_v37 = vor.u32 1.1754944e-38, %v471_v34  ;;  %vm470_vm9 = vcmp.eq.f32.partialorder %v469_v36, 8.507059e+37  ;;  %2417 = vpow2.f32 %v2307_v3 }
 0x3db   :  { %v2414_v29 = vpop.eup %2413 }
 0x3dc   :  { %v461_v32 = vmul.f32 %v2414_v29, %v458_v25  ;;  %vm466_vm6 = vweird.f32 %v2414_v29  ;;  %v2416_v40 = vpop.eup %2415 }
 0x3dd   :  { %vm467_vm8 = vmor %vm465_vm7, %vm466_vm6  ;;  %v2418_v43 = vpop.eup %2417 }
 0x3de   :  { %v462_v33 = vsub.f32 1.0, %v461_v32  ;;  %v459_v45 = vadd.f32 1.0, %v2418_v43 }
 0x3e0   :  { %v463_v35 = vmul.f32 %v2414_v29, %v462_v33  ;;  %2419 = vrcp.f32 %v459_v45  ;;  %v486_v0 = vand.u32 2147483648, %v459_v45  ;;  %vm480_vm12 = vweird.f32 %v459_v45 }
 0x3e1   :  { %v484_v4 = vand.u32 2147483647, %v459_v45 }
 0x3e2   :  { %v464_v52 = vadd.f32 %v2414_v29, %v463_v35  ;;  %v487_v8 = vor.u32 1.1754944e-38, %v486_v0 }
 0x3e3   :  { %vm485_vm14 = vcmp.eq.f32.partialorder %v484_v4, 8.507059e+37 }
 0x3e4   :  { %v468_v38 = vsel %vm467_vm8, %v2414_v29, %v464_v52 }
 0x3e5   :  { %v473_v41 = vsel %vm470_vm9, %v472_v37, %v468_v38 }
 0x3e6   :  { %v492_v42 = vmul.f32 %v2416_v40, %v473_v41  ;;  %v2420_v46 = vpop.eup %2419  ;;  %v491_v57 = vmul.f32 %v473_v41, %v3015_v49 }
 0x3e7   :  { %v476_v47 = vmul.f32 %v2420_v46, %v459_v45  ;;  %vm481_vm10 = vweird.f32 %v2420_v46 }
 0x3e8   :  { %494 = vrot.lane.b32.xlu2 %v492_v42, %s2741_s3  ;;  %vm482_vm13 = vmor %vm480_vm12, %vm481_vm10 }
 0x3e9   :  { %v477_v48 = vsub.f32 1.0, %v476_v47 }
 0x3eb   :  { %v478_v55 = vmul.f32 %v2420_v46, %v477_v48 }
 0x3ed   :  { %v479_v63 = vadd.f32 %v2420_v46, %v478_v55 }
 0x3ef   :  { %v483_v7 = vsel %vm482_vm13, %v2420_v46, %v479_v63 }
 0x3f0   :  { %v488_v12 = vsel %vm485_vm14, %v487_v8, %v483_v7 }
 0x442   :  { %v495_v60 = vpop.permute.xlu2 %494 }
 0x443   :  { %v3045_v62 = vadd.f32 %v495_v60, %v491_v57 }
 0x445   :  { %2421 = vtanh.f32 %v3045_v62 }
 0x44b   :  { %v2422_v11 = vpop.eup %2421 }
 0x44c   :  { %v499_v15 = vmul.f32 %v2422_v11, %v488_v12 }
 0x44e   :  { %501 = vrot.lane.b32.xlu2 %v499_v15, %s2741_s3 }
 0x4a8   :  { %v3049_v49 = vpop.permute.xlu2 %501 }
 0x4a9   :  { %2308 = vmatmul.msk.f32.vlgmr.msra.gmra.mxu0 %vm204_vm11, %v3049_v49  ;;  %2309 = vmatmul.msk.f32.vlgmr.msra.gmra.mxu1 %vm204_vm11, %v3049_v49 }
 0x4aa   :  { %919 = vmatpush.msra.mxu0 %v2811_v1  ;;  %939 = vmatpush.msra.mxu1 %v2813_v2  ;;  %v503_v1 = vrot.slane %v2964_v54, 6 }
 0x4ac   :  { %920 = vmatpush.msra.mxu0 %v2816_v5  ;;  %940 = vmatpush.msra.mxu1 %v2819_v6 }
 0x4ae   :  { %921 = vmatpush.msra.mxu0 %v2822_v9  ;;  %941 = vmatpush.msra.mxu1 %v2824_v10 }
 0x4b0   :  { %922 = vmatpush.msra.mxu0 %v2827_v13  ;;  %942 = vmatpush.msra.mxu1 %v2830_v14  ;;  %v504_v14 = vrot.slane %v2972_v58, 6 }
 0x4b2   :  { %923 = vmatpush.msra.mxu0 %v2836_v17  ;;  %943 = vmatpush.msra.mxu1 %v2839_v18 }
 0x4b4   :  { %924 = vmatpush.msra.mxu0 %v2843_v19  ;;  %944 = vmatpush.msra.mxu1 %v2846_v20 }
 0x4b6   :  { %925 = vmatpush.msra.mxu0 %v2850_v21  ;;  %945 = vmatpush.msra.mxu1 %v2853_v22 }
 0x4b8   :  { %926 = vmatpush.msra.mxu0 %v2857_v23  ;;  %946 = vmatpush.msra.mxu1 %v2861_v24 }
 0x526   :  { %v526_v2 = vpop.f32.mrf.mxu0  ;;  %v546_v13 = vpop.f32.mrf.mxu1 }
 0x527   :  { %v527_v5 = vadd.f32 %v526_v2, %v503_v1  ;;  %v547_v18 = vadd.f32 %v546_v13, %v504_v14 }
 0x529   :  { %v2310_v6 = vmul.f32 -1.442695, %v527_v5  ;;  %v2311_v58 = vmul.f32 -1.442695, %v547_v18 }
 0x52b   :  { %2423 = vpow2.f32 %v2310_v6 }
 0x531   :  { %v2424_v9 = vpop.eup %2423 }
 0x532   :  { %v555_v10 = vadd.f32 1.0, %v2424_v9 }
 0x534   :  { %2425 = vrcp.f32 %v555_v10  ;;  %v568_v21 = vand.u32 2147483648, %v555_v10  ;;  %v566_v23 = vand.u32 2147483647, %v555_v10  ;;  %vm562_vm0 = vweird.f32 %v555_v10 }
 0x535   :  { %2427 = vtanh.f32 %v547_v18 }
 0x536   :  { %v569_v54 = vor.u32 1.1754944e-38, %v568_v21  ;;  %vm567_vm4 = vcmp.eq.f32.partialorder %v566_v23, 8.507059e+37  ;;  %2429 = vpow2.f32 %v2311_v58 }
 0x53a   :  { %v2426_v17 = vpop.eup %2425 }
 0x53b   :  { %v558_v19 = vmul.f32 %v2426_v17, %v555_v10  ;;  %vm563_vm15 = vweird.f32 %v2426_v17  ;;  %v2428_v25 = vpop.eup %2427 }
 0x53c   :  { %vm564_vm3 = vmor %vm562_vm0, %vm563_vm15  ;;  %v2430_v29 = vpop.eup %2429 }
 0x53d   :  { %v559_v20 = vsub.f32 1.0, %v558_v19  ;;  %v556_v31 = vadd.f32 1.0, %v2430_v29 }
 0x53f   :  { %v560_v22 = vmul.f32 %v2426_v17, %v559_v20  ;;  %2431 = vrcp.f32 %v556_v31  ;;  %v583_v40 = vand.u32 2147483648, %v556_v31  ;;  %vm577_vm6 = vweird.f32 %v556_v31 }
 0x540   :  { %v581_v41 = vand.u32 2147483647, %v556_v31 }
 0x541   :  { %v561_v24 = vadd.f32 %v2426_v17, %v560_v22  ;;  %v584_v3 = vor.u32 1.1754944e-38, %v583_v40  ;;  %v710_v40 = vrot.slane %v2976_v59, 2 }
 0x542   :  { %vm582_vm8 = vcmp.eq.f32.partialorder %v581_v41, 8.507059e+37 }
 0x543   :  { %v565_v16 = vsel %vm564_vm3, %v2426_v17, %v561_v24 }
 0x544   :  { %v570_v27 = vsel %vm567_vm4, %v569_v54, %v565_v16 }
 0x545   :  { %v589_v28 = vmul.f32 %v2428_v25, %v570_v27  ;;  %v2432_v32 = vpop.eup %2431  ;;  %v588_v36 = vmul.f32 %v570_v27, %v3045_v62 }
 0x546   :  { %v573_v33 = vmul.f32 %v2432_v32, %v556_v31  ;;  %vm578_vm5 = vweird.f32 %v2432_v32 }
 0x547   :  { %591 = vrot.lane.b32.xlu0 %v589_v28, %s2741_s3  ;;  %vm579_vm7 = vmor %vm577_vm6, %vm578_vm5 }
 0x548   :  { %v574_v34 = vsub.f32 1.0, %v573_v33  ;;  %v709_v33 = vrot.slane %v2952_v51, 2 }
 0x54a   :  { %v575_v35 = vmul.f32 %v2432_v32, %v574_v34 }
 0x54c   :  { %v576_v38 = vadd.f32 %v2432_v32, %v575_v35 }
 0x54e   :  { %v580_v42 = vsel %vm579_vm7, %v2432_v32, %v576_v38 }
 0x54f   :  { %v585_v45 = vsel %vm582_vm8, %v584_v3, %v580_v42 }
 0x5b9   :  { %v592_v52 = vpop.permute.xlu0 %591 }
 0x5ba   :  { %v594_v37 = vadd.f32 %v592_v52, %v588_v36 }
 0x5bc   :  { %2433 = vtanh.f32 %v594_v37 }
 0x5c2   :  { %v2434_v43 = vpop.eup %2433 }
 0x5c3   :  { %v596_v46 = vmul.f32 %v2434_v43, %v585_v45 }
 0x5c5   :  { %606 = vrot.lane.b32.xlu1 %v596_v46, %s2741_s3 }
 0x637   :  { %v3076_v47 = vpop.permute.xlu1 %606 }
 0x638   :  { %2312 = vmatmul.msk.f32.vlgmr.msra.gmra.mxu2 %vm204_vm11, %v3076_v47  ;;  %2313 = vmatmul.msk.f32.vlgmr.msra.gmra.mxu3 %vm204_vm11, %v3076_v47 }
 0x6bb   :  { %v627_v48 = vpop.f32.mrf.mxu2  ;;  %v647_v63 = vpop.f32.mrf.mxu3 }
 0x6bc   :  { %v628_v55 = vadd.f32 %v627_v48, %v2948_v50  ;;  %v648_v4 = vadd.f32 %v647_v63, %v2968_v56 }
 0x6be   :  { %v2314_v57 = vmul.f32 -1.442695, %v628_v55  ;;  %v2315_v13 = vmul.f32 -1.442695, %v648_v4 }
 0x6c0   :  { %2435 = vpow2.f32 %v2314_v57 }
 0x6c6   :  { %v2436_v60 = vpop.eup %2435 }
 0x6c7   :  { %v656_v62 = vadd.f32 1.0, %v2436_v60 }
 0x6c9   :  { %2437 = vrcp.f32 %v656_v62  ;;  %v669_v11 = vand.u32 2147483648, %v656_v62  ;;  %v667_v15 = vand.u32 2147483647, %v656_v62  ;;  %vm663_vm10 = vweird.f32 %v656_v62 }
 0x6ca   :  { %2439 = vtanh.f32 %v648_v4 }
 0x6cb   :  { %v670_v2 = vor.u32 1.1754944e-38, %v669_v11  ;;  %vm668_vm13 = vcmp.eq.f32.partialorder %v667_v15, 8.507059e+37  ;;  %2441 = vpow2.f32 %v2315_v13 }
 0x6cf   :  { %v2438_v0 = vpop.eup %2437 }
 0x6d0   :  { %v659_v7 = vmul.f32 %v2438_v0, %v656_v62  ;;  %vm664_vm9 = vweird.f32 %v2438_v0  ;;  %v2440_v6 = vpop.eup %2439 }
 0x6d1   :  { %vm665_vm12 = vmor %vm663_vm10, %vm664_vm9  ;;  %v2442_v14 = vpop.eup %2441 }
 0x6d2   :  { %v660_v8 = vsub.f32 1.0, %v659_v7  ;;  %v657_v17 = vadd.f32 1.0, %v2442_v14 }
 0x6d4   :  { %v661_v12 = vmul.f32 %v2438_v0, %v660_v8  ;;  %2443 = vrcp.f32 %v657_v17  ;;  %v684_v16 = vand.u32 2147483648, %v657_v17  ;;  %vm678_vm15 = vweird.f32 %v657_v17 }
 0x6d5   :  { %v682_v25 = vand.u32 2147483647, %v657_v17 }
 0x6d6   :  { %v662_v1 = vadd.f32 %v2438_v0, %v661_v12  ;;  %v685_v28 = vor.u32 1.1754944e-38, %v684_v16 }
 0x6d7   :  { %vm683_vm3 = vcmp.eq.f32.partialorder %v682_v25, 8.507059e+37 }
 0x6d8   :  { %v666_v5 = vsel %vm665_vm12, %v2438_v0, %v662_v1 }
 0x6d9   :  { %v671_v9 = vsel %vm668_vm13, %v670_v2, %v666_v5 }
 0x6da   :  { %v690_v10 = vmul.f32 %v2440_v6, %v671_v9  ;;  %v2444_v18 = vpop.eup %2443  ;;  %v689_v22 = vmul.f32 %v671_v9, %v594_v37 }
 0x6db   :  { %v674_v19 = vmul.f32 %v2444_v18, %v657_v17  ;;  %vm679_vm14 = vweird.f32 %v2444_v18 }
 0x6dc   :  { %692 = vrot.lane.b32.xlu2 %v690_v10, %s2741_s3  ;;  %vm680_vm0 = vmor %vm678_vm15, %vm679_vm14 }
 0x6dd   :  { %v675_v20 = vsub.f32 1.0, %v674_v19 }
 0x6df   :  { %v676_v21 = vmul.f32 %v2444_v18, %v675_v20 }
 0x6e1   :  { %v677_v54 = vadd.f32 %v2444_v18, %v676_v21 }
 0x6e3   :  { %v681_v27 = vsel %vm680_vm0, %v2444_v18, %v677_v54 }
 0x6e4   :  { %v686_v29 = vsel %vm683_vm3, %v685_v28, %v681_v27  ;;  %v809_v28 = vrot.slane %v2968_v56, 4 }
 0x736   :  { %v693_v23 = vpop.permute.xlu2 %692 }
 0x737   :  { %v695_v24 = vadd.f32 %v693_v23, %v689_v22  ;;  %v808_v22 = vrot.slane %v2948_v50, 4 }
 0x739   :  { %2445 = vtanh.f32 %v695_v24 }
 0x73f   :  { %v2446_v58 = vpop.eup %2445 }
 0x740   :  { %v697_v31 = vmul.f32 %v2446_v58, %v686_v29 }
 0x742   :  { %705 = vrot.lane.b32.xlu0 %v697_v31, %s2741_s3 }
 0x7b4   :  { %v3086_v32 = vpop.permute.xlu0 %705 }
 0x7b5   :  { %2316 = vmatmul.msk.f32.vlgmr.msrb.gmra.mxu0 %vm204_vm11, %v3086_v32  ;;  %2317 = vmatmul.msk.f32.vlgmr.msrb.gmra.mxu1 %vm204_vm11, %v3086_v32 }
 0x832   :  { %v732_v34 = vpop.f32.mrf.mxu0  ;;  %v752_v38 = vpop.f32.mrf.mxu1 }
 0x833   :  { %v733_v35 = vadd.f32 %v732_v34, %v709_v33  ;;  %v753_v42 = vadd.f32 %v752_v38, %v710_v40 }
 0x835   :  { %v2318_v36 = vmul.f32 -1.442695, %v733_v35  ;;  %v2319_v4 = vmul.f32 -1.442695, %v753_v42 }
 0x837   :  { %2447 = vpow2.f32 %v2318_v36 }
 0x83d   :  { %v2448_v52 = vpop.eup %2447 }
 0x83e   :  { %v761_v37 = vadd.f32 1.0, %v2448_v52 }
 0x840   :  { %2449 = vrcp.f32 %v761_v37  ;;  %v774_v45 = vand.u32 2147483648, %v761_v37  ;;  %v772_v48 = vand.u32 2147483647, %v761_v37  ;;  %vm768_vm5 = vweird.f32 %v761_v37 }
 0x841   :  { %2451 = vtanh.f32 %v753_v42 }
 0x842   :  { %v775_v57 = vor.u32 1.1754944e-38, %v774_v45  ;;  %vm773_vm7 = vcmp.eq.f32.partialorder %v772_v48, 8.507059e+37  ;;  %2453 = vpow2.f32 %v2319_v4  ;;  %v3112_v45 = vld [vmem:[#allocation7 + $0x78] sm:$0xff]  ;;  %v3119_v48 = vld [vmem:[#allocation7 + $0x68] sm:$0xff] }
 0x843   :  { %1137 = vmatpush.msrb.mxu1 %v3112_v45  ;;  %1091 = vmatpush.msra.mxu3 %v3112_v45 }
 0x845   :  { %1138 = vmatpush.msrb.mxu1 %v3119_v48  ;;  %1092 = vmatpush.msra.mxu3 %v3119_v48 }
 0x846   :  { %v2450_v41 = vpop.eup %2449 }
 0x847   :  { %v764_v3 = vmul.f32 %v2450_v41, %v761_v37  ;;  %vm769_vm4 = vweird.f32 %v2450_v41  ;;  %v2452_v62 = vpop.eup %2451 }
 0x848   :  { %vm770_vm6 = vmor %vm768_vm5, %vm769_vm4  ;;  %v2454_v7 = vpop.eup %2453 }
 0x849   :  { %v765_v43 = vsub.f32 1.0, %v764_v3  ;;  %v762_v8 = vadd.f32 1.0, %v2454_v7  ;;  %v3145_v7 = vld [vmem:[#allocation7 + $0x20] sm:$0xff] }
 0x84b   :  { %v766_v46 = vmul.f32 %v2450_v41, %v765_v43  ;;  %2455 = vrcp.f32 %v762_v8  ;;  %v789_v10 = vand.u32 2147483648, %v762_v8  ;;  %vm783_vm9 = vweird.f32 %v762_v8  ;;  %v3110_v43 = vld [vmem:[#allocation7 + $0x70] sm:$0xff] }
 0x84c   :  { %v787_v13 = vand.u32 2147483647, %v762_v8  ;;  %1117 = vmatpush.msrb.mxu0 %v3110_v43  ;;  %1071 = vmatpush.msra.mxu2 %v3110_v43 }
 0x84d   :  { %v767_v55 = vadd.f32 %v2450_v41, %v766_v46  ;;  %v790_v17 = vor.u32 1.1754944e-38, %v789_v10  ;;  %v3114_v46 = vld [vmem:[#allocation7 + $0x60] sm:$0xff] }
 0x84e   :  { %vm788_vm12 = vcmp.eq.f32.partialorder %v787_v13, 8.507059e+37  ;;  %1118 = vmatpush.msrb.mxu0 %v3114_v46  ;;  %1072 = vmatpush.msra.mxu2 %v3114_v46 }
 0x84f   :  { %v771_v60 = vsel %vm770_vm6, %v2450_v41, %v767_v55  ;;  %v3121_v55 = vld [vmem:[#allocation7 + $0x50] sm:$0xff] }
 0x850   :  { %v776_v63 = vsel %vm773_vm7, %v775_v57, %v771_v60  ;;  %v3123_v57 = vld [vmem:[#allocation7 + $0x58] sm:$0xff]  ;;  %v3129_v60 = vld [vmem:[#allocation7 + $0x40] sm:$0xff]  ;;  %1119 = vmatpush.msrb.mxu0 %v3121_v55  ;;  %1073 = vmatpush.msra.mxu2 %v3121_v55  ;;  %vm110_vm7 = vcmp.lt.s32.totalorder %v2938_v30, 32 }
 0x851   :  { %v795_v0 = vmul.f32 %v2452_v62, %v776_v63  ;;  %v2456_v11 = vpop.eup %2455  ;;  %v794_v2 = vmul.f32 %v776_v63, %v695_v24  ;;  %v3131_v62 = vld [vmem:[#allocation7 + $0x48] sm:$0xff]  ;;  %1139 = vmatpush.msrb.mxu1 %v3123_v57  ;;  %v3137_v63 = vld [vmem:[#allocation7 + $0x30] sm:$0xff]  ;;  %1093 = vmatpush.msra.mxu3 %v3123_v57 }
 0x852   :  { %v779_v12 = vmul.f32 %v2456_v11, %v762_v8  ;;  %vm784_vm8 = vweird.f32 %v2456_v11  ;;  %1120 = vmatpush.msrb.mxu0 %v3129_v60  ;;  %v3147_v8 = vld [vmem:[#allocation7 + $0x28] sm:$0xff]  ;;  %1074 = vmatpush.msra.mxu2 %v3129_v60 }
 0x853   :  { %797 = vrot.lane.b32.xlu1 %v795_v0, %s2741_s3  ;;  %vm785_vm10 = vmor %vm783_vm9, %vm784_vm8  ;;  %v3139_v0 = vld [vmem:[#allocation7 + $0x38] sm:$0xff]  ;;  %1140 = vmatpush.msrb.mxu1 %v3131_v62 }
 0x854   :  { %v780_v15 = vsub.f32 1.0, %v779_v12  ;;  %1094 = vmatpush.msra.mxu3 %v3131_v62  ;;  %1121 = vmatpush.msrb.mxu0 %v3137_v63  ;;  %v3154_v12 = vld [vmem:[#allocation7 + $0x10] sm:$0xff] }
 0x855   :  { %1141 = vmatpush.msrb.mxu1 %v3139_v0  ;;  %1075 = vmatpush.msra.mxu2 %v3137_v63 }
 0x856   :  { %v781_v1 = vmul.f32 %v2456_v11, %v780_v15  ;;  %v3156_v15 = vld [vmem:[#allocation7 + $0x18] sm:$0xff]  ;;  %1095 = vmatpush.msra.mxu3 %v3139_v0  ;;  %1122 = vmatpush.msrb.mxu0 %v3145_v7 }
 0x857   :  { %1142 = vmatpush.msrb.mxu1 %v3147_v8  ;;  %1076 = vmatpush.msra.mxu2 %v3145_v7 }
 0x858   :  { %v782_v9 = vadd.f32 %v2456_v11, %v781_v1  ;;  %v3162_v1 = vld [vmem:[#allocation7] sm:$0xff]  ;;  %1096 = vmatpush.msra.mxu3 %v3147_v8  ;;  %1123 = vmatpush.msrb.mxu0 %v3154_v12 }
 0x859   :  { %1143 = vmatpush.msrb.mxu1 %v3156_v15  ;;  %1077 = vmatpush.msra.mxu2 %v3154_v12 }
 0x85a   :  { %v786_v14 = vsel %vm785_vm10, %v2456_v11, %v782_v9  ;;  %1097 = vmatpush.msra.mxu3 %v3156_v15  ;;  %1124 = vmatpush.msrb.mxu0 %v3162_v1 }
 0x85b   :  { %v791_v19 = vsel %vm788_vm12, %v790_v17, %v786_v14  ;;  %1078 = vmatpush.msra.mxu2 %v3162_v1 }
 0x8c5   :  { %v798_v5 = vpop.permute.xlu1 %797 }
 0x8c6   :  { %v3095_v6 = vadd.f32 %v798_v5, %v794_v2  ;;  %v3164_v2 = vld [vmem:[#allocation7 + $0x8] sm:$0xff] }
 0x8c7   :  { %1144 = vmatpush.msrb.mxu1 %v3164_v2  ;;  %1098 = vmatpush.msra.mxu3 %v3164_v2 }
 0x8c8   :  { %2457 = vtanh.f32 %v3095_v6 }
 0x8ce   :  { %v2458_v18 = vpop.eup %2457 }
 0x8cf   :  { %v802_v20 = vmul.f32 %v2458_v18, %v791_v19 }
 0x8d1   :  { %804 = vrot.lane.b32.xlu2 %v802_v20, %s2741_s3 }
 0x92b   :  { %v3099_v21 = vpop.permute.xlu2 %804 }
 0x92c   :  { %2320 = vmatmul.msk.f32.vlgmr.msrb.gmra.mxu2 %vm204_vm11, %v3099_v21  ;;  %2321 = vmatmul.msk.f32.vlgmr.msrb.gmra.mxu3 %vm204_vm11, %v3099_v21 }
 0x92d   :  { %1163 = vmatpush.msrb.mxu2 %v3110_v43  ;;  %1183 = vmatpush.msrb.mxu3 %v3112_v45 }
 0x92f   :  { %1164 = vmatpush.msrb.mxu2 %v3114_v46  ;;  %1184 = vmatpush.msrb.mxu3 %v3119_v48 }
 0x931   :  { %1165 = vmatpush.msrb.mxu2 %v3121_v55  ;;  %1185 = vmatpush.msrb.mxu3 %v3123_v57 }
 0x933   :  { %1166 = vmatpush.msrb.mxu2 %v3129_v60  ;;  %1186 = vmatpush.msrb.mxu3 %v3131_v62 }
 0x935   :  { %1167 = vmatpush.msrb.mxu2 %v3137_v63  ;;  %1187 = vmatpush.msrb.mxu3 %v3139_v0 }
 0x937   :  { %1168 = vmatpush.msrb.mxu2 %v3145_v7  ;;  %1188 = vmatpush.msrb.mxu3 %v3147_v8 }
 0x939   :  { %1169 = vmatpush.msrb.mxu2 %v3154_v12  ;;  %1189 = vmatpush.msrb.mxu3 %v3156_v15 }
 0x93b   :  { %1170 = vmatpush.msrb.mxu2 %v3162_v1  ;;  %1190 = vmatpush.msrb.mxu3 %v3164_v2 }
 0x9af   :  { %v831_v23 = vpop.f32.mrf.mxu2  ;;  %v851_v27 = vpop.f32.mrf.mxu3 }
 0x9b0   :  { %v832_v24 = vadd.f32 %v831_v23, %v808_v22  ;;  %v852_v29 = vadd.f32 %v851_v27, %v809_v28  ;;  %v1285_v27 = vsel %vm110_vm7, %v3099_v21, %v3049_v49  ;;  %v905_v28 = vrot.slane %v2952_v51, 6 }
 0x9b2   :  { %v2322_v54 = vmul.f32 -1.442695, %v832_v24  ;;  %v2323_v56 = vmul.f32 -1.442695, %v852_v29 }
 0x9b4   :  { %2459 = vpow2.f32 %v2322_v54 }
 0x9ba   :  { %v2460_v16 = vpop.eup %2459 }
 0x9bb   :  { %v860_v25 = vadd.f32 1.0, %v2460_v16 }
 0x9bd   :  { %2461 = vrcp.f32 %v860_v25  ;;  %v873_v34 = vand.u32 2147483648, %v860_v25  ;;  %v871_v36 = vand.u32 2147483647, %v860_v25  ;;  %vm867_vm14 = vweird.f32 %v860_v25 }
 0x9be   :  { %2463 = vtanh.f32 %v852_v29 }
 0x9bf   :  { %v874_v52 = vor.u32 1.1754944e-38, %v873_v34  ;;  %vm872_vm0 = vcmp.eq.f32.partialorder %v871_v36, 8.507059e+37  ;;  %2465 = vpow2.f32 %v2323_v56  ;;  %v906_v36 = vrot.slane %v2976_v59, 6 }
 0x9c3   :  { %v2462_v58 = vpop.eup %2461 }
 0x9c4   :  { %v863_v31 = vmul.f32 %v2462_v58, %v860_v25  ;;  %vm868_vm13 = vweird.f32 %v2462_v58  ;;  %v2464_v38 = vpop.eup %2463  ;;  %v1197_v25 = vsel %vm110_vm7, %v3076_v47, %v3086_v32 }
 0x9c5   :  { %vm869_vm15 = vmor %vm867_vm14, %vm868_vm13  ;;  %v2466_v42 = vpop.eup %2465 }
 0x9c6   :  { %v864_v33 = vsub.f32 1.0, %v863_v31  ;;  %v3108_v3 = vadd.f32 1.0, %v2466_v42 }
 0x9c8   :  { %v865_v35 = vmul.f32 %v2462_v58, %v864_v33  ;;  %2467 = vrcp.f32 %v3108_v3  ;;  %v888_v18 = vand.u32 2147483648, %v3108_v3  ;;  %vm882_vm4 = vweird.f32 %v3108_v3 }
 0x9ca   :  { %v866_v50 = vadd.f32 %v2462_v58, %v865_v35  ;;  %v889_v20 = vor.u32 1.1754944e-38, %v888_v18 }
 0x9cc   :  { %v870_v37 = vsel %vm869_vm15, %v2462_v58, %v866_v50 }
 0x9cd   :  { %v875_v40 = vsel %vm872_vm0, %v874_v52, %v870_v37 }
 0x9ce   :  { %v894_v41 = vmul.f32 %v2464_v38, %v875_v40  ;;  %v2468_v4 = vpop.eup %2467  ;;  %v893_v10 = vmul.f32 %v875_v40, %v3095_v6  ;;  %v886_v6 = vand.u32 2147483647, %v3108_v3 }
 0x9cf   :  { %v878_v11 = vmul.f32 %v2468_v4, %v3108_v3  ;;  %vm883_vm3 = vweird.f32 %v2468_v4 }
 0x9d0   :  { %896 = vrot.lane.b32.xlu0 %v894_v41, %s2741_s3  ;;  %vm884_vm5 = vmor %vm882_vm4, %vm883_vm3  ;;  %vm887_vm6 = vcmp.eq.f32.partialorder %v886_v6, 8.507059e+37  ;;  %vm1003_vm3 = vcmask 254976  }
 0x9d1   :  { %v879_v5 = vsub.f32 1.0, %v878_v11 }
 0x9d3   :  { %v880_v9 = vmul.f32 %v2468_v4, %v879_v5 }
 0x9d5   :  { %v881_v17 = vadd.f32 %v2468_v4, %v880_v9 }
 0x9d7   :  { %v885_v19 = vsel %vm884_vm5, %v2468_v4, %v881_v17 }
 0x9d8   :  { %v890_v23 = vsel %vm887_vm6, %v889_v20, %v885_v19 }
 0xa42   :  { %v897_v13 = vpop.permute.xlu0 %896 }
 0xa43   :  { %v3181_v14 = vadd.f32 %v897_v13, %v893_v10 }
 0xa45   :  { %2469 = vtanh.f32 %v3181_v14 }
 0xa4b   :  { %v2470_v22 = vpop.eup %2469 }
 0xa4c   :  { %v901_v24 = vmul.f32 %v2470_v22, %v890_v23 }
 0xa4e   :  { %903 = vrot.lane.b32.xlu1 %v901_v24, %s2741_s3 }
 0xac0   :  { %v3200_v54 = vpop.permute.xlu1 %903 }
 0xac1   :  { %2324 = vmatmul.msk.f32.vlgmr.msra.gmra.mxu0 %vm204_vm11, %v3200_v54  ;;  %2325 = vmatmul.msk.f32.vlgmr.msra.gmra.mxu1 %vm204_vm11, %v3200_v54  ;;  %v1105_v16 = vsel %vm110_vm7, %v3019_v44, %v3200_v54 }
 0xac2   :  { %1209 = vmatpush.msra.mxu0 %v3110_v43  ;;  %1229 = vmatpush.msra.mxu1 %v3112_v45 }
 0xac4   :  { %1210 = vmatpush.msra.mxu0 %v3114_v46  ;;  %1230 = vmatpush.msra.mxu1 %v3119_v48 }
 0xac6   :  { %1211 = vmatpush.msra.mxu0 %v3121_v55  ;;  %1231 = vmatpush.msra.mxu1 %v3123_v57 }
 0xac8   :  { %1212 = vmatpush.msra.mxu0 %v3129_v60  ;;  %1232 = vmatpush.msra.mxu1 %v3131_v62 }
 0xac9   :  { %2330 = vmatmul.msk.f32.vlgmr.msrb.gmra.mxu0 %vm204_vm11, %v1105_v16  ;;  %2331 = vmatmul.msk.f32.vlgmr.msrb.gmra.mxu1 %vm204_vm11, %v1105_v16 }
 0xaca   :  { %1213 = vmatpush.msra.mxu0 %v3137_v63  ;;  %1233 = vmatpush.msra.mxu1 %v3139_v0 }
 0xacc   :  { %1214 = vmatpush.msra.mxu0 %v3145_v7  ;;  %1234 = vmatpush.msra.mxu1 %v3147_v8 }
 0xace   :  { %1215 = vmatpush.msra.mxu0 %v3154_v12  ;;  %1235 = vmatpush.msra.mxu1 %v3156_v15 }
 0xad0   :  { %1216 = vmatpush.msra.mxu0 %v3162_v1  ;;  %1236 = vmatpush.msra.mxu1 %v3164_v2 }
 0xad1   :  { %2334 = vmatmul.msk.f32.vlgmr.msra.gmra.mxu0 %vm204_vm11, %v1197_v25  ;;  %2335 = vmatmul.msk.f32.vlgmr.msra.gmra.mxu1 %vm204_vm11, %v1197_v25 }
 0xad2   :  { %1297 = vmatpush.msrb.mxu0 %v3110_v43  ;;  %1317 = vmatpush.msrb.mxu1 %v3112_v45 }
 0xad4   :  { %1298 = vmatpush.msrb.mxu0 %v3114_v46  ;;  %1318 = vmatpush.msrb.mxu1 %v3119_v48 }
 0xad6   :  { %1299 = vmatpush.msrb.mxu0 %v3121_v55  ;;  %1319 = vmatpush.msrb.mxu1 %v3123_v57 }
 0xad8   :  { %1300 = vmatpush.msrb.mxu0 %v3129_v60  ;;  %1320 = vmatpush.msrb.mxu1 %v3131_v62 }
 0xada   :  { %1301 = vmatpush.msrb.mxu0 %v3137_v63  ;;  %1321 = vmatpush.msrb.mxu1 %v3139_v0 }
 0xadc   :  { %1302 = vmatpush.msrb.mxu0 %v3145_v7  ;;  %1322 = vmatpush.msrb.mxu1 %v3147_v8 }
 0xade   :  { %1303 = vmatpush.msrb.mxu0 %v3154_v12  ;;  %1323 = vmatpush.msrb.mxu1 %v3156_v15 }
 0xae0   :  { %1304 = vmatpush.msrb.mxu0 %v3162_v1  ;;  %1324 = vmatpush.msrb.mxu1 %v3164_v2 }
 0xae1   :  { %2338 = vmatmul.msk.f32.vlgmr.msrb.gmra.mxu0 %vm204_vm11, %v1285_v27  ;;  %2339 = vmatmul.msk.f32.vlgmr.msrb.gmra.mxu1 %vm204_vm11, %v1285_v27 }
 0xae2   :  { %1385 = vmatpush.msra.mxu0 %v3110_v43  ;;  %1405 = vmatpush.msra.mxu1 %v3112_v45 }
 0xae4   :  { %1386 = vmatpush.msra.mxu0 %v3114_v46  ;;  %1406 = vmatpush.msra.mxu1 %v3119_v48 }
 0xae6   :  { %1387 = vmatpush.msra.mxu0 %v3121_v55  ;;  %1407 = vmatpush.msra.mxu1 %v3123_v57 }
 0xae8   :  { %1388 = vmatpush.msra.mxu0 %v3129_v60  ;;  %1408 = vmatpush.msra.mxu1 %v3131_v62 }
 0xaea   :  { %1389 = vmatpush.msra.mxu0 %v3137_v63  ;;  %1409 = vmatpush.msra.mxu1 %v3139_v0 }
 0xaec   :  { %1390 = vmatpush.msra.mxu0 %v3145_v7  ;;  %1410 = vmatpush.msra.mxu1 %v3147_v8 }
 0xaee   :  { %1391 = vmatpush.msra.mxu0 %v3154_v12  ;;  %1411 = vmatpush.msra.mxu1 %v3156_v15 }
 0xaf0   :  { %1392 = vmatpush.msra.mxu0 %v3162_v1  ;;  %1412 = vmatpush.msra.mxu1 %v3164_v2 }
 0xb3e   :  { %v928_v58 = vpop.f32.mrf.mxu0  ;;  %v948_v35 = vpop.f32.mrf.mxu1 }
 0xb3f   :  { %v929_v29 = vadd.f32 %v928_v58, %v905_v28  ;;  %v949_v52 = vadd.f32 %v948_v35, %v906_v36  ;;  %v3316_v35 = vld [vmem:[%s3825_s5 + $0x60] sm:$0xff]  ;;  %v3321_v36 = vld [vmem:[%s3825_s5 + $0x68] sm:$0xff] }
 0xb41   :  { %v2326_v31 = vmul.f32 -1.442695, %v929_v29  ;;  %v2327_v59 = vmul.f32 -1.442695, %v949_v52 }
 0xb43   :  { %2471 = vpow2.f32 %v2326_v31 }
 0xb49   :  { %v2472_v33 = vpop.eup %2471 }
 0xb4a   :  { %v957_v34 = vadd.f32 1.0, %v2472_v33 }
 0xb4c   :  { %2473 = vrcp.f32 %v957_v34  ;;  %v970_v40 = vand.u32 2147483648, %v957_v34  ;;  %v968_v56 = vand.u32 2147483647, %v957_v34  ;;  %vm964_vm9 = vweird.f32 %v957_v34 }
 0xb4d   :  { %2475 = vtanh.f32 %v949_v52  ;;  %v3338_v52 = vld [vmem:[%s3825_s5 + $0x50] sm:$0xff] }
 0xb4e   :  { %v971_v42 = vor.u32 1.1754944e-38, %v970_v40  ;;  %vm969_vm12 = vcmp.eq.f32.partialorder %v968_v56, 8.507059e+37  ;;  %2477 = vpow2.f32 %v2327_v59  ;;  %v3371_v40 = vld [vmem:[%s3825_s5 + $0x38] sm:$0xff]  ;;  %v3390_v56 = vld [vmem:[%s3825_s5 + $0x20] sm:$0xff] }
 0xb52   :  { %v2474_v50 = vpop.eup %2473 }
 0xb53   :  { %v960_v37 = vmul.f32 %v2474_v50, %v957_v34  ;;  %vm965_vm8 = vweird.f32 %v2474_v50  ;;  %v2476_v4 = vpop.eup %2475  ;;  %v3307_v34 = vld [vmem:[%s3825_s5 + $0x78] sm:$0xff] }
 0xb54   :  { %vm966_vm10 = vmor %vm964_vm9, %vm965_vm8  ;;  %v2478_v9 = vpop.eup %2477  ;;  %1542 = vmatpush.msrb.mxu1 %v3307_v34 }
 0xb55   :  { %v961_v38 = vsub.f32 1.0, %v960_v37  ;;  %v958_v10 = vadd.f32 1.0, %v2478_v9  ;;  %v3343_v37 = vld [vmem:[%s3825_s5 + $0x58] sm:$0xff] }
 0xb56   :  { %1543 = vmatpush.msrb.mxu1 %v3321_v36 }
 0xb57   :  { %v962_v41 = vmul.f32 %v2474_v50, %v961_v38  ;;  %2479 = vrcp.f32 %v958_v10  ;;  %v985_v24 = vand.u32 2147483648, %v958_v10  ;;  %vm979_vm14 = vweird.f32 %v958_v10  ;;  %v3366_v38 = vld [vmem:[%s3825_s5 + $0x30] sm:$0xff] }
 0xb58   :  { %v983_v16 = vand.u32 2147483647, %v958_v10  ;;  %1544 = vmatpush.msrb.mxu1 %v3343_v37 }
 0xb59   :  { %v963_v51 = vadd.f32 %v2474_v50, %v962_v41  ;;  %v986_v27 = vor.u32 1.1754944e-38, %v985_v24  ;;  %v1241_v41 = vsel %vm110_vm7, %v3086_v32, %v3076_v47  ;;  %v3404_v47 = vld [vmem:[%s3825_s5 + $0x10] sm:$0xff]  ;;  %v3409_v32 = vld [vmem:[%s3825_s5 + $0x18] sm:$0xff] }
 0xb5a   :  { %vm984_vm0 = vcmp.eq.f32.partialorder %v983_v16, 8.507059e+37 }
 0xb5b   :  { %v967_v3 = vsel %vm966_vm10, %v2474_v50, %v963_v51  ;;  %v1151_v50 = vsel %vm110_vm7, %v3049_v49, %v3099_v21  ;;  %v3352_v49 = vld [vmem:[%s3825_s5 + $0x40] sm:$0xff]  ;;  %v3357_v21 = vld [vmem:[%s3825_s5 + $0x48] sm:$0xff] }
 0xb5c   :  { %v972_v11 = vsel %vm969_vm12, %v971_v42, %v967_v3  ;;  %1545 = vmatpush.msrb.mxu1 %v3357_v21 }
 0xb5d   :  { %v991_v5 = vmul.f32 %v2476_v4, %v972_v11  ;;  %v2480_v13 = vpop.eup %2479  ;;  %v990_v19 = vmul.f32 %v972_v11, %v3181_v14 }
 0xb5e   :  { %v975_v17 = vmul.f32 %v2480_v13, %v958_v10  ;;  %vm980_vm13 = vweird.f32 %v2480_v13  ;;  %1546 = vmatpush.msrb.mxu1 %v3371_v40 }
 0xb5f   :  { %993 = vrot.lane.b32.xlu2 %v991_v5, %s2741_s3  ;;  %vm981_vm15 = vmor %vm979_vm14, %vm980_vm13 }
 0xb60   :  { %v976_v18 = vsub.f32 1.0, %v975_v17 }
 0xb62   :  { %v977_v6 = vmul.f32 %v2480_v13, %v976_v18 }
 0xb64   :  { %v978_v23 = vadd.f32 %v2480_v13, %v977_v6 }
 0xb66   :  { %v982_v25 = vsel %vm981_vm15, %v2480_v13, %v978_v23 }
 0xb67   :  { %v987_v58 = vsel %vm984_vm0, %v986_v27, %v982_v25 }
 0xbb9   :  { %v994_v20 = vpop.permute.xlu2 %993 }
 0xbba   :  { %v3277_v22 = vadd.f32 %v994_v20, %v990_v19 }
 0xbbc   :  { %2481 = vtanh.f32 %v3277_v22 }
 0xbc2   :  { %v2482_v28 = vpop.eup %2481 }
 0xbc3   :  { %v3280_v29 = vmul.f32 %v2482_v28, %v987_v58 }
 0xbc5   :  { %1000 = vrot.lane.b32.xlu0 %v3280_v29, %s2741_s3 }
 0xc37   :  { %v1001_v14 = vpop.permute.xlu0 %1000 }
 0xc38   :  { %1004 = vst.msk [vmem:[#allocation9] sm:$0x3] %vm1003_vm3, %v1001_v14  ;;  %v1054_v31 = vsel %vm110_vm7, %v2989_v61, %v1001_v14  ;;  %v1373_v33 = vsel %vm110_vm7, %v1001_v14, %v2989_v61  ;;  %v3302_v61 = vld [vmem:[%s3825_s5 + $0x70] sm:$0xff] }
 0xc39   :  { %2328 = vmatmul.msk.f32.vlgmr.msra.gmra.mxu2 %vm204_vm11, %v1054_v31  ;;  %2329 = vmatmul.msk.f32.vlgmr.msra.gmra.mxu3 %vm204_vm11, %v1054_v31 }
 0xc3a   :  { %1253 = vmatpush.msra.mxu2 %v3110_v43  ;;  %1273 = vmatpush.msra.mxu3 %v3112_v45 }
 0xc3b   :  { %2342 = vmatmul.msk.f32.vlgmr.msra.gmra.mxu0 %vm204_vm11, %v1373_v33  ;;  %2343 = vmatmul.msk.f32.vlgmr.msra.gmra.mxu1 %vm204_vm11, %v1373_v33 }
 0xc3c   :  { %1254 = vmatpush.msra.mxu2 %v3114_v46  ;;  %1274 = vmatpush.msra.mxu3 %v3119_v48 }
 0xc3d   :  { %1522 = vmatpush.msrb.mxu0 %v3302_v61 }
 0xc3e   :  { %1255 = vmatpush.msra.mxu2 %v3121_v55  ;;  %1275 = vmatpush.msra.mxu3 %v3123_v57 }
 0xc3f   :  { %1523 = vmatpush.msrb.mxu0 %v3316_v35 }
 0xc40   :  { %1256 = vmatpush.msra.mxu2 %v3129_v60  ;;  %1276 = vmatpush.msra.mxu3 %v3131_v62 }
 0xc41   :  { %2332 = vmatmul.msk.f32.vlgmr.msrb.gmra.mxu2 %vm204_vm11, %v1151_v50  ;;  %2333 = vmatmul.msk.f32.vlgmr.msrb.gmra.mxu3 %vm204_vm11, %v1151_v50 }
 0xc42   :  { %1257 = vmatpush.msra.mxu2 %v3137_v63  ;;  %1277 = vmatpush.msra.mxu3 %v3139_v0 }
 0xc43   :  { %1524 = vmatpush.msrb.mxu0 %v3338_v52 }
 0xc44   :  { %1258 = vmatpush.msra.mxu2 %v3145_v7  ;;  %1278 = vmatpush.msra.mxu3 %v3147_v8 }
 0xc45   :  { %1525 = vmatpush.msrb.mxu0 %v3352_v49 }
 0xc46   :  { %1259 = vmatpush.msra.mxu2 %v3154_v12  ;;  %1279 = vmatpush.msra.mxu3 %v3156_v15 }
 0xc47   :  { %1526 = vmatpush.msrb.mxu0 %v3366_v38 }
 0xc48   :  { %1260 = vmatpush.msra.mxu2 %v3162_v1  ;;  %1280 = vmatpush.msra.mxu3 %v3164_v2 }
 0xc49   :  { %2336 = vmatmul.msk.f32.vlgmr.msra.gmra.mxu2 %vm204_vm11, %v1241_v41  ;;  %2337 = vmatmul.msk.f32.vlgmr.msra.gmra.mxu3 %vm204_vm11, %v1241_v41 }
 0xc4a   :  { %1341 = vmatpush.msrb.mxu2 %v3110_v43  ;;  %1361 = vmatpush.msrb.mxu3 %v3112_v45  ;;  %v3395_v43 = vld [vmem:[%s3825_s5 + $0x28] sm:$0xff]  ;;  %v3418_v45 = vld [vmem:[%s3825_s5] sm:$0xff] }
 0xc4b   :  { %1527 = vmatpush.msrb.mxu0 %v3390_v56  ;;  %1547 = vmatpush.msrb.mxu1 %v3395_v43 }
 0xc4c   :  { %1342 = vmatpush.msrb.mxu2 %v3114_v46  ;;  %1362 = vmatpush.msrb.mxu3 %v3119_v48  ;;  %v3423_v46 = vld [vmem:[%s3825_s5 + $0x8] sm:$0xff]  ;;  %v1329_v48 = vsel %vm110_vm7, %v3200_v54, %v3019_v44  ;;  %v1146_v44 = vpop.f32.mrf.mxu1  ;;  %s2745_s5 = smov [#allocation11]  }
 0xc4d   :  { %1528 = vmatpush.msrb.mxu0 %v3404_v47  ;;  %1548 = vmatpush.msrb.mxu1 %v3409_v32  ;;  %s2269_s20 = sshll.u32 %s2745_s5, 4  ;;  %s2270_s20 = int_to_ptr.vmem [resolvable:$true] %s2269_s20 }
 0xc4e   :  { %1343 = vmatpush.msrb.mxu2 %v3121_v55  ;;  %1363 = vmatpush.msrb.mxu3 %v3123_v57 }
 0xc4f   :  { %1529 = vmatpush.msrb.mxu0 %v3418_v45  ;;  %1549 = vmatpush.msrb.mxu1 %v3423_v46 }
 0xc50   :  { %1344 = vmatpush.msrb.mxu2 %v3129_v60  ;;  %1364 = vmatpush.msrb.mxu3 %v3131_v62 }
 0xc51   :  { %1712 = vmatpush.msra.mxu0 %v3302_v61  ;;  %1732 = vmatpush.msra.mxu1 %v3307_v34 }
 0xc52   :  { %1345 = vmatpush.msrb.mxu2 %v3137_v63  ;;  %1365 = vmatpush.msrb.mxu3 %v3139_v0  ;;  %v1036_v63 = vld [vmem:[%s3826_s6] sm:$0x3]  ;;  %s2742_s6 = smov 32  }
 0xc53   :  { %1713 = vmatpush.msra.mxu0 %v3316_v35  ;;  %1733 = vmatpush.msra.mxu1 %v3321_v36 }
 0xc54   :  { %1346 = vmatpush.msrb.mxu2 %v3145_v7  ;;  %1366 = vmatpush.msrb.mxu3 %v3147_v8  ;;  %v1238_v57 = vpop.f32.mrf.mxu1  ;;  %v1056_v8 = vperm.slane %v1036_v63, 0 }
 0xc55   :  { %1714 = vmatpush.msra.mxu0 %v3338_v52  ;;  %1734 = vmatpush.msra.mxu1 %v3343_v37 }
 0xc56   :  { %1347 = vmatpush.msrb.mxu2 %v3154_v12  ;;  %1367 = vmatpush.msrb.mxu3 %v3156_v15  ;;  %v1057_v12 = vperm.slane %v1036_v63, 1 }
 0xc57   :  { %1715 = vmatpush.msra.mxu0 %v3352_v49  ;;  %1735 = vmatpush.msra.mxu1 %v3357_v21 }
 0xc58   :  { %1348 = vmatpush.msrb.mxu2 %v3162_v1  ;;  %1368 = vmatpush.msrb.mxu3 %v3164_v2  ;;  %v3544_v23 = vadd.f32 %v1238_v57, %v1057_v12  ;;  %v3568_v50 = vadd.f32 %v1146_v44, %v1057_v12 }
 0xc59   :  { %2340 = vmatmul.msk.f32.vlgmr.msrb.gmra.mxu2 %vm204_vm11, %v1329_v48  ;;  %2341 = vmatmul.msk.f32.vlgmr.msrb.gmra.mxu3 %vm204_vm11, %v1329_v48 }
 0xc5a   :  { %1427 = vmatpush.msra.mxu2 %v3302_v61  ;;  %1447 = vmatpush.msra.mxu3 %v3307_v34 }
 0xc5b   :  { %1716 = vmatpush.msra.mxu0 %v3366_v38  ;;  %1736 = vmatpush.msra.mxu1 %v3371_v40 }
 0xc5c   :  { %1428 = vmatpush.msra.mxu2 %v3316_v35  ;;  %1448 = vmatpush.msra.mxu3 %v3321_v36  ;;  %v1326_v62 = vpop.f32.mrf.mxu1 }
 0xc5d   :  { %1717 = vmatpush.msra.mxu0 %v3390_v56  ;;  %1737 = vmatpush.msra.mxu1 %v3395_v43  ;;  %v3528_v9 = vadd.f32 %v1326_v62, %v1057_v12 }
 0xc5e   :  { %1429 = vmatpush.msra.mxu2 %v3338_v52  ;;  %1449 = vmatpush.msra.mxu3 %v3343_v37 }
 0xc5f   :  { %1718 = vmatpush.msra.mxu0 %v3404_v47  ;;  %1738 = vmatpush.msra.mxu1 %v3409_v32 }
 0xc60   :  { %1430 = vmatpush.msra.mxu2 %v3352_v49  ;;  %1450 = vmatpush.msra.mxu3 %v3357_v21 }
 0xc61   :  { %1719 = vmatpush.msra.mxu0 %v3418_v45  ;;  %1739 = vmatpush.msra.mxu1 %v3423_v46 }
 0xc62   :  { %1431 = vmatpush.msra.mxu2 %v3366_v38  ;;  %1451 = vmatpush.msra.mxu3 %v3371_v40 }
 0xc64   :  { %1432 = vmatpush.msra.mxu2 %v3390_v56  ;;  %1452 = vmatpush.msra.mxu3 %v3395_v43 }
 0xc66   :  { %1433 = vmatpush.msra.mxu2 %v3404_v47  ;;  %1453 = vmatpush.msra.mxu3 %v3409_v32 }
 0xc68   :  { %1434 = vmatpush.msra.mxu2 %v3418_v45  ;;  %1454 = vmatpush.msra.mxu3 %v3423_v46 }
 0xc69   :  { %1435 = vmatmul.f32.vlgmr.msra.gmra.mxu2 %v2740_v26  ;;  %1455 = vmatmul.f32.vlgmr.msra.gmra.mxu3 %v2740_v26  ;;  %v1126_v26 = vpop.f32.mrf.mxu0 }
 0xc6a   :  { %1617 = vmatpush.msrb.mxu2 %v3302_v61  ;;  %1637 = vmatpush.msrb.mxu3 %v3307_v34  ;;  %v3566_v33 = vadd.f32 %v1126_v26, %v1056_v8 }
 0xc6c   :  { %1618 = vmatpush.msrb.mxu2 %v3316_v35  ;;  %1638 = vmatpush.msrb.mxu3 %v3321_v36 }
 0xc6e   :  { %1619 = vmatpush.msrb.mxu2 %v3338_v52  ;;  %1639 = vmatpush.msrb.mxu3 %v3343_v37 }
 0xc70   :  { %1620 = vmatpush.msrb.mxu2 %v3352_v49  ;;  %1640 = vmatpush.msrb.mxu3 %v3357_v21 }
 0xc71   :  { %v1218_v55 = vpop.f32.mrf.mxu0 }
 0xc72   :  { %1621 = vmatpush.msrb.mxu2 %v3366_v38  ;;  %1641 = vmatpush.msrb.mxu3 %v3371_v40  ;;  %v3542_v20 = vadd.f32 %v1218_v55, %v1056_v8 }
 0xc74   :  { %1622 = vmatpush.msrb.mxu2 %v3390_v56  ;;  %1642 = vmatpush.msrb.mxu3 %v3395_v43 }
 0xc76   :  { %1623 = vmatpush.msrb.mxu2 %v3404_v47  ;;  %1643 = vmatpush.msrb.mxu3 %v3409_v32 }
 0xc78   :  { %1624 = vmatpush.msrb.mxu2 %v3418_v45  ;;  %1644 = vmatpush.msrb.mxu3 %v3423_v46 }
 0xc79   :  { %v1306_v60 = vpop.f32.mrf.mxu0 }
 0xc7a   :  { %1807 = vmatpush.msra.mxu2 %v3302_v61  ;;  %1827 = vmatpush.msra.mxu3 %v3307_v34  ;;  %v3526_v59 = vadd.f32 %v1306_v60, %v1056_v8 }
 0xc7c   :  { %1808 = vmatpush.msra.mxu2 %v3316_v35  ;;  %1828 = vmatpush.msra.mxu3 %v3321_v36 }
 0xc7e   :  { %1809 = vmatpush.msra.mxu2 %v3338_v52  ;;  %1829 = vmatpush.msra.mxu3 %v3343_v37 }
 0xc80   :  { %1810 = vmatpush.msra.mxu2 %v3352_v49  ;;  %1830 = vmatpush.msra.mxu3 %v3357_v21 }
 0xc82   :  { %1811 = vmatpush.msra.mxu2 %v3366_v38  ;;  %1831 = vmatpush.msra.mxu3 %v3371_v40 }
 0xc84   :  { %1812 = vmatpush.msra.mxu2 %v3390_v56  ;;  %1832 = vmatpush.msra.mxu3 %v3395_v43 }
 0xc86   :  { %1813 = vmatpush.msra.mxu2 %v3404_v47  ;;  %1833 = vmatpush.msra.mxu3 %v3409_v32 }
 0xc88   :  { %1814 = vmatpush.msra.mxu2 %v3418_v45  ;;  %1834 = vmatpush.msra.mxu3 %v3423_v46 }
 0xcb8   :  { %v1394_v0 = vpop.f32.mrf.mxu0  ;;  %v1414_v7 = vpop.f32.mrf.mxu1 }
 0xcb9   :  { %v3510_v2 = vadd.f32 %v1394_v0, %v1056_v8  ;;  %v3512_v54 = vadd.f32 %v1414_v7, %v1057_v12 }
 0xcbc   :  { %v1080_v15 = vpop.f32.mrf.mxu2  ;;  %v1100_v1 = vpop.f32.mrf.mxu3 }
 0xcbd   :  { %v3514_v51 = vadd.f32 %v1080_v15, %v1056_v8  ;;  %v3516_v42 = vadd.f32 %v1100_v1, %v1057_v12 }
 0xcbf   :  { %v1417_v60 = vsel %vm2942_vm1, %v3514_v51, %v3510_v2  ;;  %v1418_v15 = vsel %vm2958_vm2, %v3516_v42, %v3512_v54 }
 0xcc4   :  { %v1172_v11 = vpop.f32.mrf.mxu2  ;;  %v1192_v5 = vpop.f32.mrf.mxu3 }
 0xcc5   :  { %v3530_v10 = vadd.f32 %v1172_v11, %v1056_v8  ;;  %v3532_v13 = vadd.f32 %v1192_v5, %v1057_v12 }
 0xcc7   :  { %v1887_v17 = vsel %vm2942_vm1, %v3526_v59, %v3530_v10 }
 0xccc   :  { %v1262_v6 = vpop.f32.mrf.mxu2  ;;  %v1282_v19 = vpop.f32.mrf.mxu3 }
 0xccd   :  { %v3546_v24 = vadd.f32 %v1262_v6, %v1056_v8  ;;  %v3548_v16 = vadd.f32 %v1282_v19, %v1057_v12 }
 0xccf   :  { %v1697_v25 = vsel %vm2942_vm1, %v3542_v20, %v3546_v24  ;;  %v1698_v27 = vsel %vm2958_vm2, %v3544_v23, %v3548_v16  ;;  %v1792_v28 = vsel %vm2942_vm1, %v3546_v24, %v3542_v20  ;;  %v1793_v58 = vsel %vm2958_vm2, %v3548_v16, %v3544_v23 }
 0xcdc   :  { %v1350_v14 = vpop.f32.mrf.mxu2  ;;  %v1370_v31 = vpop.f32.mrf.mxu3 }
 0xcdd   :  { %v3570_v41 = vadd.f32 %v1350_v14, %v1056_v8  ;;  %v3572_v48 = vadd.f32 %v1370_v31, %v1057_v12 }
 0xcdf   :  { %v1507_v55 = vsel %vm2942_vm1, %v3566_v33, %v3570_v41  ;;  %v1508_v57 = vsel %vm2958_vm2, %v3568_v50, %v3572_v48 }
 0xcec   :  { %v1436_v62 = vpop.f32.mrf.mxu2  ;;  %v1456_v12 = vpop.f32.mrf.mxu3 }
 0xced   :  { %v1437_v63 = vadd.f32 %v1436_v62, %v1417_v60  ;;  %v1457_v11 = vadd.f32 %v1456_v12, %v1418_v15 }
 0xcef   :  { %v2344_v0 = vmul.f32 -1.442695, %v1437_v63  ;;  %v2345_v3 = vmul.f32 -1.442695, %v1457_v11 }
 0xcf1   :  { %2483 = vpow2.f32 %v2344_v0 }
 0xcf7   :  { %v2484_v7 = vpop.eup %2483 }
 0xcf8   :  { %v1465_v8 = vadd.f32 1.0, %v2484_v7 }
 0xcfa   :  { %2485 = vrcp.f32 %v1465_v8  ;;  %v1478_v19 = vand.u32 2147483648, %v1465_v8  ;;  %v1476_v31 = vand.u32 2147483647, %v1465_v8  ;;  %vm1472_vm5 = vweird.f32 %v1465_v8 }
 0xcfb   :  { %2487 = vtanh.f32 %v1457_v11 }
 0xcfc   :  { %v1479_v62 = vor.u32 1.1754944e-38, %v1478_v19  ;;  %vm1477_vm8 = vcmp.eq.f32.partialorder %v1476_v31, 8.507059e+37  ;;  %2489 = vpow2.f32 %v2345_v3 }
 0xd00   :  { %v2486_v1 = vpop.eup %2485 }
 0xd01   :  { %v1468_v5 = vmul.f32 %v2486_v1, %v1465_v8  ;;  %vm1473_vm4 = vweird.f32 %v2486_v1  ;;  %v2488_v0 = vpop.eup %2487 }
 0xd02   :  { %vm1474_vm6 = vmor %vm1472_vm5, %vm1473_vm4  ;;  %v2490_v12 = vpop.eup %2489 }
 0xd03   :  { %v1469_v6 = vsub.f32 1.0, %v1468_v5  ;;  %v1466_v15 = vadd.f32 1.0, %v2490_v12 }
 0xd05   :  { %v1470_v14 = vmul.f32 %v2486_v1, %v1469_v6  ;;  %2491 = vrcp.f32 %v1466_v15  ;;  %v1493_v19 = vand.u32 2147483648, %v1466_v15  ;;  %vm1487_vm10 = vweird.f32 %v1466_v15 }
 0xd07   :  { %v1471_v60 = vadd.f32 %v2486_v1, %v1470_v14  ;;  %v1494_v11 = vor.u32 1.1754944e-38, %v1493_v19 }
 0xd09   :  { %v1475_v63 = vsel %vm1474_vm6, %v2486_v1, %v1471_v60 }
 0xd0a   :  { %v1480_v7 = vsel %vm1477_vm8, %v1479_v62, %v1475_v63 }
 0xd0b   :  { %v1499_v4 = vmul.f32 %v2488_v0, %v1480_v7  ;;  %v2492_v5 = vpop.eup %2491  ;;  %v1498_v14 = vmul.f32 0.0, %v1480_v7 }
 0xd0c   :  { %v1483_v6 = vmul.f32 %v2492_v5, %v1466_v15  ;;  %vm1488_vm9 = vweird.f32 %v2492_v5 }
 0xd0d   :  { %1501 = vrot.lane.b32.xlu1 %v1499_v4, %s2741_s3  ;;  %v1491_v4 = vand.u32 2147483647, %v1466_v15  ;;  %vm1489_vm12 = vmor %vm1487_vm10, %vm1488_vm9 }
 0xd0e   :  { %v1484_v44 = vsub.f32 1.0, %v1483_v6 }
 0xd0f   :  { %vm1492_vm13 = vcmp.eq.f32.partialorder %v1491_v4, 8.507059e+37 }
 0xd10   :  { %v1485_v26 = vmul.f32 %v2492_v5, %v1484_v44 }
 0xd12   :  { %v1486_v1 = vadd.f32 %v2492_v5, %v1485_v26 }
 0xd14   :  { %v1490_v3 = vsel %vm1489_vm12, %v2492_v5, %v1486_v1 }
 0xd15   :  { %v1495_v60 = vsel %vm1492_vm13, %v1494_v11, %v1490_v3 }
 0xd7f   :  { %v1502_v8 = vpop.permute.xlu1 %1501 }
 0xd80   :  { %v3599_v18 = vadd.f32 %v1502_v8, %v1498_v14 }
 0xd82   :  { %2493 = vtanh.f32 %v3599_v18 }
 0xd88   :  { %v2494_v31 = vpop.eup %2493 }
 0xd89   :  { %v1506_v62 = vmul.f32 %v2494_v31, %v1495_v60 }
 0xd8b   :  { %1510 = vrot.lane.b32.xlu2 %v1506_v62, %s2741_s3 }
 0xde5   :  { %v3603_v44 = vpop.permute.xlu2 %1510 }
 0xde6   :  { %2346 = vmatmul.msk.f32.vlgmr.msrb.gmra.mxu0 %vm204_vm11, %v3603_v44  ;;  %2347 = vmatmul.msk.f32.vlgmr.msrb.gmra.mxu1 %vm204_vm11, %v3603_v44 }
 0xde7   :  { %1902 = vmatpush.msrb.mxu0 %v3302_v61  ;;  %1922 = vmatpush.msrb.mxu1 %v3307_v34 }
 0xde9   :  { %1903 = vmatpush.msrb.mxu0 %v3316_v35  ;;  %1923 = vmatpush.msrb.mxu1 %v3321_v36 }
 0xdeb   :  { %1904 = vmatpush.msrb.mxu0 %v3338_v52  ;;  %1924 = vmatpush.msrb.mxu1 %v3343_v37 }
 0xded   :  { %1905 = vmatpush.msrb.mxu0 %v3352_v49  ;;  %1925 = vmatpush.msrb.mxu1 %v3357_v21 }
 0xdef   :  { %1906 = vmatpush.msrb.mxu0 %v3366_v38  ;;  %1926 = vmatpush.msrb.mxu1 %v3371_v40 }
 0xdf1   :  { %1907 = vmatpush.msrb.mxu0 %v3390_v56  ;;  %1927 = vmatpush.msrb.mxu1 %v3395_v43 }
 0xdf3   :  { %1908 = vmatpush.msrb.mxu0 %v3404_v47  ;;  %1928 = vmatpush.msrb.mxu1 %v3409_v32 }
 0xdf5   :  { %1909 = vmatpush.msrb.mxu0 %v3418_v45  ;;  %1929 = vmatpush.msrb.mxu1 %v3423_v46 }
 0xe63   :  { %v1531_v26 = vpop.f32.mrf.mxu0  ;;  %v1551_v15 = vpop.f32.mrf.mxu1 }
 0xe64   :  { %v1532_v63 = vadd.f32 %v1531_v26, %v1507_v55  ;;  %v1552_v6 = vadd.f32 %v1551_v15, %v1508_v57 }
 0xe66   :  { %v2348_v0 = vmul.f32 -1.442695, %v1532_v63  ;;  %v2349_v26 = vmul.f32 -1.442695, %v1552_v6 }
 0xe68   :  { %2495 = vpow2.f32 %v2348_v0 }
 0xe6e   :  { %v2496_v7 = vpop.eup %2495 }
 0xe6f   :  { %v1560_v12 = vadd.f32 1.0, %v2496_v7 }
 0xe71   :  { %2497 = vrcp.f32 %v1560_v12  ;;  %v1573_v1 = vand.u32 2147483648, %v1560_v12  ;;  %v1571_v55 = vand.u32 2147483647, %v1560_v12  ;;  %vm1567_vm15 = vweird.f32 %v1560_v12 }
 0xe72   :  { %2499 = vtanh.f32 %v1552_v6 }
 0xe73   :  { %v1574_v3 = vor.u32 1.1754944e-38, %v1573_v1  ;;  %vm1572_vm4 = vcmp.eq.f32.partialorder %v1571_v55, 8.507059e+37  ;;  %2501 = vpow2.f32 %v2349_v26 }
 0xe77   :  { %v2498_v5 = vpop.eup %2497 }
 0xe78   :  { %v1563_v14 = vmul.f32 %v2498_v5, %v1560_v12  ;;  %vm1568_vm14 = vweird.f32 %v2498_v5  ;;  %v2500_v31 = vpop.eup %2499 }
 0xe79   :  { %vm1569_vm0 = vmor %vm1567_vm15, %vm1568_vm14  ;;  %v2502_v57 = vpop.eup %2501 }
 0xe7a   :  { %v1564_v8 = vsub.f32 1.0, %v1563_v14  ;;  %v1561_v63 = vadd.f32 1.0, %v2502_v57 }
 0xe7c   :  { %v1565_v19 = vmul.f32 %v2498_v5, %v1564_v8  ;;  %2503 = vrcp.f32 %v1561_v63  ;;  %vm1582_vm6 = vweird.f32 %v1561_v63  ;;  %v1586_v6 = vand.u32 2147483647, %v1561_v63 }
 0xe7e   :  { %v1566_v4 = vadd.f32 %v2498_v5, %v1565_v19  ;;  %v1588_v19 = vand.u32 2147483648, %v1561_v63  ;;  %vm1587_vm9 = vcmp.eq.f32.partialorder %v1586_v6, 8.507059e+37 }
 0xe80   :  { %v1570_v11 = vsel %vm1569_vm0, %v2498_v5, %v1566_v4  ;;  %v1589_v4 = vor.u32 1.1754944e-38, %v1588_v19 }
 0xe81   :  { %v1575_v60 = vsel %vm1572_vm4, %v1574_v3, %v1570_v11 }
 0xe82   :  { %v1594_v62 = vmul.f32 %v2500_v31, %v1575_v60  ;;  %v2504_v0 = vpop.eup %2503  ;;  %v1593_v12 = vmul.f32 %v1575_v60, %v3599_v18  ;;  %v1602_v60 = vsel %vm2942_vm1, %v3530_v10, %v3526_v59 }
 0xe83   :  { %v1578_v7 = vmul.f32 %v2504_v0, %v1561_v63  ;;  %vm1583_vm5 = vweird.f32 %v2504_v0 }
 0xe84   :  { %1596 = vrot.lane.b32.xlu0 %v1594_v62, %s2741_s3  ;;  %vm1584_vm8 = vmor %vm1582_vm6, %vm1583_vm5 }
 0xe85   :  { %v1579_v15 = vsub.f32 1.0, %v1578_v7 }
 0xe87   :  { %v1580_v14 = vmul.f32 %v2504_v0, %v1579_v15  ;;  %v1603_v15 = vsel %vm2958_vm2, %v3532_v13, %v3528_v9 }
 0xe89   :  { %v1581_v5 = vadd.f32 %v2504_v0, %v1580_v14 }
 0xe8b   :  { %v1585_v55 = vsel %vm1584_vm8, %v2504_v0, %v1581_v5 }
 0xe8c   :  { %v1590_v11 = vsel %vm1587_vm9, %v1589_v4, %v1585_v55 }
 0xef6   :  { %v1597_v8 = vpop.permute.xlu0 %1596 }
 0xef7   :  { %v3637_v1 = vadd.f32 %v1597_v8, %v1593_v12 }
 0xef9   :  { %2505 = vtanh.f32 %v3637_v1 }
 0xeff   :  { %v2506_v3 = vpop.eup %2505 }
 0xf00   :  { %v1601_v31 = vmul.f32 %v2506_v3, %v1590_v11 }
 0xf02   :  { %1605 = vrot.lane.b32.xlu1 %v1601_v31, %s2741_s3 }
 0xf74   :  { %v1606_v18 = vpop.permute.xlu1 %1605 }
 0xf75   :  { %2350 = vmatmul.msk.f32.vlgmr.msrb.gmra.mxu2 %vm204_vm11, %v1606_v18  ;;  %2351 = vmatmul.msk.f32.vlgmr.msrb.gmra.mxu3 %vm204_vm11, %v1606_v18 }
 0xf76   :  { %1997 = vmatpush.msrb.mxu2 %v3302_v61  ;;  %2017 = vmatpush.msrb.mxu3 %v3307_v34 }
 0xf78   :  { %1998 = vmatpush.msrb.mxu2 %v3316_v35  ;;  %2018 = vmatpush.msrb.mxu3 %v3321_v36 }
 0xf7a   :  { %1999 = vmatpush.msrb.mxu2 %v3338_v52  ;;  %2019 = vmatpush.msrb.mxu3 %v3343_v37 }
 0xf7c   :  { %2000 = vmatpush.msrb.mxu2 %v3352_v49  ;;  %2020 = vmatpush.msrb.mxu3 %v3357_v21 }
 0xf7e   :  { %2001 = vmatpush.msrb.mxu2 %v3366_v38  ;;  %2021 = vmatpush.msrb.mxu3 %v3371_v40 }
 0xf80   :  { %2002 = vmatpush.msrb.mxu2 %v3390_v56  ;;  %2022 = vmatpush.msrb.mxu3 %v3395_v43 }
 0xf82   :  { %2003 = vmatpush.msrb.mxu2 %v3404_v47  ;;  %2023 = vmatpush.msrb.mxu3 %v3409_v32 }
 0xf84   :  { %2004 = vmatpush.msrb.mxu2 %v3418_v45  ;;  %2024 = vmatpush.msrb.mxu3 %v3423_v46 }
 0xff8   :  { %v1626_v62 = vpop.f32.mrf.mxu2  ;;  %v1646_v7 = vpop.f32.mrf.mxu3 }
 0xff9   :  { %v1627_v26 = vadd.f32 %v1626_v62, %v1602_v60  ;;  %v1647_v12 = vadd.f32 %v1646_v7, %v1603_v15 }
 0xffb   :  { %v2352_v57 = vmul.f32 -1.442695, %v1627_v26  ;;  %v2353_v62 = vmul.f32 -1.442695, %v1647_v12 }
 0xffd   :  { %2507 = vpow2.f32 %v2352_v57 }
0x1003   :  { %v2508_v63 = vpop.eup %2507 }
0x1004   :  { %v1655_v0 = vadd.f32 1.0, %v2508_v63 }
0x1006   :  { %2509 = vrcp.f32 %v1655_v0  ;;  %v1668_v19 = vand.u32 2147483648, %v1655_v0  ;;  %v1666_v55 = vand.u32 2147483647, %v1655_v0  ;;  %vm1662_vm12 = vweird.f32 %v1655_v0 }
0x1007   :  { %2511 = vtanh.f32 %v1647_v12 }
0x1008   :  { %v1669_v3 = vor.u32 1.1754944e-38, %v1668_v19  ;;  %vm1667_vm14 = vcmp.eq.f32.partialorder %v1666_v55, 8.507059e+37  ;;  %2513 = vpow2.f32 %v2353_v62 }
0x100c   :  { %v2510_v14 = vpop.eup %2509 }
0x100d   :  { %v1658_v8 = vmul.f32 %v2510_v14, %v1655_v0  ;;  %vm1663_vm10 = vweird.f32 %v2510_v14  ;;  %v2512_v31 = vpop.eup %2511 }
0x100e   :  { %vm1664_vm13 = vmor %vm1662_vm12, %vm1663_vm10  ;;  %v2514_v26 = vpop.eup %2513 }
0x100f   :  { %v1659_v5 = vsub.f32 1.0, %v1658_v8  ;;  %v1656_v57 = vadd.f32 1.0, %v2514_v26 }
0x1011   :  { %v1660_v6 = vmul.f32 %v2510_v14, %v1659_v5  ;;  %2515 = vrcp.f32 %v1656_v57  ;;  %vm1677_vm0 = vweird.f32 %v1656_v57  ;;  %v1681_v12 = vand.u32 2147483647, %v1656_v57 }
0x1013   :  { %v1661_v4 = vadd.f32 %v2510_v14, %v1660_v6  ;;  %v1683_v6 = vand.u32 2147483648, %v1656_v57  ;;  %vm1682_vm5 = vcmp.eq.f32.partialorder %v1681_v12, 8.507059e+37 }
0x1015   :  { %v1665_v11 = vsel %vm1664_vm13, %v2510_v14, %v1661_v4  ;;  %v1684_v4 = vor.u32 1.1754944e-38, %v1683_v6 }
0x1016   :  { %v1670_v18 = vsel %vm1667_vm14, %v1669_v3, %v1665_v11 }
0x1017   :  { %v1689_v60 = vmul.f32 %v2512_v31, %v1670_v18  ;;  %v2516_v63 = vpop.eup %2515  ;;  %v1688_v0 = vmul.f32 %v1670_v18, %v3637_v1 }
0x1018   :  { %v1673_v7 = vmul.f32 %v2516_v63, %v1656_v57  ;;  %vm1678_vm15 = vweird.f32 %v2516_v63 }
0x1019   :  { %1691 = vrot.lane.b32.xlu2 %v1689_v60, %s2741_s3  ;;  %vm1679_vm4 = vmor %vm1677_vm0, %vm1678_vm15 }
0x101a   :  { %v1674_v15 = vsub.f32 1.0, %v1673_v7 }
0x101c   :  { %v1675_v8 = vmul.f32 %v2516_v63, %v1674_v15 }
0x101e   :  { %v1676_v14 = vadd.f32 %v2516_v63, %v1675_v8 }
0x1020   :  { %v1680_v55 = vsel %vm1679_vm4, %v2516_v63, %v1676_v14 }
0x1021   :  { %v1685_v11 = vsel %vm1682_vm5, %v1684_v4, %v1680_v55 }
0x1073   :  { %v1692_v5 = vpop.permute.xlu2 %1691 }
0x1074   :  { %v3669_v19 = vadd.f32 %v1692_v5, %v1688_v0 }
0x1076   :  { %2517 = vtanh.f32 %v3669_v19 }
0x107c   :  { %v2518_v3 = vpop.eup %2517 }
0x107d   :  { %v1696_v31 = vmul.f32 %v2518_v3, %v1685_v11 }
0x107f   :  { %1700 = vrot.lane.b32.xlu0 %v1696_v31, %s2741_s3 }
0x10f1   :  { %v1701_v1 = vpop.permute.xlu0 %1700 }
0x10f2   :  { %2354 = vmatmul.msk.f32.vlgmr.msra.gmra.mxu0 %vm204_vm11, %v1701_v1  ;;  %2355 = vmatmul.msk.f32.vlgmr.msra.gmra.mxu1 %vm204_vm11, %v1701_v1 }
0x10f3   :  { %2092 = vmatpush.msra.mxu0 %v3302_v61  ;;  %2112 = vmatpush.msra.mxu1 %v3307_v34 }
0x10f5   :  { %2093 = vmatpush.msra.mxu0 %v3316_v35  ;;  %2113 = vmatpush.msra.mxu1 %v3321_v36 }
0x10f7   :  { %2094 = vmatpush.msra.mxu0 %v3338_v52  ;;  %2114 = vmatpush.msra.mxu1 %v3343_v37 }
0x10f9   :  { %2095 = vmatpush.msra.mxu0 %v3352_v49  ;;  %2115 = vmatpush.msra.mxu1 %v3357_v21 }
0x10fb   :  { %2096 = vmatpush.msra.mxu0 %v3366_v38  ;;  %2116 = vmatpush.msra.mxu1 %v3371_v40 }
0x10fd   :  { %2097 = vmatpush.msra.mxu0 %v3390_v56  ;;  %2117 = vmatpush.msra.mxu1 %v3395_v43 }
0x10ff   :  { %2098 = vmatpush.msra.mxu0 %v3404_v47  ;;  %2118 = vmatpush.msra.mxu1 %v3409_v32 }
0x1101   :  { %2099 = vmatpush.msra.mxu0 %v3418_v45  ;;  %2119 = vmatpush.msra.mxu1 %v3423_v46 }
0x116f   :  { %v1721_v61 = vpop.f32.mrf.mxu0  ;;  %v1741_v37 = vpop.f32.mrf.mxu1 }
0x1170   :  { %v1722_v34 = vadd.f32 %v1721_v61, %v1697_v25  ;;  %v1742_v21 = vadd.f32 %v1741_v37, %v1698_v27 }
0x1172   :  { %v2356_v35 = vmul.f32 -1.442695, %v1722_v34  ;;  %v2357_v62 = vmul.f32 -1.442695, %v1742_v21 }
0x1174   :  { %2519 = vpow2.f32 %v2356_v35 }
0x117a   :  { %v2520_v36 = vpop.eup %2519 }
0x117b   :  { %v1750_v52 = vadd.f32 1.0, %v2520_v36 }
0x117d   :  { %2521 = vrcp.f32 %v1750_v52  ;;  %v1763_v56 = vand.u32 2147483648, %v1750_v52  ;;  %v1761_v47 = vand.u32 2147483647, %v1750_v52  ;;  %vm1757_vm8 = vweird.f32 %v1750_v52 }
0x117e   :  { %2523 = vtanh.f32 %v1742_v21 }
0x117f   :  { %v1764_v45 = vor.u32 1.1754944e-38, %v1763_v56  ;;  %vm1762_vm10 = vcmp.eq.f32.partialorder %v1761_v47, 8.507059e+37  ;;  %2525 = vpow2.f32 %v2357_v62 }
0x1183   :  { %v2522_v49 = vpop.eup %2521 }
0x1184   :  { %v1753_v38 = vmul.f32 %v2522_v49, %v1750_v52  ;;  %vm1758_vm6 = vweird.f32 %v2522_v49  ;;  %v2524_v25 = vpop.eup %2523 }
0x1185   :  { %vm1759_vm9 = vmor %vm1757_vm8, %vm1758_vm6  ;;  %v2526_v27 = vpop.eup %2525 }
0x1186   :  { %v1754_v40 = vsub.f32 1.0, %v1753_v38  ;;  %v1751_v26 = vadd.f32 1.0, %v2526_v27 }
0x1188   :  { %v1755_v43 = vmul.f32 %v2522_v49, %v1754_v40  ;;  %2527 = vrcp.f32 %v1751_v26  ;;  %v1778_v6 = vand.u32 2147483648, %v1751_v26  ;;  %vm1772_vm13 = vweird.f32 %v1751_v26 }
0x1189   :  { %v1776_v12 = vand.u32 2147483647, %v1751_v26 }
0x118a   :  { %v1756_v32 = vadd.f32 %v2522_v49, %v1755_v43  ;;  %v1779_v4 = vor.u32 1.1754944e-38, %v1778_v6 }
0x118b   :  { %vm1777_vm15 = vcmp.eq.f32.partialorder %v1776_v12, 8.507059e+37 }
0x118c   :  { %v1760_v46 = vsel %vm1759_vm9, %v2522_v49, %v1756_v32 }
0x118d   :  { %v1765_v18 = vsel %vm1762_vm10, %v1764_v45, %v1760_v46 }
0x118e   :  { %v1784_v60 = vmul.f32 %v2524_v25, %v1765_v18  ;;  %v2528_v57 = vpop.eup %2527  ;;  %v1783_v8 = vmul.f32 %v1765_v18, %v3669_v19 }
0x118f   :  { %v1768_v63 = vmul.f32 %v2528_v57, %v1751_v26  ;;  %vm1773_vm12 = vweird.f32 %v2528_v57 }
0x1190   :  { %1786 = vrot.lane.b32.xlu1 %v1784_v60, %s2741_s3  ;;  %vm1774_vm14 = vmor %vm1772_vm13, %vm1773_vm12 }
0x1191   :  { %v1769_v7 = vsub.f32 1.0, %v1768_v63 }
0x1193   :  { %v1770_v15 = vmul.f32 %v2528_v57, %v1769_v7 }
0x1195   :  { %v1771_v14 = vadd.f32 %v2528_v57, %v1770_v15 }
0x1197   :  { %v1775_v55 = vsel %vm1774_vm14, %v2528_v57, %v1771_v14 }
0x1198   :  { %v1780_v11 = vsel %vm1777_vm15, %v1779_v4, %v1775_v55 }
0x1202   :  { %v1787_v0 = vpop.permute.xlu1 %1786 }
0x1203   :  { %v1789_v5 = vadd.f32 %v1787_v0, %v1783_v8 }
0x1205   :  { %2529 = vtanh.f32 %v1789_v5 }
0x120b   :  { %v2530_v3 = vpop.eup %2529 }
0x120c   :  { %v1791_v31 = vmul.f32 %v2530_v3, %v1780_v11 }
0x120e   :  { %1795 = vrot.lane.b32.xlu2 %v1791_v31, %s2741_s3 }
0x1268   :  { %v1796_v1 = vpop.permute.xlu2 %1795 }
0x1269   :  { %2358 = vmatmul.msk.f32.vlgmr.msra.gmra.mxu2 %vm204_vm11, %v1796_v1  ;;  %2359 = vmatmul.msk.f32.vlgmr.msra.gmra.mxu3 %vm204_vm11, %v1796_v1 }
0x12ec   :  { %v1816_v19 = vpop.f32.mrf.mxu2  ;;  %v1836_v52 = vpop.f32.mrf.mxu3 }
0x12ed   :  { %v1817_v61 = vadd.f32 %v1816_v19, %v1792_v28  ;;  %v1837_v49 = vadd.f32 %v1836_v52, %v1793_v58  ;;  %v3835_v19 = vsel %vm2958_vm2, %v3528_v9, %v3532_v13 }
0x12ef   :  { %v2360_v34 = vmul.f32 -1.442695, %v1817_v61  ;;  %v2361_v23 = vmul.f32 -1.442695, %v1837_v49 }
0x12f1   :  { %2531 = vpow2.f32 %v2360_v34 }
0x12f7   :  { %v2532_v35 = vpop.eup %2531 }
0x12f8   :  { %v1845_v36 = vadd.f32 1.0, %v2532_v35 }
0x12fa   :  { %2533 = vrcp.f32 %v1845_v36  ;;  %v1858_v40 = vand.u32 2147483648, %v1845_v36  ;;  %v1856_v20 = vand.u32 2147483647, %v1845_v36  ;;  %vm1852_vm4 = vweird.f32 %v1845_v36 }
0x12fb   :  { %2535 = vtanh.f32 %v1837_v49 }
0x12fc   :  { %v1859_v28 = vor.u32 1.1754944e-38, %v1858_v40  ;;  %vm1857_vm6 = vcmp.eq.f32.partialorder %v1856_v20, 8.507059e+37  ;;  %2537 = vpow2.f32 %v2361_v23 }
0x1300   :  { %v2534_v37 = vpop.eup %2533 }
0x1301   :  { %v1848_v21 = vmul.f32 %v2534_v37, %v1845_v36  ;;  %vm1853_vm0 = vweird.f32 %v2534_v37  ;;  %v2536_v47 = vpop.eup %2535 }
0x1302   :  { %vm1854_vm5 = vmor %vm1852_vm4, %vm1853_vm0  ;;  %v2538_v16 = vpop.eup %2537 }
0x1303   :  { %v1849_v38 = vsub.f32 1.0, %v1848_v21  ;;  %v1846_v58 = vadd.f32 1.0, %v2538_v16 }
0x1305   :  { %v1850_v56 = vmul.f32 %v2534_v37, %v1849_v38  ;;  %2539 = vrcp.f32 %v1846_v58  ;;  %v1873_v63 = vand.u32 2147483648, %v1846_v58  ;;  %vm1867_vm9 = vweird.f32 %v1846_v58 }
0x1306   :  { %v1871_v7 = vand.u32 2147483647, %v1846_v58 }
0x1307   :  { %v1851_v24 = vadd.f32 %v2534_v37, %v1850_v56  ;;  %v1874_v8 = vor.u32 1.1754944e-38, %v1873_v63 }
0x1308   :  { %vm1872_vm12 = vcmp.eq.f32.partialorder %v1871_v7, 8.507059e+37 }
0x1309   :  { %v1855_v43 = vsel %vm1854_vm5, %v2534_v37, %v1851_v24 }
0x130a   :  { %v1860_v32 = vsel %vm1857_vm6, %v1859_v28, %v1855_v43 }
0x130b   :  { %v1879_v45 = vmul.f32 %v2536_v47, %v1860_v32  ;;  %v2540_v46 = vpop.eup %2539  ;;  %v1878_v62 = vmul.f32 %v1860_v32, %v1789_v5 }
0x130c   :  { %v1863_v25 = vmul.f32 %v2540_v46, %v1846_v58  ;;  %vm1868_vm8 = vweird.f32 %v2540_v46 }
0x130d   :  { %1881 = vrot.lane.b32.xlu0 %v1879_v45, %s2741_s3  ;;  %vm1869_vm10 = vmor %vm1867_vm9, %vm1868_vm8 }
0x130e   :  { %v1864_v18 = vsub.f32 1.0, %v1863_v25 }
0x1310   :  { %v1865_v60 = vmul.f32 %v2540_v46, %v1864_v18 }
0x1312   :  { %v1866_v57 = vadd.f32 %v2540_v46, %v1865_v60 }
0x1314   :  { %v1870_v15 = vsel %vm1869_vm10, %v2540_v46, %v1866_v57 }
0x1315   :  { %v1875_v14 = vsel %vm1872_vm12, %v1874_v8, %v1870_v15 }
0x137f   :  { %v1882_v27 = vpop.permute.xlu0 %1881 }
0x1380   :  { %v1884_v26 = vadd.f32 %v1882_v27, %v1878_v62 }
0x1382   :  { %2541 = vtanh.f32 %v1884_v26 }
0x1388   :  { %v2542_v0 = vpop.eup %2541 }
0x1389   :  { %v1886_v6 = vmul.f32 %v2542_v0, %v1875_v14  ;;  %v3837_v14 = vsel %vm2958_vm2, %v3572_v48, %v3568_v50 }
0x138b   :  { %1890 = vrot.lane.b32.xlu1 %v1886_v6, %s2741_s3 }
0x13fd   :  { %v1891_v12 = vpop.permute.xlu1 %1890 }
0x13fe   :  { %2362 = vmatmul.msk.f32.vlgmr.msrb.gmra.mxu0 %vm204_vm11, %v1891_v12  ;;  %2363 = vmatmul.msk.f32.vlgmr.msrb.gmra.mxu1 %vm204_vm11, %v1891_v12 }
0x147b   :  { %v1911_v5 = vpop.f32.mrf.mxu0  ;;  %v1931_v31 = vpop.f32.mrf.mxu1 }
0x147c   :  { %v1912_v55 = vadd.f32 %v1911_v5, %v1887_v17  ;;  %v1932_v61 = vadd.f32 %v1931_v31, %v3835_v19 }
0x147e   :  { %v2364_v4 = vmul.f32 -1.442695, %v1912_v55  ;;  %v2365_v9 = vmul.f32 -1.442695, %v1932_v61 }
0x1480   :  { %2543 = vpow2.f32 %v2364_v4 }
0x1486   :  { %v2544_v3 = vpop.eup %2543 }
0x1487   :  { %v1940_v11 = vadd.f32 1.0, %v2544_v3 }
0x1489   :  { %2545 = vrcp.f32 %v1940_v11  ;;  %v1953_v36 = vand.u32 2147483648, %v1940_v11  ;;  %v1951_v59 = vand.u32 2147483647, %v1940_v11  ;;  %vm1947_vm14 = vweird.f32 %v1940_v11 }
0x148a   :  { %2547 = vtanh.f32 %v1932_v61 }
0x148b   :  { %v1954_v17 = vor.u32 1.1754944e-38, %v1953_v36  ;;  %vm1952_vm0 = vcmp.eq.f32.partialorder %v1951_v59, 8.507059e+37  ;;  %2549 = vpow2.f32 %v2365_v9 }
0x148f   :  { %v2546_v1 = vpop.eup %2545 }
0x1490   :  { %v1943_v34 = vmul.f32 %v2546_v1, %v1940_v11  ;;  %vm1948_vm13 = vweird.f32 %v2546_v1  ;;  %v2548_v49 = vpop.eup %2547 }
0x1491   :  { %vm1949_vm15 = vmor %vm1947_vm14, %vm1948_vm13  ;;  %v2550_v13 = vpop.eup %2549 }
0x1492   :  { %v1944_v35 = vsub.f32 1.0, %v1943_v34  ;;  %v1941_v40 = vadd.f32 1.0, %v2550_v13 }
0x1494   :  { %v1945_v52 = vmul.f32 %v2546_v1, %v1944_v35  ;;  %2551 = vrcp.f32 %v1941_v40  ;;  %v1968_v23 = vand.u32 2147483648, %v1941_v40  ;;  %vm1962_vm5 = vweird.f32 %v1941_v40 }
0x1495   :  { %v1966_v16 = vand.u32 2147483647, %v1941_v40 }
0x1496   :  { %v1946_v10 = vadd.f32 %v2546_v1, %v1945_v52  ;;  %v1969_v46 = vor.u32 1.1754944e-38, %v1968_v23 }
0x1497   :  { %vm1967_vm8 = vcmp.eq.f32.partialorder %v1966_v16, 8.507059e+37 }
0x1498   :  { %v1950_v37 = vsel %vm1949_vm15, %v2546_v1, %v1946_v10 }
0x1499   :  { %v1955_v21 = vsel %vm1952_vm0, %v1954_v17, %v1950_v37 }
0x149a   :  { %v1974_v38 = vmul.f32 %v2548_v49, %v1955_v21  ;;  %v2552_v56 = vpop.eup %2551  ;;  %v1973_v43 = vmul.f32 %v1955_v21, %v1884_v26  ;;  %v3836_v26 = vsel %vm2942_vm1, %v3570_v41, %v3566_v33 }
0x149b   :  { %v1958_v20 = vmul.f32 %v2552_v56, %v1941_v40  ;;  %vm1963_vm4 = vweird.f32 %v2552_v56 }
0x149c   :  { %1976 = vrot.lane.b32.xlu2 %v1974_v38, %s2741_s3  ;;  %vm1964_vm6 = vmor %vm1962_vm5, %vm1963_vm4 }
0x149d   :  { %v1959_v24 = vsub.f32 1.0, %v1958_v20 }
0x149f   :  { %v1960_v28 = vmul.f32 %v2552_v56, %v1959_v24 }
0x14a1   :  { %v1961_v45 = vadd.f32 %v2552_v56, %v1960_v28  ;;  %v3838_v28 = vsel %vm2942_vm1, %v3510_v2, %v3514_v51 }
0x14a3   :  { %v1965_v58 = vsel %vm1964_vm6, %v2552_v56, %v1961_v45 }
0x14a4   :  { %v1970_v18 = vsel %vm1967_vm8, %v1969_v46, %v1965_v58  ;;  %v3839_v58 = vsel %vm2958_vm2, %v3512_v54, %v3516_v42 }
0x14f6   :  { %v1977_v47 = vpop.permute.xlu2 %1976 }
0x14f7   :  { %v1979_v32 = vadd.f32 %v1977_v47, %v1973_v43 }
0x14f9   :  { %2553 = vtanh.f32 %v1979_v32 }
0x14ff   :  { %v2554_v25 = vpop.eup %2553 }
0x1500   :  { %v1981_v60 = vmul.f32 %v2554_v25, %v1970_v18 }
0x1502   :  { %1985 = vrot.lane.b32.xlu0 %v1981_v60, %s2741_s3 }
0x1574   :  { %v1986_v62 = vpop.permute.xlu0 %1985 }
0x1575   :  { %2366 = vmatmul.msk.f32.vlgmr.msrb.gmra.mxu2 %vm204_vm11, %v1986_v62  ;;  %2367 = vmatmul.msk.f32.vlgmr.msrb.gmra.mxu3 %vm204_vm11, %v1986_v62 }
0x15f8   :  { %v2006_v27 = vpop.f32.mrf.mxu2  ;;  %v2026_v8 = vpop.f32.mrf.mxu3 }
0x15f9   :  { %v2007_v57 = vadd.f32 %v2006_v27, %v3836_v26  ;;  %v2027_v6 = vadd.f32 %v2026_v8, %v3837_v14 }
0x15fb   :  { %v2368_v63 = vmul.f32 -1.442695, %v2007_v57  ;;  %v2369_v50 = vmul.f32 -1.442695, %v2027_v6 }
0x15fd   :  { %2555 = vpow2.f32 %v2368_v63 }
0x1603   :  { %v2556_v7 = vpop.eup %2555 }
0x1604   :  { %v2035_v15 = vadd.f32 1.0, %v2556_v7 }
0x1606   :  { %2557 = vrcp.f32 %v2035_v15  ;;  %v2048_v55 = vand.u32 2147483648, %v2035_v15  ;;  %v2046_v33 = vand.u32 2147483647, %v2035_v15  ;;  %vm2042_vm10 = vweird.f32 %v2035_v15 }
0x1607   :  { %2559 = vtanh.f32 %v2027_v6 }
0x1608   :  { %v2049_v3 = vor.u32 1.1754944e-38, %v2048_v55  ;;  %vm2047_vm13 = vcmp.eq.f32.partialorder %v2046_v33, 8.507059e+37  ;;  %2561 = vpow2.f32 %v2369_v50  ;;  %v2201_v50 = vld [vmem:[%s3827_s7 + $0x28] sm:$0xff] }
0x160c   :  { %v2558_v0 = vpop.eup %2557 }
0x160d   :  { %v2038_v12 = vmul.f32 %v2558_v0, %v2035_v15  ;;  %vm2043_vm9 = vweird.f32 %v2558_v0  ;;  %v2560_v31 = vpop.eup %2559 }
0x160e   :  { %vm2044_vm12 = vmor %vm2042_vm10, %vm2043_vm9  ;;  %v2562_v48 = vpop.eup %2561 }
0x160f   :  { %v2039_v5 = vsub.f32 1.0, %v2038_v12  ;;  %v2036_v61 = vadd.f32 1.0, %v2562_v48  ;;  %v2200_v48 = vld [vmem:[%s3827_s7 + $0x20] sm:$0xff] }
0x1611   :  { %v2040_v4 = vmul.f32 %v2558_v0, %v2039_v5  ;;  %2563 = vrcp.f32 %v2036_v61  ;;  %v2063_v49 = vand.u32 2147483648, %v2036_v61  ;;  %vm2057_vm15 = vweird.f32 %v2036_v61 }
0x1612   :  { %v2061_v21 = vand.u32 2147483647, %v2036_v61 }
0x1613   :  { %v2041_v41 = vadd.f32 %v2558_v0, %v2040_v4  ;;  %v2064_v9 = vor.u32 1.1754944e-38, %v2063_v49 }
0x1614   :  { %vm2062_vm4 = vcmp.eq.f32.partialorder %v2061_v21, 8.507059e+37 }
0x1615   :  { %v2045_v11 = vsel %vm2044_vm12, %v2558_v0, %v2041_v41 }
0x1616   :  { %v2050_v1 = vsel %vm2047_vm13, %v2049_v3, %v2045_v11  ;;  %vm2227_vm13 = vcmask 17408  }
0x1617   :  { %v2069_v19 = vmul.f32 %v2560_v31, %v2050_v1  ;;  %v2564_v34 = vpop.eup %2563  ;;  %v2068_v59 = vmul.f32 %v2050_v1, %v1979_v32  ;;  %v2203_v1 = vld [vmem:[%s3827_s7 + $0x38] sm:$0xff] }
0x1618   :  { %v2053_v35 = vmul.f32 %v2564_v34, %v2036_v61  ;;  %vm2058_vm14 = vweird.f32 %v2564_v34  ;;  %2215 = vmatpush.msra.mxu2 %v2203_v1  ;;  %v2198_v61 = vld [vmem:[%s3827_s7 + $0x10] sm:$0xff] }
0x1619   :  { %2071 = vrot.lane.b32.xlu1 %v2069_v19, %s2741_s3  ;;  %vm2059_vm0 = vmor %vm2057_vm15, %vm2058_vm14  ;;  %v2202_v19 = vld [vmem:[%s3827_s7 + $0x30] sm:$0xff] }
0x161a   :  { %v2054_v36 = vsub.f32 1.0, %v2053_v35  ;;  %2216 = vmatpush.msra.mxu2 %v2202_v19  ;;  %v2196_v35 = vld [vmem:[%s3827_s7] sm:$0xff] }
0x161c   :  { %v2055_v52 = vmul.f32 %v2564_v34, %v2054_v36  ;;  %2217 = vmatpush.msra.mxu2 %v2201_v50 }
0x161e   :  { %v2056_v37 = vadd.f32 %v2564_v34, %v2055_v52  ;;  %2218 = vmatpush.msra.mxu2 %v2200_v48 }
0x1620   :  { %v2060_v38 = vsel %vm2059_vm0, %v2564_v34, %v2056_v37  ;;  %v2197_v34 = vld [vmem:[%s3827_s7 + $0x8] sm:$0xff] }
0x1621   :  { %v2065_v40 = vsel %vm2062_vm4, %v2064_v9, %v2060_v38 }
0x168b   :  { %v2072_v10 = vpop.permute.xlu1 %2071 }
0x168c   :  { %v2074_v17 = vadd.f32 %v2072_v10, %v2068_v59 }
0x168e   :  { %2565 = vtanh.f32 %v2074_v17 }
0x1694   :  { %v2566_v13 = vpop.eup %2565 }
0x1695   :  { %v2076_v56 = vmul.f32 %v2566_v13, %v2065_v40 }
0x1697   :  { %2080 = vrot.lane.b32.xlu2 %v2076_v56, %s2741_s3 }
0x16f1   :  { %v2081_v20 = vpop.permute.xlu2 %2080 }
0x16f2   :  { %2370 = vmatmul.msk.f32.vlgmr.msra.gmra.mxu0 %vm204_vm11, %v2081_v20  ;;  %2371 = vmatmul.msk.f32.vlgmr.msra.gmra.mxu1 %vm204_vm11, %v2081_v20 }
0x176f   :  { %v2101_v24 = vpop.f32.mrf.mxu0  ;;  %v2121_v23 = vpop.f32.mrf.mxu1 }
0x1770   :  { %v2102_v43 = vadd.f32 %v2101_v24, %v3838_v28  ;;  %v2122_v46 = vadd.f32 %v2121_v23, %v3839_v58 }
0x1772   :  { %v2372_v47 = vmul.f32 -1.442695, %v2102_v43  ;;  %v2373_v54 = vmul.f32 -1.442695, %v2122_v46 }
0x1774   :  { %2567 = vpow2.f32 %v2372_v47 }
0x177a   :  { %v2568_v32 = vpop.eup %2567 }
0x177b   :  { %v2130_v45 = vadd.f32 1.0, %v2568_v32 }
0x177d   :  { %2569 = vrcp.f32 %v2130_v45  ;;  %v2143_v39 = vand.u32 2147483648, %v2130_v45  ;;  %v2141_v2 = vand.u32 2147483647, %v2130_v45  ;;  %vm2137_vm5 = vweird.f32 %v2130_v45 }
0x177e   :  { %2571 = vtanh.f32 %v2122_v46 }
0x177f   :  { %v2144_v62 = vor.u32 1.1754944e-38, %v2143_v39  ;;  %vm2142_vm8 = vcmp.eq.f32.partialorder %v2141_v2, 8.507059e+37  ;;  %2573 = vpow2.f32 %v2373_v54 }
0x1783   :  { %v2570_v16 = vpop.eup %2569 }
0x1784   :  { %v2133_v25 = vmul.f32 %v2570_v16, %v2130_v45  ;;  %vm2138_vm1 = vweird.f32 %v2570_v16  ;;  %v2572_v26 = vpop.eup %2571 }
0x1785   :  { %vm2139_vm6 = vmor %vm2137_vm5, %vm2138_vm1  ;;  %v2574_v42 = vpop.eup %2573 }
0x1786   :  { %v2134_v18 = vsub.f32 1.0, %v2133_v25  ;;  %v2131_v63 = vadd.f32 1.0, %v2574_v42 }
0x1788   :  { %v2135_v60 = vmul.f32 %v2570_v16, %v2134_v18  ;;  %2575 = vrcp.f32 %v2131_v63  ;;  %v2158_v55 = vand.u32 2147483648, %v2131_v63  ;;  %vm2152_vm9 = vweird.f32 %v2131_v63 }
0x1789   :  { %v2156_v4 = vand.u32 2147483647, %v2131_v63 }
0x178a   :  { %v2136_v51 = vadd.f32 %v2570_v16, %v2135_v60  ;;  %v2159_v41 = vor.u32 1.1754944e-38, %v2158_v55 }
0x178b   :  { %vm2157_vm12 = vcmp.eq.f32.partialorder %v2156_v4, 8.507059e+37 }
0x178c   :  { %v2140_v27 = vsel %vm2139_vm6, %v2570_v16, %v2136_v51 }
0x178d   :  { %v2145_v57 = vsel %vm2142_vm8, %v2144_v62, %v2140_v27 }
0x178e   :  { %v2164_v53 = vmul.f32 %v2572_v26, %v2145_v57  ;;  %v2576_v7 = vpop.eup %2575  ;;  %v2163_v14 = vmul.f32 %v2145_v57, %v2074_v17 }
0x178f   :  { %v2148_v15 = vmul.f32 %v2576_v7, %v2131_v63  ;;  %vm2153_vm2 = vweird.f32 %v2576_v7 }
0x1790   :  { %2166 = vrot.lane.b32.xlu0 %v2164_v53, %s2741_s3  ;;  %vm2154_vm10 = vmor %vm2152_vm9, %vm2153_vm2 }
0x1791   :  { %v2149_v8 = vsub.f32 1.0, %v2148_v15 }
0x1793   :  { %v2150_v0 = vmul.f32 %v2576_v7, %v2149_v8 }
0x1795   :  { %v2151_v5 = vadd.f32 %v2576_v7, %v2150_v0 }
0x1797   :  { %v2155_v33 = vsel %vm2154_vm10, %v2576_v7, %v2151_v5 }
0x1798   :  { %v2160_v11 = vsel %vm2157_vm12, %v2159_v41, %v2155_v33 }
0x1802   :  { %v2167_v6 = vpop.permute.xlu0 %2166 }
0x1803   :  { %v2169_v12 = vadd.f32 %v2167_v6, %v2163_v14 }
0x1805   :  { %2577 = vtanh.f32 %v2169_v12 }
0x180b   :  { %v2578_v3 = vpop.eup %2577 }
0x180c   :  { %v2171_v31 = vmul.f32 %v2578_v3, %v2160_v11 }
0x180e   :  { %2173 = vrot.lane.b32.xlu1 %v2171_v31, %s2741_s3 }
0x1816   :  { %1005 = vrot.lane.b32.xlu1 %v3280_v29, %s2742_s6  ;;  %v2199_v29 = vld [vmem:[%s3827_s7 + $0x18] sm:$0xff]  ;;  %s2743_s7 = smov [#allocation9]  }
0x1817   :  { %2219 = vmatpush.msra.mxu2 %v2199_v29 }
0x1819   :  { %2220 = vmatpush.msra.mxu2 %v2198_v61 }
0x181b   :  { %2221 = vmatpush.msra.mxu2 %v2197_v34 }
0x181d   :  { %2222 = vmatpush.msra.mxu2 %v2196_v35 }
0x181e   :  { %2178 = vrot.lane.b32.xlu1 %v2171_v31, %s2742_s6 }
0x1826   :  { %1011 = vrot.lane.b32.xlu1 %v3277_v22, %s2741_s3 }
0x182e   :  { %1015 = vrot.lane.b32.xlu1 %v3277_v22, %s2742_s6 }
0x1836   :  { %2184 = vrot.lane.b32.xlu1 %v2169_v12, %s2741_s3  ;;  %s2256_s3 = sshll.u32 %s2743_s7, 4  ;;  %s2257_s3 = int_to_ptr.vmem [resolvable:$true] %s2256_s3 }
0x1880   :  { %v2174_v36 = vpop.permute.xlu1 %2173 }
0x1881   :  { %2177 = vst.msk [vmem:[#allocation9 + $0x4] sm:$0x3] %vm1003_vm3, %v2174_v36  ;;  %v2195_v52 = vsel %vm110_vm7, %v2174_v36, %v3603_v44 }
0x1882   :  { %2374 = vmatmul.msk.f32.vlgmr.msra.gmra.mxu2 %vm204_vm11, %v2195_v52 }
0x1888   :  { %v1006_v59 = vpop.permute.xlu1 %1005 }
0x1889   :  { %1009 = vst.msk [vmem:[#allocation9 + $0x2] sm:$0x3] %vm1003_vm3, %v1006_v59 }
0x1890   :  { %v2179_v22 = vpop.permute.xlu1 %2178 }
0x1891   :  { %2182 = vst.msk [vmem:[#allocation9 + $0x6] sm:$0x3] %vm1003_vm3, %v2179_v22 }
0x1892   :  { %2264 = dma.vmem_to_hbm [thread:$0]  %s2257_s3, 128, %s2259_s15, [#allocation10], %s2742_s6, %s2742_s6, %s2744_s16  }
0x1898   :  { %v1012_v10 = vpop.permute.xlu1 %1011 }
0x1899   :  { %1014 = vst.msk [vmem:[#allocation11] sm:$0x3] %vm1003_vm3, %v1012_v10 }
0x18a0   :  { %v1016_v17 = vpop.permute.xlu1 %1015 }
0x18a1   :  { %1019 = vst.msk [vmem:[#allocation11 + $0x2] sm:$0x3] %vm1003_vm3, %v1016_v17 }
0x18a8   :  { %v2185_v37 = vpop.permute.xlu1 %2184 }
0x18a9   :  { %2188 = vst.msk [vmem:[#allocation11 + $0x4] sm:$0x3] %vm1003_vm3, %v2185_v37 }
0x1905   :  { %v2224_v30 = vpop.f32.mrf.mxu2 }
0x1906   :  { %v2228_v44 = vsel %vm2227_vm13, %v2224_v30, -inf }
0x1907   :  { %2229 = vmax.xlane.f32.xlu2 %v2228_v44 }
0x191f   :  { %2189 = vrot.lane.b32.xlu2 %v2169_v12, %s2742_s6 }
0x197a   :  { %v2230_v49 = vpop.xlane.xlu2 %2229 }
0x197b   :  { %v2231_v21 = vsub.f32 %v2224_v30, %v2230_v49 }
0x197d   :  { %v2232_v38 = vmul.f32 1.442695, %v2231_v21 }
0x197f   :  { %2579 = vpow2.f32 %v2232_v38 }
0x1982   :  { %v2190_v9 = vpop.permute.xlu2 %2189 }
0x1983   :  { %2193 = vst.msk [vmem:[#allocation11 + $0x6] sm:$0x3] %vm1003_vm3, %v2190_v9 }
0x1984   :  { %2277 = dma.vmem_to_hbm [thread:$0]  %s2270_s20, 128, %s2272_s19, [#allocation10], %s2742_s6, %s2742_s6, %s2744_s16  }
0x1985   :  { %v2580_v13 = vpop.eup %2579 }
0x1986   :  { %v2234_v40 = vsel %vm2227_vm13, %v2580_v13, 0.0 }
0x1987   :  { %2235 = vadd.xlane.f32.xlu0 %v2234_v40 }
0x19fa   :  { %v2236_v56 = vpop.xlane.xlu0 %2235 }
0x19fb   :  { %2581 = vlog2.f32 %v2236_v56 }
0x1a01   :  { %v2582_v20 = vpop.eup %2581 }
0x1a02   :  { %v2238_v24 = vmul.f32 0.6931472, %v2582_v20 }
0x1a04   :  { %v2239_v28 = vsub.f32 %v2231_v21, %v2238_v24 }
0x1a06   :  { %2240 = vst.msk [vmem:[#allocation8] sm:$0x3] %vm2227_vm13, %v2239_v28 }
0x1a07   :  { %2251 = dma.vmem_to_hbm [thread:$0]  %s2247_s21, 32, %s2249_s24, [#allocation4]  }
0x1a08   :  { %2731 = dma.done.wait [#allocation4], 32  }
0x1a09   :  { %2732 = vsyncadd [#allocation4], 4294967264 }
0x1a0a   :  { %2733 = dma.done.wait [#allocation10], 256  }
0x1a0b   :  { %2734 = vsyncadd [#allocation10], 4294967040 }
0x1a0c   :  { %2290 = vsyncpa [#allocation3], 1 }
0x1a0d   :  { %2291 = vsyncpa [#allocation6], 1 }
0x1a0e   :  { %2292 = vsyncpa [#allocation4], 1 }
0x1a0f   :  { %2293 = vsyncpa [#allocation10], 1 }

</bundles_post_ra>
